<compile_context>
chip_gen: v6e
topology: v6e:2x2x1
jax: 0.10.0
libtpu: 0.0.40
codegen_flags: <defaults>
</compile_context>

<pallas_src>
import jax
import jax.numpy as jnp
from jax import lax
from jax.experimental import pallas as pl
from jax.experimental.pallas import tpu as pltpu

HP = 128  # lane-aligned padded LSTM hidden size (real H = 50)


# ----------------------------------------------------------------------------
# Fused kernel
# ----------------------------------------------------------------------------
def fused_kernel(x_big_ref, w1_ref, b1m_ref, w2t_ref,
                 wih_t_ref, whh_t_ref, bl_ref, wf_t_ref, bf_ref,
                 out_ref, gin_ref):
    """conv1 -> conv2 -> LSTM (last hidden) -> fused dense -> log_softmax.

    x_big_ref:  ((L1+2)*B, K*C_in)  conv1 taps concatenated along contraction
                                    dim, row = time*B + b, boundary rows zero
    w1_ref:     (K*C_in, 16)        conv1 weights, taps stacked on contraction
    b1m_ref:    ((L1+2)*B, 16)      conv1 bias matrix (zero on boundary rows)
    w2t_ref:    (K, 16, 32)         conv2 per-tap weights, transposed
    wih_t_ref:  (32, 4*Hp)          W_ih^T, per-gate zero-padded 50 -> Hp
    whh_t_ref:  (Hp, 4*Hp)          W_hh^T, per-gate zero-padded
    bl_ref:     (1, 4*Hp)           b_ih + b_hh + conv2_b@W_ih^T, gate-padded
    wf_t_ref:   (Hp, C)             (d2_w @ d1_w)^T, rows >= 50 zero
    bf_ref:     (1, C)              d2_w @ d1_b + d2_b
    out_ref:    (B, C)              log-probabilities
    gin_ref:    (T*B, 4*Hp)         scratch: hoisted input-gate projections
    """
    batch = out_ref.shape[0]
    k_taps = w2t_ref.shape[0]
    c2 = w2t_ref.shape[2]
    tb, g4 = gin_ref.shape
    t_steps = tb // batch
    hp = g4 // 4

    # ---- conv1: ONE MXU matmul over all (time, batch) rows and all taps ----
    # y1p row j*B+b = conv1 output at (batch b, time j-1), channels-last.
    # Rows for j=0 and j=L1+1 are exactly zero (taps & bias pre-masked), which
    # realizes conv2's zero padding with no in-kernel pad / concat / offset
    # stores.
    y1p = jnp.dot(x_big_ref[...], w1_ref[...],
                  preferred_element_type=jnp.float32) + b1m_ref[...]

    # ---- conv2: tap windows are static row (sublane) slices of y1p --------
    # (conv2 bias already folded through W_ih into bl in the wrapper)
    y2 = jnp.zeros((tb, c2), jnp.float32)
    for k in range(k_taps):                                # static unroll K=5
        y2 = y2 + jnp.dot(y1p[k * batch:(k + t_steps) * batch, :], w2t_ref[k],
                          preferred_element_type=jnp.float32)

    # ---- LSTM input projection hoisted out of the recurrence --------------
    gin_ref[...] = (jnp.dot(y2, wih_t_ref[...],
                            preferred_element_type=jnp.float32) + bl_ref[...])

    # ---- LSTM recurrence: only h @ W_hh^T remains on the serial chain -----
    whh_t = whh_t_ref[...]                                 # hoisted (loop-inv)
    h = jnp.zeros((batch, hp), jnp.float32)
    c = jnp.zeros((batch, hp), jnp.float32)
    for t in range(t_steps):                               # static slices
        gates = gin_ref[t * batch:(t + 1) * batch, :] + jnp.dot(
            h, whh_t, preferred_element_type=jnp.float32)
        i = jax.nn.sigmoid(gates[:, 0 * hp:1 * hp])        # lane-aligned slices
        f = jax.nn.sigmoid(gates[:, 1 * hp:2 * hp])
        g = jnp.tanh(gates[:, 2 * hp:3 * hp])
        o = jax.nn.sigmoid(gates[:, 3 * hp:4 * hp])
        c = f * c + i * g
        h = o * jnp.tanh(c)

    # ---- fused dense1∘dense2 + log_softmax --------------------------------
    z = jnp.dot(h, wf_t_ref[...],
                preferred_element_type=jnp.float32) + bf_ref[...]
    m = jnp.max(z, axis=1, keepdims=True)
    lse = m + jnp.log(jnp.sum(jnp.exp(z - m), axis=1, keepdims=True))
    out_ref[...] = z - lse


# ----------------------------------------------------------------------------
# Wrapper: trace-time layout plumbing (tap concat, gate padding, bias folds)
# ----------------------------------------------------------------------------
def _prep(x, p, hp):
    B, C_in, L = x.shape
    C1, _, K = p["conv1_w"].shape                 # (16, C_in, 5)
    C2 = p["conv2_w"].shape[0]                    # 32
    H = p["w_hh"].shape[1]                        # 50
    C = p["d2_w"].shape[0]                        # num_classes
    L1 = L + 2 - K + 1                            # conv1 output length (pad=1)
    T = L1 + 2 - K + 1                            # conv2 output length == steps
    assert T >= 1 and H <= hp

    # channels-last, time-major, batch-interleaved rows: row = time*B + b
    x_cl = jnp.pad(jnp.transpose(x, (2, 0, 1)), ((1, 1), (0, 0), (0, 0)))
    # pre-shifted conv1 taps over an extended (L1+2) range; the two boundary
    # time rows are zero so they directly serve as conv2's zero padding.
    x_taps = jnp.stack([x_cl[k:k + L1] for k in range(K)], axis=0)
    x_taps = jnp.pad(x_taps, ((0, 0), (1, 1), (0, 0), (0, 0)))   # (K,L1+2,B,Cin)
    # concat taps along contraction dim -> conv1 becomes ONE matmul
    x_big = jnp.transpose(x_taps, (1, 2, 0, 3)).reshape((L1 + 2) * B, K * C_in)
    w1 = jnp.transpose(p["conv1_w"], (2, 1, 0)).reshape(K * C_in, C1)
    b1m = jnp.zeros((L1 + 2, B, C1), jnp.float32).at[1:L1 + 1].set(p["conv1_b"])
    b1m = b1m.reshape((L1 + 2) * B, C1)

    w2t = jnp.transpose(p["conv2_w"], (2, 1, 0))  # (K, 16, 32)

    # LSTM weights zero-padded per gate from H -> hp (padded h/c stay zero).
    wih = jnp.zeros((4, hp, C2), jnp.float32).at[:, :H, :].set(
        p["w_ih"].reshape(4, H, C2)).reshape(4 * hp, C2)
    whh = jnp.zeros((4, hp, hp), jnp.float32).at[:, :H, :H].set(
        p["w_hh"].reshape(4, H, H)).reshape(4 * hp, hp)
    bl = jnp.zeros((4, hp), jnp.float32).at[:, :H].set(
        (p["b_ih"] + p["b_hh"]).reshape(4, H)).reshape(1, 4 * hp)
    wih_t = wih.T                                 # (32, 4*hp)
    # fold conv2 bias through W_ih into the LSTM gate bias (exact, all linear)
    bl = bl + p["conv2_b"].reshape(1, C2) @ wih_t

    # dense1 -> dense2 has no activation between them: exact fold.
    wf = p["d2_w"] @ p["d1_w"]                    # (C, H)
    bf = (p["d1_b"] @ p["d2_w"].T + p["d2_b"]).reshape(1, C)
    wf_t = jnp.zeros((hp, C), jnp.float32).at[:H, :].set(wf.T)

    args = (x_big, w1, b1m, w2t, wih_t, whh.T, bl, wf_t, bf)
    return args, B, C, T


@jax.jit
def conv1d_lstm_forward(x, params):
    args, B, C, T = _prep(x, params, HP)
    vmem = pl.BlockSpec(memory_space=pltpu.MemorySpace.VMEM)
    return pl.pallas_call(
        fused_kernel,
        out_shape=jax.ShapeDtypeStruct((B, C), jnp.float32),
        in_specs=[vmem] * len(args),
        out_specs=vmem,
        scratch_shapes=[pltpu.VMEM((T * B, 4 * HP), jnp.float32)],
    )(*args)


# ----------------------------------------------------------------------------
# Pure-JAX reference (sanity check of the Pallas kernel)
# ----------------------------------------------------------------------------
def ref_forward(x, p):
    dn = ("NCH", "OIH", "NCH")
    y = lax.conv_general_dilated(x, p["conv1_w"], (1,), [(1, 1)],
                                 dimension_numbers=dn) + p["conv1_b"][None, :, None]
    y = lax.conv_general_dilated(y, p["conv2_w"], (1,), [(1, 1)],
                                 dimension_numbers=dn) + p["conv2_b"][None, :, None]
    seq = jnp.transpose(y, (0, 2, 1))             # (B, T, 32)
    B, T, _ = seq.shape
    H = p["w_hh"].shape[1]
    h = jnp.zeros((B, H), jnp.float32)
    c = jnp.zeros((B, H), jnp.float32)
    bias = p["b_ih"] + p["b_hh"]
    for t in range(T):
        gates = seq[:, t, :] @ p["w_ih"].T + h @ p["w_hh"].T + bias
        i = jax.nn.sigmoid(gates[:, 0 * H:1 * H])
        f = jax.nn.sigmoid(gates[:, 1 * H:2 * H])
        g = jnp.tanh(gates[:, 2 * H:3 * H])
        o = jax.nn.sigmoid(gates[:, 3 * H:4 * H])
        c = f * c + i * g
        h = o * jnp.tanh(c)
    z = h @ p["d1_w"].T + p["d1_b"]
    z = z @ p["d2_w"].T + p["d2_b"]
    return jax.nn.log_softmax(z, axis=1)


# ----------------------------------------------------------------------------
# Main
# ----------------------------------------------------------------------------
if __name__ == "__main__":
    # Small shapes consistent with the module (in_channels / num_classes are
    # constructor args; conv widths 16/32 and LSTM hidden 50 are hard-coded).
    B, C_IN, L, NUM_CLASSES, H = 2, 8, 16, 10, 50

    keys = jax.random.split(jax.random.PRNGKey(0), 13)
    s = 0.1
    params = {
        "conv1_w": s * jax.random.normal(keys[1], (16, C_IN, 5), jnp.float32),
        "conv1_b": s * jax.random.normal(keys[2], (16,), jnp.float32),
        "conv2_w": s * jax.random.normal(keys[3], (32, 16, 5), jnp.float32),
        "conv2_b": s * jax.random.normal(keys[4], (32,), jnp.float32),
        "w_ih":    s * jax.random.normal(keys[5], (4 * H, 32), jnp.float32),
        "w_hh":    s * jax.random.normal(keys[6], (4 * H, H), jnp.float32),
        "b_ih":    s * jax.random.normal(keys[7], (4 * H,), jnp.float32),
        "b_hh":    s * jax.random.normal(keys[8], (4 * H,), jnp.float32),
        "d1_w":    s * jax.random.normal(keys[9], (32, H), jnp.float32),
        "d1_b":    s * jax.random.normal(keys[10], (32,), jnp.float32),
        "d2_w":    s * jax.random.normal(keys[11], (NUM_CLASSES, 32), jnp.float32),
        "d2_b":    s * jax.random.normal(keys[12], (NUM_CLASSES,), jnp.float32),
    }
    x = jax.random.normal(keys[0], (B, C_IN, L), jnp.float32)

    out = jax.block_until_ready(conv1d_lstm_forward(x, params))
    assert out.shape == (B, NUM_CLASSES) and out.dtype == jnp.float32
    assert bool(jnp.all(jnp.isfinite(out)))

    ref = ref_forward(x, params)
    err = float(jnp.max(jnp.abs(out - ref)))
    assert jnp.allclose(out, ref, atol=2e-2, rtol=2e-2), f"mismatch: {err}"

    print("KERNEL_OK")
</pallas_src>

<mosaic_0001>
module attributes {stable_mosaic.version = 11 : i64} {
  func.func @fused_kernel(%arg0: memref<32x40xf32, #tpu.memory_space<vmem>>, %arg1: memref<40x16xf32, #tpu.memory_space<vmem>>, %arg2: memref<32x16xf32, #tpu.memory_space<vmem>>, %arg3: memref<5x16x32xf32, #tpu.memory_space<vmem>>, %arg4: memref<32x512xf32, #tpu.memory_space<vmem>>, %arg5: memref<128x512xf32, #tpu.memory_space<vmem>>, %arg6: memref<1x512xf32, #tpu.memory_space<vmem>>, %arg7: memref<128x10xf32, #tpu.memory_space<vmem>>, %arg8: memref<1x10xf32, #tpu.memory_space<vmem>>, %arg9: memref<2x10xf32, #tpu.memory_space<vmem>>, %arg10: memref<24x512xf32, #tpu.memory_space<vmem>>) attributes {dimension_semantics = [], scalar_prefetch = 0 : i64, scratch_operands = 1 : i64, tpu.core_type = #tpu.core_type<tc>} {
    %c0 = arith.constant 0 : index
    %c0_0 = arith.constant 0 : index
    %0 = vector.load %arg0[%c0, %c0_0] : memref<32x40xf32, #tpu.memory_space<vmem>>, vector<32x40xf32>
    %c0_1 = arith.constant 0 : index
    %c0_2 = arith.constant 0 : index
    %1 = vector.load %arg1[%c0_1, %c0_2] : memref<40x16xf32, #tpu.memory_space<vmem>>, vector<40x16xf32>
    %cst = arith.constant dense<0.000000e+00> : vector<32x16xf32>
    %2 = tpu.matmul %0, %1, %cst {dimension_numbers = #tpu.dot_dimension_numbers<[1], [0], [0], [1], [0, 0, 1, 1], [], []>} : vector<32x40xf32>, vector<40x16xf32>, vector<32x16xf32> -> vector<32x16xf32>
    %c0_3 = arith.constant 0 : index
    %c0_4 = arith.constant 0 : index
    %3 = vector.load %arg2[%c0_3, %c0_4] : memref<32x16xf32, #tpu.memory_space<vmem>>, vector<32x16xf32>
    %4 = arith.addf %2, %3 : vector<32x16xf32>
    %cst_5 = arith.constant 0.000000e+00 : f32
    %5 = vector.broadcast %cst_5 : f32 to vector<24x32xf32>
    %6 = vector.extract_strided_slice %4 {offsets = [0, 0], sizes = [24, 16], strides = [1, 1]} : vector<32x16xf32> to vector<24x16xf32>
    %c0_6 = arith.constant 0 : index
    %c0_7 = arith.constant 0 : index
    %c0_8 = arith.constant 0 : index
    %7 = vector.load %arg3[%c0_6, %c0_7, %c0_8] : memref<5x16x32xf32, #tpu.memory_space<vmem>>, vector<1x16x32xf32>
    %8 = vector.shape_cast %7 : vector<1x16x32xf32> to vector<16x32xf32>
    %cst_9 = arith.constant dense<0.000000e+00> : vector<24x32xf32>
    %9 = tpu.matmul %6, %8, %cst_9 {dimension_numbers = #tpu.dot_dimension_numbers<[1], [0], [0], [1], [0, 0, 1, 1], [], []>} : vector<24x16xf32>, vector<16x32xf32>, vector<24x32xf32> -> vector<24x32xf32>
    %10 = arith.addf %5, %9 : vector<24x32xf32>
    %11 = vector.extract_strided_slice %4 {offsets = [2, 0], sizes = [24, 16], strides = [1, 1]} : vector<32x16xf32> to vector<24x16xf32>
    %c1 = arith.constant 1 : index
    %c0_10 = arith.constant 0 : index
    %c0_11 = arith.constant 0 : index
    %12 = vector.load %arg3[%c1, %c0_10, %c0_11] : memref<5x16x32xf32, #tpu.memory_space<vmem>>, vector<1x16x32xf32>
    %13 = vector.shape_cast %12 : vector<1x16x32xf32> to vector<16x32xf32>
    %cst_12 = arith.constant dense<0.000000e+00> : vector<24x32xf32>
    %14 = tpu.matmul %11, %13, %cst_12 {dimension_numbers = #tpu.dot_dimension_numbers<[1], [0], [0], [1], [0, 0, 1, 1], [], []>} : vector<24x16xf32>, vector<16x32xf32>, vector<24x32xf32> -> vector<24x32xf32>
    %15 = arith.addf %10, %14 : vector<24x32xf32>
    %16 = vector.extract_strided_slice %4 {offsets = [4, 0], sizes = [24, 16], strides = [1, 1]} : vector<32x16xf32> to vector<24x16xf32>
    %c2 = arith.constant 2 : index
    %c0_13 = arith.constant 0 : index
    %c0_14 = arith.constant 0 : index
    %17 = vector.load %arg3[%c2, %c0_13, %c0_14] : memref<5x16x32xf32, #tpu.memory_space<vmem>>, vector<1x16x32xf32>
    %18 = vector.shape_cast %17 : vector<1x16x32xf32> to vector<16x32xf32>
    %cst_15 = arith.constant dense<0.000000e+00> : vector<24x32xf32>
    %19 = tpu.matmul %16, %18, %cst_15 {dimension_numbers = #tpu.dot_dimension_numbers<[1], [0], [0], [1], [0, 0, 1, 1], [], []>} : vector<24x16xf32>, vector<16x32xf32>, vector<24x32xf32> -> vector<24x32xf32>
    %20 = arith.addf %15, %19 : vector<24x32xf32>
    %21 = vector.extract_strided_slice %4 {offsets = [6, 0], sizes = [24, 16], strides = [1, 1]} : vector<32x16xf32> to vector<24x16xf32>
    %c3 = arith.constant 3 : index
    %c0_16 = arith.constant 0 : index
    %c0_17 = arith.constant 0 : index
    %22 = vector.load %arg3[%c3, %c0_16, %c0_17] : memref<5x16x32xf32, #tpu.memory_space<vmem>>, vector<1x16x32xf32>
    %23 = vector.shape_cast %22 : vector<1x16x32xf32> to vector<16x32xf32>
    %cst_18 = arith.constant dense<0.000000e+00> : vector<24x32xf32>
    %24 = tpu.matmul %21, %23, %cst_18 {dimension_numbers = #tpu.dot_dimension_numbers<[1], [0], [0], [1], [0, 0, 1, 1], [], []>} : vector<24x16xf32>, vector<16x32xf32>, vector<24x32xf32> -> vector<24x32xf32>
    %25 = arith.addf %20, %24 : vector<24x32xf32>
    %26 = vector.extract_strided_slice %4 {offsets = [8, 0], sizes = [24, 16], strides = [1, 1]} : vector<32x16xf32> to vector<24x16xf32>
    %c4 = arith.constant 4 : index
    %c0_19 = arith.constant 0 : index
    %c0_20 = arith.constant 0 : index
    %27 = vector.load %arg3[%c4, %c0_19, %c0_20] : memref<5x16x32xf32, #tpu.memory_space<vmem>>, vector<1x16x32xf32>
    %28 = vector.shape_cast %27 : vector<1x16x32xf32> to vector<16x32xf32>
    %cst_21 = arith.constant dense<0.000000e+00> : vector<24x32xf32>
    %29 = tpu.matmul %26, %28, %cst_21 {dimension_numbers = #tpu.dot_dimension_numbers<[1], [0], [0], [1], [0, 0, 1, 1], [], []>} : vector<24x16xf32>, vector<16x32xf32>, vector<24x32xf32> -> vector<24x32xf32>
    %30 = arith.addf %25, %29 : vector<24x32xf32>
    %c0_22 = arith.constant 0 : index
    %c0_23 = arith.constant 0 : index
    %31 = vector.load %arg4[%c0_22, %c0_23] : memref<32x512xf32, #tpu.memory_space<vmem>>, vector<32x512xf32>
    %cst_24 = arith.constant dense<0.000000e+00> : vector<24x512xf32>
    %32 = tpu.matmul %30, %31, %cst_24 {dimension_numbers = #tpu.dot_dimension_numbers<[1], [0], [0], [1], [0, 0, 1, 1], [], []>} : vector<24x32xf32>, vector<32x512xf32>, vector<24x512xf32> -> vector<24x512xf32>
    %c0_25 = arith.constant 0 : index
    %c0_26 = arith.constant 0 : index
    %33 = vector.load %arg6[%c0_25, %c0_26] : memref<1x512xf32, #tpu.memory_space<vmem>>, vector<1x512xf32>
    %34 = vector.broadcast %33 : vector<1x512xf32> to vector<24x512xf32>
    %35 = arith.addf %32, %34 : vector<24x512xf32>
    %c0_27 = arith.constant 0 : index
    %c0_28 = arith.constant 0 : index
    %36 = vector.load %arg10[%c0_27, %c0_28] : memref<24x512xf32, #tpu.memory_space<vmem>>, vector<24x512xf32>
    tpu.vector_store %arg10[%c0_27, %c0_28], %35 {strides = array<i32>} : memref<24x512xf32, #tpu.memory_space<vmem>>, vector<24x512xf32>,
    %c0_29 = arith.constant 0 : index
    %c0_30 = arith.constant 0 : index
    %37 = vector.load %arg5[%c0_29, %c0_30] : memref<128x512xf32, #tpu.memory_space<vmem>>, vector<128x512xf32>
    %cst_31 = arith.constant 0.000000e+00 : f32
    %38 = vector.broadcast %cst_31 : f32 to vector<2x128xf32>
    %cst_32 = arith.constant 0.000000e+00 : f32
    %39 = vector.broadcast %cst_32 : f32 to vector<2x128xf32>
    %c0_33 = arith.constant 0 : index
    %c0_34 = arith.constant 0 : index
    %40 = vector.load %arg10[%c0_33, %c0_34] : memref<24x512xf32, #tpu.memory_space<vmem>>, vector<2x512xf32>
    %cst_35 = arith.constant dense<0.000000e+00> : vector<2x512xf32>
    %41 = tpu.matmul %38, %37, %cst_35 {dimension_numbers = #tpu.dot_dimension_numbers<[1], [0], [0], [1], [0, 0, 1, 1], [], []>} : vector<2x128xf32>, vector<128x512xf32>, vector<2x512xf32> -> vector<2x512xf32>
    %42 = arith.addf %40, %41 : vector<2x512xf32>
    %43 = vector.extract_strided_slice %42 {offsets = [0, 0], sizes = [2, 128], strides = [1, 1]} : vector<2x512xf32> to vector<2x128xf32>
    %44 = arith.negf %43 : vector<2x128xf32>
    %45 = math.exp %44 : vector<2x128xf32>
    %cst_36 = arith.constant 1.000000e+00 : f32
    %46 = vector.broadcast %cst_36 : f32 to vector<2x128xf32>
    %47 = arith.addf %46, %45 : vector<2x128xf32>
    %48 = arith.divf %46, %47 : vector<2x128xf32>
    %49 = vector.extract_strided_slice %42 {offsets = [0, 128], sizes = [2, 128], strides = [1, 1]} : vector<2x512xf32> to vector<2x128xf32>
    %50 = arith.negf %49 : vector<2x128xf32>
    %51 = math.exp %50 : vector<2x128xf32>
    %cst_37 = arith.constant 1.000000e+00 : f32
    %52 = vector.broadcast %cst_37 : f32 to vector<2x128xf32>
    %53 = arith.addf %52, %51 : vector<2x128xf32>
    %54 = arith.divf %52, %53 : vector<2x128xf32>
    %55 = vector.extract_strided_slice %42 {offsets = [0, 256], sizes = [2, 128], strides = [1, 1]} : vector<2x512xf32> to vector<2x128xf32>
    %56 = math.tanh %55 : vector<2x128xf32>
    %57 = vector.extract_strided_slice %42 {offsets = [0, 384], sizes = [2, 128], strides = [1, 1]} : vector<2x512xf32> to vector<2x128xf32>
    %58 = arith.negf %57 : vector<2x128xf32>
    %59 = math.exp %58 : vector<2x128xf32>
    %cst_38 = arith.constant 1.000000e+00 : f32
    %60 = vector.broadcast %cst_38 : f32 to vector<2x128xf32>
    %61 = arith.addf %60, %59 : vector<2x128xf32>
    %62 = arith.divf %60, %61 : vector<2x128xf32>
    %63 = arith.mulf %54, %39 : vector<2x128xf32>
    %64 = arith.mulf %48, %56 : vector<2x128xf32>
    %65 = arith.addf %63, %64 : vector<2x128xf32>
    %66 = math.tanh %65 : vector<2x128xf32>
    %67 = arith.mulf %62, %66 : vector<2x128xf32>
    %c2_39 = arith.constant 2 : index
    %c0_40 = arith.constant 0 : index
    %68 = vector.load %arg10[%c2_39, %c0_40] : memref<24x512xf32, #tpu.memory_space<vmem>>, vector<2x512xf32>
    %cst_41 = arith.constant dense<0.000000e+00> : vector<2x512xf32>
    %69 = tpu.matmul %67, %37, %cst_41 {dimension_numbers = #tpu.dot_dimension_numbers<[1], [0], [0], [1], [0, 0, 1, 1], [], []>} : vector<2x128xf32>, vector<128x512xf32>, vector<2x512xf32> -> vector<2x512xf32>
    %70 = arith.addf %68, %69 : vector<2x512xf32>
    %71 = vector.extract_strided_slice %70 {offsets = [0, 0], sizes = [2, 128], strides = [1, 1]} : vector<2x512xf32> to vector<2x128xf32>
    %72 = arith.negf %71 : vector<2x128xf32>
    %73 = math.exp %72 : vector<2x128xf32>
    %cst_42 = arith.constant 1.000000e+00 : f32
    %74 = vector.broadcast %cst_42 : f32 to vector<2x128xf32>
    %75 = arith.addf %74, %73 : vector<2x128xf32>
    %76 = arith.divf %74, %75 : vector<2x128xf32>
    %77 = vector.extract_strided_slice %70 {offsets = [0, 128], sizes = [2, 128], strides = [1, 1]} : vector<2x512xf32> to vector<2x128xf32>
    %78 = arith.negf %77 : vector<2x128xf32>
    %79 = math.exp %78 : vector<2x128xf32>
    %cst_43 = arith.constant 1.000000e+00 : f32
    %80 = vector.broadcast %cst_43 : f32 to vector<2x128xf32>
    %81 = arith.addf %80, %79 : vector<2x128xf32>
    %82 = arith.divf %80, %81 : vector<2x128xf32>
    %83 = vector.extract_strided_slice %70 {offsets = [0, 256], sizes = [2, 128], strides = [1, 1]} : vector<2x512xf32> to vector<2x128xf32>
    %84 = math.tanh %83 : vector<2x128xf32>
    %85 = vector.extract_strided_slice %70 {offsets = [0, 384], sizes = [2, 128], strides = [1, 1]} : vector<2x512xf32> to vector<2x128xf32>
    %86 = arith.negf %85 : vector<2x128xf32>
    %87 = math.exp %86 : vector<2x128xf32>
    %cst_44 = arith.constant 1.000000e+00 : f32
    %88 = vector.broadcast %cst_44 : f32 to vector<2x128xf32>
    %89 = arith.addf %88, %87 : vector<2x128xf32>
    %90 = arith.divf %88, %89 : vector<2x128xf32>
    %91 = arith.mulf %82, %65 : vector<2x128xf32>
    %92 = arith.mulf %76, %84 : vector<2x128xf32>
    %93 = arith.addf %91, %92 : vector<2x128xf32>
    %94 = math.tanh %93 : vector<2x128xf32>
    %95 = arith.mulf %90, %94 : vector<2x128xf32>
    %c4_45 = arith.constant 4 : index
    %c0_46 = arith.constant 0 : index
    %96 = vector.load %arg10[%c4_45, %c0_46] : memref<24x512xf32, #tpu.memory_space<vmem>>, vector<2x512xf32>
    %cst_47 = arith.constant dense<0.000000e+00> : vector<2x512xf32>
    %97 = tpu.matmul %95, %37, %cst_47 {dimension_numbers = #tpu.dot_dimension_numbers<[1], [0], [0], [1], [0, 0, 1, 1], [], []>} : vector<2x128xf32>, vector<128x512xf32>, vector<2x512xf32> -> vector<2x512xf32>
    %98 = arith.addf %96, %97 : vector<2x512xf32>
    %99 = vector.extract_strided_slice %98 {offsets = [0, 0], sizes = [2, 128], strides = [1, 1]} : vector<2x512xf32> to vector<2x128xf32>
    %100 = arith.negf %99 : vector<2x128xf32>
    %101 = math.exp %100 : vector<2x128xf32>
    %cst_48 = arith.constant 1.000000e+00 : f32
    %102 = vector.broadcast %cst_48 : f32 to vector<2x128xf32>
    %103 = arith.addf %102, %101 : vector<2x128xf32>
    %104 = arith.divf %102, %103 : vector<2x128xf32>
    %105 = vector.extract_strided_slice %98 {offsets = [0, 128], sizes = [2, 128], strides = [1, 1]} : vector<2x512xf32> to vector<2x128xf32>
    %106 = arith.negf %105 : vector<2x128xf32>
    %107 = math.exp %106 : vector<2x128xf32>
    %cst_49 = arith.constant 1.000000e+00 : f32
    %108 = vector.broadcast %cst_49 : f32 to vector<2x128xf32>
    %109 = arith.addf %108, %107 : vector<2x128xf32>
    %110 = arith.divf %108, %109 : vector<2x128xf32>
    %111 = vector.extract_strided_slice %98 {offsets = [0, 256], sizes = [2, 128], strides = [1, 1]} : vector<2x512xf32> to vector<2x128xf32>
    %112 = math.tanh %111 : vector<2x128xf32>
    %113 = vector.extract_strided_slice %98 {offsets = [0, 384], sizes = [2, 128], strides = [1, 1]} : vector<2x512xf32> to vector<2x128xf32>
    %114 = arith.negf %113 : vector<2x128xf32>
    %115 = math.exp %114 : vector<2x128xf32>
    %cst_50 = arith.constant 1.000000e+00 : f32
    %116 = vector.broadcast %cst_50 : f32 to vector<2x128xf32>
    %117 = arith.addf %116, %115 : vector<2x128xf32>
    %118 = arith.divf %116, %117 : vector<2x128xf32>
    %119 = arith.mulf %110, %93 : vector<2x128xf32>
    %120 = arith.mulf %104, %112 : vector<2x128xf32>
    %121 = arith.addf %119, %120 : vector<2x128xf32>
    %122 = math.tanh %121 : vector<2x128xf32>
    %123 = arith.mulf %118, %122 : vector<2x128xf32>
    %c6 = arith.constant 6 : index
    %c0_51 = arith.constant 0 : index
    %124 = vector.load %arg10[%c6, %c0_51] : memref<24x512xf32, #tpu.memory_space<vmem>>, vector<2x512xf32>
    %cst_52 = arith.constant dense<0.000000e+00> : vector<2x512xf32>
    %125 = tpu.matmul %123, %37, %cst_52 {dimension_numbers = #tpu.dot_dimension_numbers<[1], [0], [0], [1], [0, 0, 1, 1], [], []>} : vector<2x128xf32>, vector<128x512xf32>, vector<2x512xf32> -> vector<2x512xf32>
    %126 = arith.addf %124, %125 : vector<2x512xf32>
    %127 = vector.extract_strided_slice %126 {offsets = [0, 0], sizes = [2, 128], strides = [1, 1]} : vector<2x512xf32> to vector<2x128xf32>
    %128 = arith.negf %127 : vector<2x128xf32>
    %129 = math.exp %128 : vector<2x128xf32>
    %cst_53 = arith.constant 1.000000e+00 : f32
    %130 = vector.broadcast %cst_53 : f32 to vector<2x128xf32>
    %131 = arith.addf %130, %129 : vector<2x128xf32>
    %132 = arith.divf %130, %131 : vector<2x128xf32>
    %133 = vector.extract_strided_slice %126 {offsets = [0, 128], sizes = [2, 128], strides = [1, 1]} : vector<2x512xf32> to vector<2x128xf32>
    %134 = arith.negf %133 : vector<2x128xf32>
    %135 = math.exp %134 : vector<2x128xf32>
    %cst_54 = arith.constant 1.000000e+00 : f32
    %136 = vector.broadcast %cst_54 : f32 to vector<2x128xf32>
    %137 = arith.addf %136, %135 : vector<2x128xf32>
    %138 = arith.divf %136, %137 : vector<2x128xf32>
    %139 = vector.extract_strided_slice %126 {offsets = [0, 256], sizes = [2, 128], strides = [1, 1]} : vector<2x512xf32> to vector<2x128xf32>
    %140 = math.tanh %139 : vector<2x128xf32>
    %141 = vector.extract_strided_slice %126 {offsets = [0, 384], sizes = [2, 128], strides = [1, 1]} : vector<2x512xf32> to vector<2x128xf32>
    %142 = arith.negf %141 : vector<2x128xf32>
    %143 = math.exp %142 : vector<2x128xf32>
    %cst_55 = arith.constant 1.000000e+00 : f32
    %144 = vector.broadcast %cst_55 : f32 to vector<2x128xf32>
    %145 = arith.addf %144, %143 : vector<2x128xf32>
    %146 = arith.divf %144, %145 : vector<2x128xf32>
    %147 = arith.mulf %138, %121 : vector<2x128xf32>
    %148 = arith.mulf %132, %140 : vector<2x128xf32>
    %149 = arith.addf %147, %148 : vector<2x128xf32>
    %150 = math.tanh %149 : vector<2x128xf32>
    %151 = arith.mulf %146, %150 : vector<2x128xf32>
    %c8 = arith.constant 8 : index
    %c0_56 = arith.constant 0 : index
    %152 = vector.load %arg10[%c8, %c0_56] : memref<24x512xf32, #tpu.memory_space<vmem>>, vector<2x512xf32>
    %cst_57 = arith.constant dense<0.000000e+00> : vector<2x512xf32>
    %153 = tpu.matmul %151, %37, %cst_57 {dimension_numbers = #tpu.dot_dimension_numbers<[1], [0], [0], [1], [0, 0, 1, 1], [], []>} : vector<2x128xf32>, vector<128x512xf32>, vector<2x512xf32> -> vector<2x512xf32>
    %154 = arith.addf %152, %153 : vector<2x512xf32>
    %155 = vector.extract_strided_slice %154 {offsets = [0, 0], sizes = [2, 128], strides = [1, 1]} : vector<2x512xf32> to vector<2x128xf32>
    %156 = arith.negf %155 : vector<2x128xf32>
    %157 = math.exp %156 : vector<2x128xf32>
    %cst_58 = arith.constant 1.000000e+00 : f32
    %158 = vector.broadcast %cst_58 : f32 to vector<2x128xf32>
    %159 = arith.addf %158, %157 : vector<2x128xf32>
    %160 = arith.divf %158, %159 : vector<2x128xf32>
    %161 = vector.extract_strided_slice %154 {offsets = [0, 128], sizes = [2, 128], strides = [1, 1]} : vector<2x512xf32> to vector<2x128xf32>
    %162 = arith.negf %161 : vector<2x128xf32>
    %163 = math.exp %162 : vector<2x128xf32>
    %cst_59 = arith.constant 1.000000e+00 : f32
    %164 = vector.broadcast %cst_59 : f32 to vector<2x128xf32>
    %165 = arith.addf %164, %163 : vector<2x128xf32>
    %166 = arith.divf %164, %165 : vector<2x128xf32>
    %167 = vector.extract_strided_slice %154 {offsets = [0, 256], sizes = [2, 128], strides = [1, 1]} : vector<2x512xf32> to vector<2x128xf32>
    %168 = math.tanh %167 : vector<2x128xf32>
    %169 = vector.extract_strided_slice %154 {offsets = [0, 384], sizes = [2, 128], strides = [1, 1]} : vector<2x512xf32> to vector<2x128xf32>
    %170 = arith.negf %169 : vector<2x128xf32>
    %171 = math.exp %170 : vector<2x128xf32>
    %cst_60 = arith.constant 1.000000e+00 : f32
    %172 = vector.broadcast %cst_60 : f32 to vector<2x128xf32>
    %173 = arith.addf %172, %171 : vector<2x128xf32>
    %174 = arith.divf %172, %173 : vector<2x128xf32>
    %175 = arith.mulf %166, %149 : vector<2x128xf32>
    %176 = arith.mulf %160, %168 : vector<2x128xf32>
    %177 = arith.addf %175, %176 : vector<2x128xf32>
    %178 = math.tanh %177 : vector<2x128xf32>
    %179 = arith.mulf %174, %178 : vector<2x128xf32>
    %c10 = arith.constant 10 : index
    %c0_61 = arith.constant 0 : index
    %180 = vector.load %arg10[%c10, %c0_61] : memref<24x512xf32, #tpu.memory_space<vmem>>, vector<2x512xf32>
    %cst_62 = arith.constant dense<0.000000e+00> : vector<2x512xf32>
    %181 = tpu.matmul %179, %37, %cst_62 {dimension_numbers = #tpu.dot_dimension_numbers<[1], [0], [0], [1], [0, 0, 1, 1], [], []>} : vector<2x128xf32>, vector<128x512xf32>, vector<2x512xf32> -> vector<2x512xf32>
    %182 = arith.addf %180, %181 : vector<2x512xf32>
    %183 = vector.extract_strided_slice %182 {offsets = [0, 0], sizes = [2, 128], strides = [1, 1]} : vector<2x512xf32> to vector<2x128xf32>
    %184 = arith.negf %183 : vector<2x128xf32>
    %185 = math.exp %184 : vector<2x128xf32>
    %cst_63 = arith.constant 1.000000e+00 : f32
    %186 = vector.broadcast %cst_63 : f32 to vector<2x128xf32>
    %187 = arith.addf %186, %185 : vector<2x128xf32>
    %188 = arith.divf %186, %187 : vector<2x128xf32>
    %189 = vector.extract_strided_slice %182 {offsets = [0, 128], sizes = [2, 128], strides = [1, 1]} : vector<2x512xf32> to vector<2x128xf32>
    %190 = arith.negf %189 : vector<2x128xf32>
    %191 = math.exp %190 : vector<2x128xf32>
    %cst_64 = arith.constant 1.000000e+00 : f32
    %192 = vector.broadcast %cst_64 : f32 to vector<2x128xf32>
    %193 = arith.addf %192, %191 : vector<2x128xf32>
    %194 = arith.divf %192, %193 : vector<2x128xf32>
    %195 = vector.extract_strided_slice %182 {offsets = [0, 256], sizes = [2, 128], strides = [1, 1]} : vector<2x512xf32> to vector<2x128xf32>
    %196 = math.tanh %195 : vector<2x128xf32>
    %197 = vector.extract_strided_slice %182 {offsets = [0, 384], sizes = [2, 128], strides = [1, 1]} : vector<2x512xf32> to vector<2x128xf32>
    %198 = arith.negf %197 : vector<2x128xf32>
    %199 = math.exp %198 : vector<2x128xf32>
    %cst_65 = arith.constant 1.000000e+00 : f32
    %200 = vector.broadcast %cst_65 : f32 to vector<2x128xf32>
    %201 = arith.addf %200, %199 : vector<2x128xf32>
    %202 = arith.divf %200, %201 : vector<2x128xf32>
    %203 = arith.mulf %194, %177 : vector<2x128xf32>
    %204 = arith.mulf %188, %196 : vector<2x128xf32>
    %205 = arith.addf %203, %204 : vector<2x128xf32>
    %206 = math.tanh %205 : vector<2x128xf32>
    %207 = arith.mulf %202, %206 : vector<2x128xf32>
    %c12 = arith.constant 12 : index
    %c0_66 = arith.constant 0 : index
    %208 = vector.load %arg10[%c12, %c0_66] : memref<24x512xf32, #tpu.memory_space<vmem>>, vector<2x512xf32>
    %cst_67 = arith.constant dense<0.000000e+00> : vector<2x512xf32>
    %209 = tpu.matmul %207, %37, %cst_67 {dimension_numbers = #tpu.dot_dimension_numbers<[1], [0], [0], [1], [0, 0, 1, 1], [], []>} : vector<2x128xf32>, vector<128x512xf32>, vector<2x512xf32> -> vector<2x512xf32>
    %210 = arith.addf %208, %209 : vector<2x512xf32>
    %211 = vector.extract_strided_slice %210 {offsets = [0, 0], sizes = [2, 128], strides = [1, 1]} : vector<2x512xf32> to vector<2x128xf32>
    %212 = arith.negf %211 : vector<2x128xf32>
    %213 = math.exp %212 : vector<2x128xf32>
    %cst_68 = arith.constant 1.000000e+00 : f32
    %214 = vector.broadcast %cst_68 : f32 to vector<2x128xf32>
    %215 = arith.addf %214, %213 : vector<2x128xf32>
    %216 = arith.divf %214, %215 : vector<2x128xf32>
    %217 = vector.extract_strided_slice %210 {offsets = [0, 128], sizes = [2, 128], strides = [1, 1]} : vector<2x512xf32> to vector<2x128xf32>
    %218 = arith.negf %217 : vector<2x128xf32>
    %219 = math.exp %218 : vector<2x128xf32>
    %cst_69 = arith.constant 1.000000e+00 : f32
    %220 = vector.broadcast %cst_69 : f32 to vector<2x128xf32>
    %221 = arith.addf %220, %219 : vector<2x128xf32>
    %222 = arith.divf %220, %221 : vector<2x128xf32>
    %223 = vector.extract_strided_slice %210 {offsets = [0, 256], sizes = [2, 128], strides = [1, 1]} : vector<2x512xf32> to vector<2x128xf32>
    %224 = math.tanh %223 : vector<2x128xf32>
    %225 = vector.extract_strided_slice %210 {offsets = [0, 384], sizes = [2, 128], strides = [1, 1]} : vector<2x512xf32> to vector<2x128xf32>
    %226 = arith.negf %225 : vector<2x128xf32>
    %227 = math.exp %226 : vector<2x128xf32>
    %cst_70 = arith.constant 1.000000e+00 : f32
    %228 = vector.broadcast %cst_70 : f32 to vector<2x128xf32>
    %229 = arith.addf %228, %227 : vector<2x128xf32>
    %230 = arith.divf %228, %229 : vector<2x128xf32>
    %231 = arith.mulf %222, %205 : vector<2x128xf32>
    %232 = arith.mulf %216, %224 : vector<2x128xf32>
    %233 = arith.addf %231, %232 : vector<2x128xf32>
    %234 = math.tanh %233 : vector<2x128xf32>
    %235 = arith.mulf %230, %234 : vector<2x128xf32>
    %c14 = arith.constant 14 : index
    %c0_71 = arith.constant 0 : index
    %236 = vector.load %arg10[%c14, %c0_71] : memref<24x512xf32, #tpu.memory_space<vmem>>, vector<2x512xf32>
    %cst_72 = arith.constant dense<0.000000e+00> : vector<2x512xf32>
    %237 = tpu.matmul %235, %37, %cst_72 {dimension_numbers = #tpu.dot_dimension_numbers<[1], [0], [0], [1], [0, 0, 1, 1], [], []>} : vector<2x128xf32>, vector<128x512xf32>, vector<2x512xf32> -> vector<2x512xf32>
    %238 = arith.addf %236, %237 : vector<2x512xf32>
    %239 = vector.extract_strided_slice %238 {offsets = [0, 0], sizes = [2, 128], strides = [1, 1]} : vector<2x512xf32> to vector<2x128xf32>
    %240 = arith.negf %239 : vector<2x128xf32>
    %241 = math.exp %240 : vector<2x128xf32>
    %cst_73 = arith.constant 1.000000e+00 : f32
    %242 = vector.broadcast %cst_73 : f32 to vector<2x128xf32>
    %243 = arith.addf %242, %241 : vector<2x128xf32>
    %244 = arith.divf %242, %243 : vector<2x128xf32>
    %245 = vector.extract_strided_slice %238 {offsets = [0, 128], sizes = [2, 128], strides = [1, 1]} : vector<2x512xf32> to vector<2x128xf32>
    %246 = arith.negf %245 : vector<2x128xf32>
    %247 = math.exp %246 : vector<2x128xf32>
    %cst_74 = arith.constant 1.000000e+00 : f32
    %248 = vector.broadcast %cst_74 : f32 to vector<2x128xf32>
    %249 = arith.addf %248, %247 : vector<2x128xf32>
    %250 = arith.divf %248, %249 : vector<2x128xf32>
    %251 = vector.extract_strided_slice %238 {offsets = [0, 256], sizes = [2, 128], strides = [1, 1]} : vector<2x512xf32> to vector<2x128xf32>
    %252 = math.tanh %251 : vector<2x128xf32>
    %253 = vector.extract_strided_slice %238 {offsets = [0, 384], sizes = [2, 128], strides = [1, 1]} : vector<2x512xf32> to vector<2x128xf32>
    %254 = arith.negf %253 : vector<2x128xf32>
    %255 = math.exp %254 : vector<2x128xf32>
    %cst_75 = arith.constant 1.000000e+00 : f32
    %256 = vector.broadcast %cst_75 : f32 to vector<2x128xf32>
    %257 = arith.addf %256, %255 : vector<2x128xf32>
    %258 = arith.divf %256, %257 : vector<2x128xf32>
    %259 = arith.mulf %250, %233 : vector<2x128xf32>
    %260 = arith.mulf %244, %252 : vector<2x128xf32>
    %261 = arith.addf %259, %260 : vector<2x128xf32>
    %262 = math.tanh %261 : vector<2x128xf32>
    %263 = arith.mulf %258, %262 : vector<2x128xf32>
    %c16 = arith.constant 16 : index
    %c0_76 = arith.constant 0 : index
    %264 = vector.load %arg10[%c16, %c0_76] : memref<24x512xf32, #tpu.memory_space<vmem>>, vector<2x512xf32>
    %cst_77 = arith.constant dense<0.000000e+00> : vector<2x512xf32>
    %265 = tpu.matmul %263, %37, %cst_77 {dimension_numbers = #tpu.dot_dimension_numbers<[1], [0], [0], [1], [0, 0, 1, 1], [], []>} : vector<2x128xf32>, vector<128x512xf32>, vector<2x512xf32> -> vector<2x512xf32>
    %266 = arith.addf %264, %265 : vector<2x512xf32>
    %267 = vector.extract_strided_slice %266 {offsets = [0, 0], sizes = [2, 128], strides = [1, 1]} : vector<2x512xf32> to vector<2x128xf32>
    %268 = arith.negf %267 : vector<2x128xf32>
    %269 = math.exp %268 : vector<2x128xf32>
    %cst_78 = arith.constant 1.000000e+00 : f32
    %270 = vector.broadcast %cst_78 : f32 to vector<2x128xf32>
    %271 = arith.addf %270, %269 : vector<2x128xf32>
    %272 = arith.divf %270, %271 : vector<2x128xf32>
    %273 = vector.extract_strided_slice %266 {offsets = [0, 128], sizes = [2, 128], strides = [1, 1]} : vector<2x512xf32> to vector<2x128xf32>
    %274 = arith.negf %273 : vector<2x128xf32>
    %275 = math.exp %274 : vector<2x128xf32>
    %cst_79 = arith.constant 1.000000e+00 : f32
    %276 = vector.broadcast %cst_79 : f32 to vector<2x128xf32>
    %277 = arith.addf %276, %275 : vector<2x128xf32>
    %278 = arith.divf %276, %277 : vector<2x128xf32>
    %279 = vector.extract_strided_slice %266 {offsets = [0, 256], sizes = [2, 128], strides = [1, 1]} : vector<2x512xf32> to vector<2x128xf32>
    %280 = math.tanh %279 : vector<2x128xf32>
    %281 = vector.extract_strided_slice %266 {offsets = [0, 384], sizes = [2, 128], strides = [1, 1]} : vector<2x512xf32> to vector<2x128xf32>
    %282 = arith.negf %281 : vector<2x128xf32>
    %283 = math.exp %282 : vector<2x128xf32>
    %cst_80 = arith.constant 1.000000e+00 : f32
    %284 = vector.broadcast %cst_80 : f32 to vector<2x128xf32>
    %285 = arith.addf %284, %283 : vector<2x128xf32>
    %286 = arith.divf %284, %285 : vector<2x128xf32>
    %287 = arith.mulf %278, %261 : vector<2x128xf32>
    %288 = arith.mulf %272, %280 : vector<2x128xf32>
    %289 = arith.addf %287, %288 : vector<2x128xf32>
    %290 = math.tanh %289 : vector<2x128xf32>
    %291 = arith.mulf %286, %290 : vector<2x128xf32>
    %c18 = arith.constant 18 : index
    %c0_81 = arith.constant 0 : index
    %292 = vector.load %arg10[%c18, %c0_81] : memref<24x512xf32, #tpu.memory_space<vmem>>, vector<2x512xf32>
    %cst_82 = arith.constant dense<0.000000e+00> : vector<2x512xf32>
    %293 = tpu.matmul %291, %37, %cst_82 {dimension_numbers = #tpu.dot_dimension_numbers<[1], [0], [0], [1], [0, 0, 1, 1], [], []>} : vector<2x128xf32>, vector<128x512xf32>, vector<2x512xf32> -> vector<2x512xf32>
    %294 = arith.addf %292, %293 : vector<2x512xf32>
    %295 = vector.extract_strided_slice %294 {offsets = [0, 0], sizes = [2, 128], strides = [1, 1]} : vector<2x512xf32> to vector<2x128xf32>
    %296 = arith.negf %295 : vector<2x128xf32>
    %297 = math.exp %296 : vector<2x128xf32>
    %cst_83 = arith.constant 1.000000e+00 : f32
    %298 = vector.broadcast %cst_83 : f32 to vector<2x128xf32>
    %299 = arith.addf %298, %297 : vector<2x128xf32>
    %300 = arith.divf %298, %299 : vector<2x128xf32>
    %301 = vector.extract_strided_slice %294 {offsets = [0, 128], sizes = [2, 128], strides = [1, 1]} : vector<2x512xf32> to vector<2x128xf32>
    %302 = arith.negf %301 : vector<2x128xf32>
    %303 = math.exp %302 : vector<2x128xf32>
    %cst_84 = arith.constant 1.000000e+00 : f32
    %304 = vector.broadcast %cst_84 : f32 to vector<2x128xf32>
    %305 = arith.addf %304, %303 : vector<2x128xf32>
    %306 = arith.divf %304, %305 : vector<2x128xf32>
    %307 = vector.extract_strided_slice %294 {offsets = [0, 256], sizes = [2, 128], strides = [1, 1]} : vector<2x512xf32> to vector<2x128xf32>
    %308 = math.tanh %307 : vector<2x128xf32>
    %309 = vector.extract_strided_slice %294 {offsets = [0, 384], sizes = [2, 128], strides = [1, 1]} : vector<2x512xf32> to vector<2x128xf32>
    %310 = arith.negf %309 : vector<2x128xf32>
    %311 = math.exp %310 : vector<2x128xf32>
    %cst_85 = arith.constant 1.000000e+00 : f32
    %312 = vector.broadcast %cst_85 : f32 to vector<2x128xf32>
    %313 = arith.addf %312, %311 : vector<2x128xf32>
    %314 = arith.divf %312, %313 : vector<2x128xf32>
    %315 = arith.mulf %306, %289 : vector<2x128xf32>
    %316 = arith.mulf %300, %308 : vector<2x128xf32>
    %317 = arith.addf %315, %316 : vector<2x128xf32>
    %318 = math.tanh %317 : vector<2x128xf32>
    %319 = arith.mulf %314, %318 : vector<2x128xf32>
    %c20 = arith.constant 20 : index
    %c0_86 = arith.constant 0 : index
    %320 = vector.load %arg10[%c20, %c0_86] : memref<24x512xf32, #tpu.memory_space<vmem>>, vector<2x512xf32>
    %cst_87 = arith.constant dense<0.000000e+00> : vector<2x512xf32>
    %321 = tpu.matmul %319, %37, %cst_87 {dimension_numbers = #tpu.dot_dimension_numbers<[1], [0], [0], [1], [0, 0, 1, 1], [], []>} : vector<2x128xf32>, vector<128x512xf32>, vector<2x512xf32> -> vector<2x512xf32>
    %322 = arith.addf %320, %321 : vector<2x512xf32>
    %323 = vector.extract_strided_slice %322 {offsets = [0, 0], sizes = [2, 128], strides = [1, 1]} : vector<2x512xf32> to vector<2x128xf32>
    %324 = arith.negf %323 : vector<2x128xf32>
    %325 = math.exp %324 : vector<2x128xf32>
    %cst_88 = arith.constant 1.000000e+00 : f32
    %326 = vector.broadcast %cst_88 : f32 to vector<2x128xf32>
    %327 = arith.addf %326, %325 : vector<2x128xf32>
    %328 = arith.divf %326, %327 : vector<2x128xf32>
    %329 = vector.extract_strided_slice %322 {offsets = [0, 128], sizes = [2, 128], strides = [1, 1]} : vector<2x512xf32> to vector<2x128xf32>
    %330 = arith.negf %329 : vector<2x128xf32>
    %331 = math.exp %330 : vector<2x128xf32>
    %cst_89 = arith.constant 1.000000e+00 : f32
    %332 = vector.broadcast %cst_89 : f32 to vector<2x128xf32>
    %333 = arith.addf %332, %331 : vector<2x128xf32>
    %334 = arith.divf %332, %333 : vector<2x128xf32>
    %335 = vector.extract_strided_slice %322 {offsets = [0, 256], sizes = [2, 128], strides = [1, 1]} : vector<2x512xf32> to vector<2x128xf32>
    %336 = math.tanh %335 : vector<2x128xf32>
    %337 = vector.extract_strided_slice %322 {offsets = [0, 384], sizes = [2, 128], strides = [1, 1]} : vector<2x512xf32> to vector<2x128xf32>
    %338 = arith.negf %337 : vector<2x128xf32>
    %339 = math.exp %338 : vector<2x128xf32>
    %cst_90 = arith.constant 1.000000e+00 : f32
    %340 = vector.broadcast %cst_90 : f32 to vector<2x128xf32>
    %341 = arith.addf %340, %339 : vector<2x128xf32>
    %342 = arith.divf %340, %341 : vector<2x128xf32>
    %343 = arith.mulf %334, %317 : vector<2x128xf32>
    %344 = arith.mulf %328, %336 : vector<2x128xf32>
    %345 = arith.addf %343, %344 : vector<2x128xf32>
    %346 = math.tanh %345 : vector<2x128xf32>
    %347 = arith.mulf %342, %346 : vector<2x128xf32>
    %c22 = arith.constant 22 : index
    %c0_91 = arith.constant 0 : index
    %348 = vector.load %arg10[%c22, %c0_91] : memref<24x512xf32, #tpu.memory_space<vmem>>, vector<2x512xf32>
    %cst_92 = arith.constant dense<0.000000e+00> : vector<2x512xf32>
    %349 = tpu.matmul %347, %37, %cst_92 {dimension_numbers = #tpu.dot_dimension_numbers<[1], [0], [0], [1], [0, 0, 1, 1], [], []>} : vector<2x128xf32>, vector<128x512xf32>, vector<2x512xf32> -> vector<2x512xf32>
    %350 = arith.addf %348, %349 : vector<2x512xf32>
    %351 = vector.extract_strided_slice %350 {offsets = [0, 0], sizes = [2, 128], strides = [1, 1]} : vector<2x512xf32> to vector<2x128xf32>
    %352 = arith.negf %351 : vector<2x128xf32>
    %353 = math.exp %352 : vector<2x128xf32>
    %cst_93 = arith.constant 1.000000e+00 : f32
    %354 = vector.broadcast %cst_93 : f32 to vector<2x128xf32>
    %355 = arith.addf %354, %353 : vector<2x128xf32>
    %356 = arith.divf %354, %355 : vector<2x128xf32>
    %357 = vector.extract_strided_slice %350 {offsets = [0, 128], sizes = [2, 128], strides = [1, 1]} : vector<2x512xf32> to vector<2x128xf32>
    %358 = arith.negf %357 : vector<2x128xf32>
    %359 = math.exp %358 : vector<2x128xf32>
    %cst_94 = arith.constant 1.000000e+00 : f32
    %360 = vector.broadcast %cst_94 : f32 to vector<2x128xf32>
    %361 = arith.addf %360, %359 : vector<2x128xf32>
    %362 = arith.divf %360, %361 : vector<2x128xf32>
    %363 = vector.extract_strided_slice %350 {offsets = [0, 256], sizes = [2, 128], strides = [1, 1]} : vector<2x512xf32> to vector<2x128xf32>
    %364 = math.tanh %363 : vector<2x128xf32>
    %365 = vector.extract_strided_slice %350 {offsets = [0, 384], sizes = [2, 128], strides = [1, 1]} : vector<2x512xf32> to vector<2x128xf32>
    %366 = arith.negf %365 : vector<2x128xf32>
    %367 = math.exp %366 : vector<2x128xf32>
    %cst_95 = arith.constant 1.000000e+00 : f32
    %368 = vector.broadcast %cst_95 : f32 to vector<2x128xf32>
    %369 = arith.addf %368, %367 : vector<2x128xf32>
    %370 = arith.divf %368, %369 : vector<2x128xf32>
    %371 = arith.mulf %362, %345 : vector<2x128xf32>
    %372 = arith.mulf %356, %364 : vector<2x128xf32>
    %373 = arith.addf %371, %372 : vector<2x128xf32>
    %374 = math.tanh %373 : vector<2x128xf32>
    %375 = arith.mulf %370, %374 : vector<2x128xf32>
    %c0_96 = arith.constant 0 : index
    %c0_97 = arith.constant 0 : index
    %376 = vector.load %arg7[%c0_96, %c0_97] : memref<128x10xf32, #tpu.memory_space<vmem>>, vector<128x10xf32>
    %cst_98 = arith.constant dense<0.000000e+00> : vector<2x10xf32>
    %377 = tpu.matmul %375, %376, %cst_98 {dimension_numbers = #tpu.dot_dimension_numbers<[1], [0], [0], [1], [0, 0, 1, 1], [], []>} : vector<2x128xf32>, vector<128x10xf32>, vector<2x10xf32> -> vector<2x10xf32>
    %c0_99 = arith.constant 0 : index
    %c0_100 = arith.constant 0 : index
    %378 = vector.load %arg8[%c0_99, %c0_100] : memref<1x10xf32, #tpu.memory_space<vmem>>, vector<1x10xf32>
    %379 = vector.broadcast %378 : vector<1x10xf32> to vector<2x10xf32>
    %380 = arith.addf %377, %379 : vector<2x10xf32>
    %cst_101 = arith.constant dense<0xFF800000> : vector<2xf32>
    %381 = vector.multi_reduction <maximumf>, %380, %cst_101 [1] : vector<2x10xf32> to vector<2xf32>
    %382 = vector.shape_cast %381 : vector<2xf32> to vector<2x1xf32>
    %383 = vector.broadcast %382 : vector<2x1xf32> to vector<2x10xf32>
    %384 = arith.subf %380, %383 : vector<2x10xf32>
    %385 = math.exp %384 : vector<2x10xf32>
    %cst_102 = arith.constant dense<0.000000e+00> : vector<2xf32>
    %386 = vector.multi_reduction <add>, %385, %cst_102 [1] : vector<2x10xf32> to vector<2xf32>
    %387 = vector.shape_cast %386 : vector<2xf32> to vector<2x1xf32>
    %388 = math.log %387 : vector<2x1xf32>
    %389 = arith.addf %382, %388 : vector<2x1xf32>
    %390 = vector.broadcast %389 : vector<2x1xf32> to vector<2x10xf32>
    %391 = arith.subf %380, %390 : vector<2x10xf32>
    %c0_103 = arith.constant 0 : index
    %c0_104 = arith.constant 0 : index
    %392 = vector.load %arg9[%c0_103, %c0_104] : memref<2x10xf32, #tpu.memory_space<vmem>>, vector<2x10xf32>
    tpu.vector_store %arg9[%c0_103, %c0_104], %391 {strides = array<i32>} : memref<2x10xf32, #tpu.memory_space<vmem>>, vector<2x10xf32>,
    return
  }
}

</mosaic_0001>

<bundles_post_ra>
// kernel: conv1d_lstm_forward.1
= control target key start
LH: loop header
LB: loop body
LE: loop exit
PB: predicated region body
PF: predicated region fallthrough
CT: control target
= control target key end

     0   :  { %vm46_vm0 = vcmask 326656   ;;  %v6038_v3 = vmov 0.0   ;;  %s6028_s0 = inlined_call_operand.vmem [shape: f32[32,40], index: 0, kind: input, shape index: {}]   ;;  %s6029_s1 = inlined_call_operand.vmem [shape: f32[40,16], index: 1, kind: input, shape index: {}]   ;;  %s6030_s2 = inlined_call_operand.vmem [shape: f32[32,16], index: 2, kind: input, shape index: {}]   ;;  %s6031_s3 = inlined_call_operand.vmem [shape: f32[5,16,32], index: 3, kind: input, shape index: {}]   ;;  %s6032_s4 = inlined_call_operand.vmem [shape: f32[32,512], index: 4, kind: input, shape index: {}]   ;;  %s6033_s5 = inlined_call_operand.vmem [shape: f32[128,512], index: 5, kind: input, shape index: {}]   ;;  %s6034_s6 = inlined_call_operand.vmem [shape: f32[1,512], index: 6, kind: input, shape index: {}]   ;;  %s6035_s7 = inlined_call_operand.vmem [shape: f32[128,10], index: 7, kind: input, shape index: {}]   ;;  %s6036_s8 = inlined_call_operand.vmem [shape: f32[1,10], index: 8, kind: input, shape index: {}]   ;;  %s6037_s9 = inlined_call_operand.hbm [shape: f32[2,10], index: 9, kind: output, shape index: {}]  }
   0x1   :  { %v41_v0 = vld [vmem:[%s6029_s1 + $0x20] sm:$0xff]  ;;  %v40_v1 = vld [vmem:[%s6029_s1 + $0x18] sm:$0xff]  ;;  %3440 = vmatprep.subr.mxu1 %v6038_v3  ;;  %v39_v4 = vld [vmem:[%s6029_s1 + $0x10] sm:$0xff] }
   0x2   :  { %3411 = vmatprep.subr.mxu0 %v41_v0  ;;  %v33_v2 = vld [vmem:[%s6028_s0] sm:$0xff] }
   0x3   :  { %3412 = vmatpush3.msra.mxu0 %v41_v0  ;;  %3421 = vmatprep.mubr.msk.f32.mxu0 %vm46_vm0, %v33_v2 }
   0x4   :  { %3413 = vmatprep.subr.mxu0 %v40_v1 }
   0x5   :  { %14 = vsyncpa [#allocation4], 0  ;;  %3414 = vmatpush3.msra.mxu0 %v40_v1  ;;  %v38_v5 = vld [vmem:[%s6029_s1 + $0x8] sm:$0xff]  ;;  %v37_v6 = vld [vmem:[%s6029_s1] sm:$0xff]  ;;  %vm3881_vm1 = vmmov 0   ;;  %vm161_vm2 = vcmask 130048  }
   0x6   :  { %3415 = vmatprep.subr.mxu0 %v39_v4  ;;  %v34_v7 = vld [vmem:[%s6028_s0 + $0x8] sm:$0xff]  ;;  %v35_v8 = vld [vmem:[%s6028_s0 + $0x10] sm:$0xff]  ;;  %v36_v9 = vld [vmem:[%s6028_s0 + $0x18] sm:$0xff]  ;;  %3444 = vmatprep.mubr.msk.f32.mxu1 %vm3881_vm1, %v6038_v3  ;;  %vm153_vm3 = vcmask 1045504   ;;  %vm437_vm4 = vcmask 1041408   ;;  %vm337_vm5 = vcmask 1043456  }
   0x7   :  { %3416 = vmatpush3.msra.mxu0 %v39_v4  ;;  %v3295_v10 = vld [vmem:[%s6031_s3 + $0x18] sm:$0xff]  ;;  %v145_v11 = vld [vmem:[%s6031_s3 + $0x8] sm:$0xff]  ;;  %v144_v12 = vld [vmem:[%s6031_s3] sm:$0xff]  ;;  %vm660_vm6 = vcmask 261120   ;;  %vm3261_vm7 = vcmask 74752  }
   0x8   :  { %3417 = vmatprep.subr.mxu0 %v38_v5  ;;  %3441 = vmatpush3.msra.mxu1 %v145_v11  ;;  %v3294_v13 = vld [vmem:[%s6031_s3 + $0x10] sm:$0xff]  ;;  %v43_v14 = vld [vmem:[%s6030_s2 + $0x8] sm:$0xff]  ;;  %v42_v16 = vld [vmem:[%s6030_s2] sm:$0xff] }
   0x9   :  { %3418 = vmatpush3.msra.mxu0 %v38_v5  ;;  %3442 = vmatprep.subr.mxu1 %v6038_v3  ;;  %v3308_v20 = vld [vmem:[%s6031_s3 + $0x38] sm:$0xff]  ;;  %v44_v22 = vld [vmem:[%s6030_s2 + $0x10] sm:$0xff]  ;;  %v3303_v28 = vld [vmem:[%s6031_s3 + $0x28] sm:$0xff] }
   0xa   :  { %3419 = vmatprep.subr.mxu0 %v37_v6  ;;  %3443 = vmatpush3.msra.mxu1 %v144_v12  ;;  %v3307_v25 = vld [vmem:[%s6031_s3 + $0x30] sm:$0xff]  ;;  %v45_v26 = vld [vmem:[%s6030_s2 + $0x18] sm:$0xff]  ;;  %v3302_v33 = vld [vmem:[%s6031_s3 + $0x20] sm:$0xff] }
   0xb   :  { %3420 = vmatpush3.msra.mxu0 %v37_v6  ;;  %3527 = vmatprep.subr.mxu1 %v6038_v3  ;;  %v3313_v50 = vld [vmem:[%s6031_s3 + $0x48] sm:$0xff]  ;;  %v3312_v52 = vld [vmem:[%s6031_s3 + $0x40] sm:$0xff]  ;;  %v637_v54 = vld [vmem:[%s6032_s4 + $0x78] sm:$0xff] }
   0xc   :  { %3422 = vmatmul.mubr.msk.f32.vlgmr.msra.gmra.mxu0 %vm46_vm0, %v34_v7  ;;  %3427 = vmatprep.subr.mxu0 %v6038_v3  ;;  %v635_v53 = vld [vmem:[%s6032_s4 + $0x68] sm:$0xff]  ;;  %v634_v55 = vld [vmem:[%s6032_s4 + $0x60] sm:$0xff]  ;;  %v636_v56 = vld [vmem:[%s6032_s4 + $0x70] sm:$0xff] }
   0xd   :  { %3424 = vmatprep.mubr.msk.f32.mxu0 %vm46_vm0, %v35_v8  ;;  %3428 = vmatpush3.msra.mxu0 %v3295_v10  ;;  %v631_v57 = vld [vmem:[%s6032_s4 + $0x48] sm:$0xff]  ;;  %v633_v58 = vld [vmem:[%s6032_s4 + $0x58] sm:$0xff]  ;;  %v630_v59 = vld [vmem:[%s6032_s4 + $0x40] sm:$0xff] }
   0xe   :  { %3429 = vmatprep.subr.mxu0 %v6038_v3  ;;  %v632_v60 = vld [vmem:[%s6032_s4 + $0x50] sm:$0xff]  ;;  %v627_v61 = vld [vmem:[%s6032_s4 + $0x28] sm:$0xff]  ;;  %v629_v62 = vld [vmem:[%s6032_s4 + $0x38] sm:$0xff] }
   0xf   :  { %3430 = vmatpush3.msra.mxu0 %v3294_v13  ;;  %v626_v63 = vld [vmem:[%s6032_s4 + $0x20] sm:$0xff]  ;;  %v628_v0 = vld [vmem:[%s6032_s4 + $0x30] sm:$0xff]  ;;  %v623_v1 = vld [vmem:[%s6032_s4 + $0x8] sm:$0xff] }
  0x10   :  { %3425 = vmatmul.mubr.msk.f32.gmra.mxu0 %vm46_vm0, %v36_v9  ;;  %3453 = vmatprep.subr.mxu0 %v6038_v3  ;;  %v625_v2 = vld [vmem:[%s6032_s4 + $0x18] sm:$0xff]  ;;  %v622_v4 = vld [vmem:[%s6032_s4] sm:$0xff]  ;;  %v624_v5 = vld [vmem:[%s6032_s4 + $0x10] sm:$0xff] }
  0x11   :  { %3431 = vmatprep.mubr.msk.f32.mxu0 %vm3881_vm1, %v6038_v3  ;;  %v4145_v6 = vld [vmem:[%s6033_s5 + $0x1e8] sm:$0xff]  ;;  %v4150_v7 = vld [vmem:[%s6033_s5 + $0x1f8] sm:$0xff] }
  0x12   :  { %6160 = vst [vmem:[#allocation6_spill] sm:$0xff] %v4145_v6  ;;  %6161 = vst [vmem:[#allocation7_spill] sm:$0xff] %v4150_v7 }
  0xcc   :  { %v3423_v15 = vpop.f32.mrf.mxu0 }
  0xcd   :  { %v3992_v17 = vadd.f32 %v3423_v15, %v43_v14 }
  0xce   :  { %v125_v18 = vpop.f32.mrf.mxu0 }
  0xcf   :  { %v3994_v19 = vadd.f32 %v125_v18, %v42_v16  ;;  %v155_v24 = vrot.slane %v3992_v17, 2  ;;  %v439_v37 = vrot.slane %v3992_v17, 6  ;;  %v339_v41 = vrot.slane %v3992_v17, 4 }
  0xd0   :  { %v3426_v21 = vpop.f32.mrf.mxu0 }
  0xd1   :  { %v154_v23 = vrot.slane %v3994_v19, 2  ;;  %3445 = vmatmul.mubr.msk.f32.vlgmr.msra.gmra.mxu1 %vm161_vm2, %v3994_v19  ;;  %v141_v31 = vadd.f32 %v3426_v21, %v45_v26  ;;  %v338_v38 = vrot.slane %v3994_v19, 4  ;;  %v438_v48 = vrot.slane %v3994_v19, 6 }
  0xd2   :  { %v135_v27 = vpop.f32.mrf.mxu0  ;;  %3447 = vmatprep.mubr.msk.f32.mxu1 %vm3881_vm1, %v6038_v3  ;;  %3529 = vmatpush3.msra.mxu1 %v3308_v20 }
  0xd3   :  { %v4017_v29 = vadd.f32 %v135_v27, %v44_v22  ;;  %v156_v30 = vsel %vm153_vm3, %v154_v23, %v155_v24  ;;  %3528 = vmatprep.subr.mxu1 %v6038_v3  ;;  %v159_v36 = vrot.slane %v141_v31, 2  ;;  %v443_v42 = vrot.slane %v141_v31, 6 }
  0xd4   :  { %3432 = vmatmul.mubr.msk.f32.vlgmr.msra.gmra.mxu0 %vm161_vm2, %v156_v30  ;;  %3530 = vmatpush3.msra.mxu1 %v3307_v25  ;;  %v340_v43 = vsel %vm337_vm5, %v338_v38, %v339_v41  ;;  %v343_v47 = vrot.slane %v141_v31, 4  ;;  %v440_v51 = vsel %vm437_vm4, %v438_v48, %v439_v37 }
  0xd5   :  { %3454 = vmatpush3.msra.mxu0 %v3303_v28  ;;  %3448 = vmatmul.mubr.msk.f32.gmra.mxu1 %vm161_vm2, %v3992_v17  ;;  %v157_v32 = vrot.slane %v4017_v29, 2  ;;  %v441_v35 = vrot.slane %v4017_v29, 6  ;;  %v341_v44 = vrot.slane %v4017_v29, 4 }
  0xd6   :  { %3434 = vmatprep.mubr.msk.f32.mxu0 %vm3881_vm1, %v6038_v3  ;;  %3450 = vmatprep.mubr.msk.f32.mxu1 %vm3881_vm1, %v6038_v3 }
  0xd7   :  { %v158_v34 = vsel %vm153_vm3, %v155_v24, %v157_v32  ;;  %3455 = vmatprep.subr.mxu0 %v6038_v3  ;;  %v160_v39 = vsel %vm153_vm3, %v157_v32, %v159_v36  ;;  %v442_v40 = vsel %vm437_vm4, %v439_v37, %v441_v35  ;;  %v444_v45 = vsel %vm437_vm4, %v441_v35, %v443_v42  ;;  %v4167_v42 = vld [vmem:[%s6033_s5 + $0x1c8] sm:$0xff] }
  0xd8   :  { %3435 = vmatmul.mubr.msk.f32.gmra.mxu0 %vm161_vm2, %v158_v34  ;;  %v342_v46 = vsel %vm337_vm5, %v339_v41, %v341_v44  ;;  %v344_v49 = vsel %vm337_vm5, %v341_v44, %v343_v47  ;;  %694 = vmatprep.subr.mxu1 %v635_v53  ;;  %v4184_v47 = vld [vmem:[%s6033_s5 + $0x1d0] sm:$0xff] }
  0xd9   :  { %3451 = vmatmul.mubr.msk.f32.gmra.mxu1 %vm161_vm2, %v4017_v29  ;;  %3456 = vmatpush3.msra.mxu0 %v3302_v33 }
  0xda   :  { %3437 = vmatprep.mubr.msk.f32.mxu0 %vm3881_vm1, %v6038_v3  ;;  %3473 = vmatprep.mubr.msk.f32.mxu1 %vm3881_vm1, %v6038_v3 }
  0xdb   :  { %3466 = vmatprep.subr.mxu0 %v6038_v3 }
  0xdc   :  { %3438 = vmatmul.mubr.msk.f32.gmra.mxu0 %vm161_vm2, %v160_v39  ;;  %v4157_v39 = vld [vmem:[%s6033_s5 + $0x1e0] sm:$0xff] }
  0xdd   :  { %3474 = vmatmul.mubr.msk.f32.vlgmr.msra.gmra.mxu1 %vm161_vm2, %v442_v40  ;;  %3457 = vmatprep.mubr.msk.f32.mxu0 %vm3881_vm1, %v6038_v3  ;;  %v4162_v40 = vld [vmem:[%s6033_s5 + $0x1f0] sm:$0xff] }
  0xde   :  { %3476 = vmatprep.mubr.msk.f32.mxu1 %vm3881_vm1, %v6038_v3  ;;  %695 = vmatpush1.msra.mxu1 %v634_v55  ;;  %v4212_v55 = vld [vmem:[%s6033_s5 + $0x1b0] sm:$0xff] }
  0xdf   :  { %696 = vmatprep.subr.mxu1 %v631_v57  ;;  %v4219_v57 = vld [vmem:[%s6033_s5 + $0x188] sm:$0xff] }
  0xe0   :  { %3458 = vmatmul.mubr.msk.f32.vlgmr.msra.gmra.mxu0 %vm161_vm2, %v340_v43  ;;  %697 = vmatpush1.msra.mxu1 %v630_v59  ;;  %v4172_v43 = vld [vmem:[%s6033_s5 + $0x1d8] sm:$0xff] }
  0xe1   :  { %3467 = vmatpush3.msra.mxu0 %v3308_v20  ;;  %3477 = vmatmul.mubr.msk.f32.gmra.mxu1 %vm161_vm2, %v444_v45 }
  0xe2   :  { %3460 = vmatprep.mubr.msk.f32.mxu0 %vm3881_vm1, %v6038_v3  ;;  %3468 = vmatprep.subr.mxu0 %v6038_v3 }
  0xe3   :  { %3469 = vmatpush3.msra.mxu0 %v3307_v25  ;;  %734 = vmatprep.mubr.f32.mxu1 %v6038_v3 }
  0xe4   :  { %3461 = vmatmul.mubr.msk.f32.gmra.mxu0 %vm161_vm2, %v342_v46  ;;  %3479 = vmatprep.subr.mxu0 %v6038_v3  ;;  %v4179_v46 = vld [vmem:[%s6033_s5 + $0x1c0] sm:$0xff] }
  0xe5   :  { %3463 = vmatprep.mubr.msk.f32.mxu0 %vm3881_vm1, %v6038_v3  ;;  %698 = vmatprep.subr.mxu1 %v627_v61  ;;  %v4236_v61 = vld [vmem:[%s6033_s5 + $0x190] sm:$0xff] }
  0xe6   :  { %699 = vmatpush1.msra.mxu1 %v626_v63 }
  0xe7   :  { %700 = vmatprep.subr.mxu1 %v623_v1  ;;  %v4250_v1 = vld [vmem:[%s6033_s5 + $0x178] sm:$0xff] }
  0xe8   :  { %3464 = vmatmul.mubr.msk.f32.gmra.mxu0 %vm161_vm2, %v344_v49  ;;  %701 = vmatpush1.msra.mxu1 %v622_v4  ;;  %v4264_v4 = vld [vmem:[%s6033_s5 + $0x170] sm:$0xff] }
  0xe9   :  { %3470 = vmatprep.mubr.msk.f32.mxu0 %vm3881_vm1, %v6038_v3  ;;  %916 = vmatprep.subr.mxu1 %v4145_v6 }
  0xec   :  { %3471 = vmatmul.mubr.msk.f32.vlgmr.msra.gmra.mxu0 %vm161_vm2, %v440_v51  ;;  %v4193_v51 = vld [vmem:[%s6033_s5 + $0x1a8] sm:$0xff] }
  0xed   :  { %3480 = vmatpush3.msra.mxu0 %v3313_v50  ;;  %3483 = vmatprep.mubr.msk.f32.mxu0 %vm3881_vm1, %v6038_v3 }
  0xee   :  { %3481 = vmatprep.subr.mxu0 %v6038_v3 }
  0xef   :  { %3482 = vmatpush3.msra.mxu0 %v3312_v52  ;;  %v4198_v52 = vld [vmem:[%s6033_s5 + $0x1b8] sm:$0xff] }
  0xf0   :  { %3484 = vmatmul.mubr.msk.f32.vlgmr.msra.gmra.mxu0 %vm161_vm2, %v3992_v17  ;;  %777 = vmatprep.subr.mxu0 %v637_v54  ;;  %v4207_v54 = vld [vmem:[%s6033_s5 + $0x1a0] sm:$0xff] }
  0xf1   :  { %3486 = vmatprep.mubr.msk.f32.mxu0 %vm3881_vm1, %v6038_v3  ;;  %778 = vmatpush1.msra.mxu0 %v636_v56 }
  0xf2   :  { %779 = vmatprep.subr.mxu0 %v633_v58  ;;  %v4224_v58 = vld [vmem:[%s6033_s5 + $0x198] sm:$0xff] }
  0xf3   :  { %780 = vmatpush1.msra.mxu0 %v632_v60  ;;  %v4231_v60 = vld [vmem:[%s6033_s5 + $0x180] sm:$0xff] }
  0xf4   :  { %3487 = vmatmul.mubr.msk.f32.gmra.mxu0 %vm161_vm2, %v4017_v29  ;;  %781 = vmatprep.subr.mxu0 %v629_v62 }
  0xf5   :  { %3489 = vmatprep.mubr.msk.f32.mxu0 %vm3881_vm1, %v6038_v3  ;;  %782 = vmatpush1.msra.mxu0 %v628_v0  ;;  %v4245_v0 = vld [vmem:[%s6033_s5 + $0x168] sm:$0xff] }
  0xf6   :  { %783 = vmatprep.subr.mxu0 %v625_v2  ;;  %v4259_v2 = vld [vmem:[%s6033_s5 + $0x160] sm:$0xff] }
  0xf7   :  { %784 = vmatpush1.msra.mxu0 %v624_v5  ;;  %v4271_v5 = vld [vmem:[%s6033_s5 + $0x148] sm:$0xff] }
  0xf8   :  { %3490 = vmatmul.mubr.msk.f32.gmra.mxu0 %vm161_vm2, %v141_v31  ;;  %987 = vmatprep.subr.mxu0 %v4150_v7 }
  0xf9   :  { %817 = vmatprep.mubr.f32.mxu0 %v6038_v3 }
 0x191   :  { %v320_v8 = vpop.f32.mrf.mxu1 }
 0x193   :  { %v3446_v9 = vpop.f32.mrf.mxu1 }
 0x194   :  { %v234_v10 = vpop.f32.mrf.mxu0  ;;  %v4283_v9 = vld [vmem:[%s6033_s5 + $0x140] sm:$0xff] }
 0x195   :  { %v325_v11 = vpop.f32.mrf.mxu1  ;;  %v321_v30 = vadd.f32 %v320_v8, %v234_v10  ;;  %v4276_v8 = vld [vmem:[%s6033_s5 + $0x158] sm:$0xff]  ;;  %v4288_v10 = vld [vmem:[%s6033_s5 + $0x150] sm:$0xff] }
 0x196   :  { %v3433_v12 = vpop.f32.mrf.mxu0 }
 0x197   :  { %v3449_v13 = vpop.f32.mrf.mxu1  ;;  %v4300_v12 = vld [vmem:[%s6033_s5 + $0x138] sm:$0xff] }
 0x198   :  { %v239_v14 = vpop.f32.mrf.mxu0  ;;  %v4307_v13 = vld [vmem:[%s6033_s5 + $0x120] sm:$0xff] }
 0x199   :  { %v330_v15 = vpop.f32.mrf.mxu1  ;;  %v326_v32 = vadd.f32 %v325_v11, %v239_v14  ;;  %v4295_v11 = vld [vmem:[%s6033_s5 + $0x128] sm:$0xff]  ;;  %v4312_v14 = vld [vmem:[%s6033_s5 + $0x130] sm:$0xff] }
 0x19a   :  { %v3436_v16 = vpop.f32.mrf.mxu0 }
 0x19b   :  { %v3452_v17 = vpop.f32.mrf.mxu1  ;;  %v4324_v16 = vld [vmem:[%s6033_s5 + $0x118] sm:$0xff] }
 0x19c   :  { %v244_v18 = vpop.f32.mrf.mxu0  ;;  %v4331_v17 = vld [vmem:[%s6033_s5 + $0x100] sm:$0xff] }
 0x19d   :  { %v522_v19 = vpop.f32.mrf.mxu1  ;;  %v331_v44 = vadd.f32 %v330_v15, %v244_v18  ;;  %v4319_v15 = vld [vmem:[%s6033_s5 + $0x108] sm:$0xff]  ;;  %v4336_v18 = vld [vmem:[%s6033_s5 + $0x110] sm:$0xff] }
 0x19e   :  { %v3439_v20 = vpop.f32.mrf.mxu0 }
 0x19f   :  { %v3475_v21 = vpop.f32.mrf.mxu1  ;;  %v4348_v20 = vld [vmem:[%s6033_s5 + $0xf8] sm:$0xff] }
 0x1a0   :  { %v417_v22 = vpop.f32.mrf.mxu0  ;;  %v4355_v21 = vld [vmem:[%s6033_s5 + $0xe0] sm:$0xff] }
 0x1a1   :  { %v527_v23 = vpop.f32.mrf.mxu1  ;;  %v431_v33 = vadd.f32 %v417_v22, %v321_v30  ;;  %v4360_v22 = vld [vmem:[%s6033_s5 + $0xf0] sm:$0xff] }
 0x1a2   :  { %v3459_v24 = vpop.f32.mrf.mxu0  ;;  %v4408_v30 = vld [vmem:[%s6033_s5 + $0xb0] sm:$0xff] }
 0x1a3   :  { %v3478_v25 = vpop.f32.mrf.mxu1  ;;  %v4372_v24 = vld [vmem:[%s6033_s5 + $0xd8] sm:$0xff] }
 0x1a4   :  { %v422_v26 = vpop.f32.mrf.mxu0  ;;  %v4379_v25 = vld [vmem:[%s6033_s5 + $0xc0] sm:$0xff] }
 0x1a5   :  { %v432_v35 = vadd.f32 %v422_v26, %v326_v32  ;;  %v4384_v26 = vld [vmem:[%s6033_s5 + $0xd0] sm:$0xff]  ;;  %v4420_v32 = vld [vmem:[%s6033_s5 + $0x98] sm:$0xff] }
 0x1a6   :  { %v3462_v27 = vpop.f32.mrf.mxu0  ;;  %6163 = vst [vmem:[#allocation9_spill] sm:$0xff] %v4420_v32 }
 0x1a7   :  { %v532_v45 = vadd.f32 %v522_v19, %v432_v35  ;;  %v4343_v19 = vld [vmem:[%s6033_s5 + $0xe8] sm:$0xff] }
 0x1a8   :  { %v427_v28 = vpop.f32.mrf.mxu0  ;;  %v4391_v27 = vld [vmem:[%s6033_s5 + $0xa8] sm:$0xff] }
 0x1a9   :  { %v433_v49 = vadd.f32 %v427_v28, %v331_v44  ;;  %v4396_v28 = vld [vmem:[%s6033_s5 + $0xb8] sm:$0xff]  ;;  %v4439_v35 = vld [vmem:[%s6033_s5 + $0x68] sm:$0xff] }
 0x1aa   :  { %v3465_v29 = vpop.f32.mrf.mxu0  ;;  %6166 = vst [vmem:[#allocation12_spill] sm:$0xff] %v4439_v35  ;;  %v4468_v44 = vld [vmem:[%s6033_s5 + $0x58] sm:$0xff] }
 0x1ab   :  { %v533_v59 = vadd.f32 %v527_v23, %v433_v49  ;;  %v4367_v23 = vld [vmem:[%s6033_s5 + $0xc8] sm:$0xff]  ;;  %v4403_v29 = vld [vmem:[%s6033_s5 + $0xa0] sm:$0xff]  ;;  %6171 = vst [vmem:[#allocation17_spill] sm:$0xff] %v4468_v44 }
 0x1ac   :  { %v517_v31 = vpop.f32.mrf.mxu0  ;;  %v4487_v49 = vld [vmem:[%s6033_s5 + $0x28] sm:$0xff] }
 0x1ad   :  { %v531_v36 = vadd.f32 %v517_v31, %v431_v33  ;;  %v4415_v31 = vld [vmem:[%s6033_s5 + $0x88] sm:$0xff]  ;;  %v4427_v33 = vld [vmem:[%s6033_s5 + $0x80] sm:$0xff]  ;;  %6174 = vst [vmem:[#allocation20_spill] sm:$0xff] %v4487_v49 }
 0x1ae   :  { %v3472_v34 = vpop.f32.mrf.mxu0  ;;  %6162 = vst [vmem:[#allocation8_spill] sm:$0xff] %v4415_v31  ;;  %6164 = vst [vmem:[#allocation10_spill] sm:$0xff] %v4427_v33 }
 0x1af   :  { %v4432_v34 = vld [vmem:[%s6033_s5 + $0x90] sm:$0xff] }
 0x1b0   :  { %v605_v37 = vpop.f32.mrf.mxu0  ;;  %6165 = vst [vmem:[#allocation11_spill] sm:$0xff] %v4432_v34 }
 0x1b1   :  { %v619_v38 = vadd.f32 %v605_v37, %v531_v36  ;;  %v4444_v36 = vld [vmem:[%s6033_s5 + $0x78] sm:$0xff]  ;;  %v4451_v37 = vld [vmem:[%s6033_s5 + $0x60] sm:$0xff] }
 0x1b2   :  { %v3485_v41 = vpop.f32.mrf.mxu0  ;;  %6167 = vst [vmem:[#allocation13_spill] sm:$0xff] %v4444_v36  ;;  %6168 = vst [vmem:[#allocation14_spill] sm:$0xff] %v4451_v37 }
 0x1b3   :  { %3317 = vmatmul.mubr.msk.f32.vlgmr.msra.gmra.mxu1 %vm660_vm6, %v619_v38  ;;  %3320 = vmatmul.mubr.msk.f32.vlgmr.msra.gmra.mxu0 %vm660_vm6, %v619_v38  ;;  %v4456_v38 = vld [vmem:[%s6033_s5 + $0x70] sm:$0xff]  ;;  %v4463_v41 = vld [vmem:[%s6033_s5 + $0x48] sm:$0xff] }
 0x1b4   :  { %917 = vmatpush1.msra.mxu1 %v4157_v39  ;;  %988 = vmatpush1.msra.mxu0 %v4162_v40  ;;  %v610_v48 = vpop.f32.mrf.mxu0  ;;  %6169 = vst [vmem:[#allocation15_spill] sm:$0xff] %v4456_v38  ;;  %6170 = vst [vmem:[#allocation16_spill] sm:$0xff] %v4463_v41 }
 0x1b5   :  { %v620_v50 = vadd.f32 %v610_v48, %v532_v45  ;;  %918 = vmatprep.subr.mxu1 %v4167_v42  ;;  %989 = vmatprep.subr.mxu0 %v4172_v43  ;;  %v4475_v45 = vld [vmem:[%s6033_s5 + $0x40] sm:$0xff]  ;;  %v4480_v48 = vld [vmem:[%s6033_s5 + $0x50] sm:$0xff] }
 0x1b6   :  { %919 = vmatpush1.msra.mxu1 %v4179_v46  ;;  %990 = vmatpush1.msra.mxu0 %v4184_v47  ;;  %v3488_v53 = vpop.f32.mrf.mxu0  ;;  %6172 = vst [vmem:[#allocation18_spill] sm:$0xff] %v4475_v45  ;;  %6173 = vst [vmem:[#allocation19_spill] sm:$0xff] %v4480_v48 }
 0x1b7   :  { %740 = vmatprep.mubr.f32.mxu1 %v6038_v3  ;;  %823 = vmatprep.mubr.f32.mxu0 %v6038_v3  ;;  %v4499_v53 = vld [vmem:[%s6033_s5 + $0x20] sm:$0xff] }
 0x1b8   :  { %920 = vmatprep.subr.mxu1 %v4193_v51  ;;  %991 = vmatprep.subr.mxu0 %v4198_v52  ;;  %v615_v56 = vpop.f32.mrf.mxu0  ;;  %6176 = vst [vmem:[#allocation22_spill] sm:$0xff] %v4499_v53 }
 0x1b9   :  { %3318 = vmatmul.mubr.msk.f32.gmra.mxu1 %vm660_vm6, %v620_v50  ;;  %3321 = vmatmul.mubr.msk.f32.gmra.mxu0 %vm660_vm6, %v620_v50  ;;  %v621_v63 = vadd.f32 %v615_v56, %v533_v59  ;;  %v4492_v50 = vld [vmem:[%s6033_s5 + $0x38] sm:$0xff]  ;;  %v4504_v56 = vld [vmem:[%s6033_s5 + $0x30] sm:$0xff]  ;;  %v4511_v59 = vld [vmem:[%s6033_s5 + $0x8] sm:$0xff] }
 0x1ba   :  { %921 = vmatpush1.msra.mxu1 %v4207_v54  ;;  %992 = vmatpush1.msra.mxu0 %v4212_v55  ;;  %v3491_v62 = vpop.f32.mrf.mxu0  ;;  %6175 = vst [vmem:[#allocation21_spill] sm:$0xff] %v4492_v50  ;;  %6177 = vst [vmem:[#allocation23_spill] sm:$0xff] %v4504_v56 }
 0x1bb   :  { %922 = vmatprep.subr.mxu1 %v4219_v57  ;;  %993 = vmatprep.subr.mxu0 %v4224_v58  ;;  %6178 = vst [vmem:[#allocation24_spill] sm:$0xff] %v4511_v59  ;;  %v4516_v62 = vld [vmem:[%s6033_s5 + $0x18] sm:$0xff] }
 0x1bc   :  { %923 = vmatpush1.msra.mxu1 %v4231_v60  ;;  %994 = vmatpush1.msra.mxu0 %v4236_v61  ;;  %6179 = vst [vmem:[#allocation25_spill] sm:$0xff] %v4516_v62 }
 0x1bd   :  { %746 = vmatprep.mubr.f32.mxu1 %v6038_v3  ;;  %829 = vmatprep.mubr.f32.mxu0 %v6038_v3  ;;  %v4530_v3 = vld [vmem:[%s6033_s5 + $0x10] sm:$0xff] }
 0x1be   :  { %924 = vmatprep.subr.mxu1 %v4245_v0  ;;  %995 = vmatprep.subr.mxu0 %v4250_v1  ;;  %6181 = vst [vmem:[#allocation27_spill] sm:$0xff] %v4530_v3 }
 0x1bf   :  { %3319 = vmatmul.mubr.msk.f32.gmra.mxu1 %vm660_vm6, %v621_v63  ;;  %3322 = vmatmul.mubr.msk.f32.gmra.mxu0 %vm660_vm6, %v621_v63  ;;  %v4523_v63 = vld [vmem:[%s6033_s5] sm:$0xff] }
 0x1c0   :  { %925 = vmatpush1.msra.mxu1 %v4259_v2  ;;  %996 = vmatpush1.msra.mxu0 %v4264_v4  ;;  %6180 = vst [vmem:[#allocation26_spill] sm:$0xff] %v4523_v63 }
 0x1c1   :  { %926 = vmatprep.subr.mxu1 %v4271_v5  ;;  %997 = vmatprep.subr.mxu0 %v4276_v8 }
 0x1c2   :  { %927 = vmatpush1.msra.mxu1 %v4283_v9  ;;  %998 = vmatpush1.msra.mxu0 %v4288_v10 }
 0x1c3   :  { %928 = vmatprep.subr.mxu1 %v4295_v11  ;;  %999 = vmatprep.subr.mxu0 %v4300_v12 }
 0x1c4   :  { %929 = vmatpush1.msra.mxu1 %v4307_v13  ;;  %1000 = vmatpush1.msra.mxu0 %v4312_v14 }
 0x1c5   :  { %930 = vmatprep.subr.mxu1 %v4319_v15  ;;  %1001 = vmatprep.subr.mxu0 %v4324_v16 }
 0x1c6   :  { %931 = vmatpush1.msra.mxu1 %v4331_v17  ;;  %1002 = vmatpush1.msra.mxu0 %v4336_v18 }
 0x1c7   :  { %932 = vmatprep.subr.mxu1 %v4343_v19  ;;  %1003 = vmatprep.subr.mxu0 %v4348_v20 }
 0x1c8   :  { %933 = vmatpush1.msra.mxu1 %v4355_v21  ;;  %1004 = vmatpush1.msra.mxu0 %v4360_v22 }
 0x1c9   :  { %934 = vmatprep.subr.mxu1 %v4367_v23  ;;  %1005 = vmatprep.subr.mxu0 %v4372_v24 }
 0x1ca   :  { %935 = vmatpush1.msra.mxu1 %v4379_v25  ;;  %1006 = vmatpush1.msra.mxu0 %v4384_v26 }
 0x1cb   :  { %936 = vmatprep.subr.mxu1 %v4391_v27  ;;  %1007 = vmatprep.subr.mxu0 %v4396_v28 }
 0x1cc   :  { %937 = vmatpush1.msra.mxu1 %v4403_v29  ;;  %1008 = vmatpush1.msra.mxu0 %v4408_v30 }
 0x1cd   :  { %938 = vmatprep.subr.mxu1 %v4415_v31  ;;  %1009 = vmatprep.subr.mxu0 %v4420_v32 }
 0x1ce   :  { %939 = vmatpush1.msra.mxu1 %v4427_v33  ;;  %1010 = vmatpush1.msra.mxu0 %v4432_v34 }
 0x1cf   :  { %940 = vmatprep.subr.mxu1 %v4439_v35  ;;  %1011 = vmatprep.subr.mxu0 %v4444_v36 }
 0x1d0   :  { %941 = vmatpush1.msra.mxu1 %v4451_v37  ;;  %1012 = vmatpush1.msra.mxu0 %v4456_v38 }
 0x1d1   :  { %942 = vmatprep.subr.mxu1 %v4463_v41  ;;  %1013 = vmatprep.subr.mxu0 %v4468_v44 }
 0x1d2   :  { %943 = vmatpush1.msra.mxu1 %v4475_v45  ;;  %1014 = vmatpush1.msra.mxu0 %v4480_v48 }
 0x1d3   :  { %944 = vmatprep.subr.mxu1 %v4487_v49  ;;  %1015 = vmatprep.subr.mxu0 %v4492_v50  ;;  %v6182_v50 = vmov 0.0  }
 0x1d4   :  { %945 = vmatpush1.msra.mxu1 %v4499_v53  ;;  %1016 = vmatpush1.msra.mxu0 %v4504_v56 }
 0x1d5   :  { %946 = vmatprep.subr.mxu1 %v4511_v59  ;;  %1017 = vmatprep.subr.mxu0 %v4516_v62 }
 0x1d6   :  { %947 = vmatpush1.msra.mxu1 %v4523_v63  ;;  %980 = vmatprep.mubr.f32.mxu1 %v6182_v50 }
 0x1d7   :  { %1018 = vmatpush1.msra.mxu0 %v4530_v3  ;;  %1051 = vmatprep.mubr.f32.mxu0 %v6182_v50 }
 0x1d8   :  { %981 = vmatmul.mubr.f32.vlgmr.msra.gmra.mxu1 %v6182_v50  ;;  %1052 = vmatmul.mubr.f32.vlgmr.msra.gmra.mxu0 %v6182_v50 }
 0x1d9   :  { %1090 = vmatprep.subr.mxu1 %v4145_v6  ;;  %1161 = vmatprep.subr.mxu0 %v4150_v7 }
 0x1da   :  { %1091 = vmatpush1.msra.mxu1 %v4157_v39  ;;  %1162 = vmatpush1.msra.mxu0 %v4162_v40 }
 0x1db   :  { %1092 = vmatprep.subr.mxu1 %v4167_v42  ;;  %1163 = vmatprep.subr.mxu0 %v4172_v43 }
 0x1dc   :  { %1093 = vmatpush1.msra.mxu1 %v4179_v46  ;;  %1164 = vmatpush1.msra.mxu0 %v4184_v47 }
 0x1dd   :  { %1094 = vmatprep.subr.mxu1 %v4193_v51  ;;  %1165 = vmatprep.subr.mxu0 %v4198_v52 }
 0x1de   :  { %1095 = vmatpush1.msra.mxu1 %v4207_v54  ;;  %1166 = vmatpush1.msra.mxu0 %v4212_v55 }
 0x1df   :  { %1096 = vmatprep.subr.mxu1 %v4219_v57  ;;  %1167 = vmatprep.subr.mxu0 %v4224_v58 }
 0x1e0   :  { %1097 = vmatpush1.msra.mxu1 %v4231_v60  ;;  %1168 = vmatpush1.msra.mxu0 %v4236_v61 }
 0x1e1   :  { %1098 = vmatprep.subr.mxu1 %v4245_v0  ;;  %1169 = vmatprep.subr.mxu0 %v4250_v1 }
 0x1e2   :  { %1099 = vmatpush1.msra.mxu1 %v4259_v2  ;;  %1170 = vmatpush1.msra.mxu0 %v4264_v4 }
 0x1e3   :  { %1100 = vmatprep.subr.mxu1 %v4271_v5  ;;  %1171 = vmatprep.subr.mxu0 %v4276_v8 }
 0x1e4   :  { %1101 = vmatpush1.msra.mxu1 %v4283_v9  ;;  %1172 = vmatpush1.msra.mxu0 %v4288_v10 }
 0x1e5   :  { %1102 = vmatprep.subr.mxu1 %v4295_v11  ;;  %1173 = vmatprep.subr.mxu0 %v4300_v12 }
 0x1e6   :  { %1103 = vmatpush1.msra.mxu1 %v4307_v13  ;;  %1174 = vmatpush1.msra.mxu0 %v4312_v14 }
 0x1e7   :  { %1104 = vmatprep.subr.mxu1 %v4319_v15  ;;  %1175 = vmatprep.subr.mxu0 %v4324_v16 }
 0x1e8   :  { %1105 = vmatpush1.msra.mxu1 %v4331_v17  ;;  %1176 = vmatpush1.msra.mxu0 %v4336_v18 }
 0x1e9   :  { %1106 = vmatprep.subr.mxu1 %v4343_v19  ;;  %1177 = vmatprep.subr.mxu0 %v4348_v20 }
 0x1ea   :  { %1107 = vmatpush1.msra.mxu1 %v4355_v21  ;;  %1178 = vmatpush1.msra.mxu0 %v4360_v22 }
 0x1eb   :  { %1108 = vmatprep.subr.mxu1 %v4367_v23  ;;  %1179 = vmatprep.subr.mxu0 %v4372_v24 }
 0x1ec   :  { %1109 = vmatpush1.msra.mxu1 %v4379_v25  ;;  %1180 = vmatpush1.msra.mxu0 %v4384_v26 }
 0x1ed   :  { %1110 = vmatprep.subr.mxu1 %v4391_v27  ;;  %1181 = vmatprep.subr.mxu0 %v4396_v28 }
 0x1ee   :  { %1111 = vmatpush1.msra.mxu1 %v4403_v29  ;;  %1182 = vmatpush1.msra.mxu0 %v4408_v30 }
 0x1ef   :  { %1112 = vmatprep.subr.mxu1 %v4415_v31  ;;  %1183 = vmatprep.subr.mxu0 %v4420_v32 }
 0x1f0   :  { %1113 = vmatpush1.msra.mxu1 %v4427_v33  ;;  %1184 = vmatpush1.msra.mxu0 %v4432_v34  ;;  %v6183_v33 = vld [vmem:[#allocation21_spill] sm:$0xff] }
 0x1f1   :  { %1114 = vmatprep.subr.mxu1 %v4439_v35  ;;  %1185 = vmatprep.subr.mxu0 %v4444_v36 }
 0x1f2   :  { %1115 = vmatpush1.msra.mxu1 %v4451_v37  ;;  %1186 = vmatpush1.msra.mxu0 %v4456_v38 }
 0x1f3   :  { %1116 = vmatprep.subr.mxu1 %v4463_v41  ;;  %1187 = vmatprep.subr.mxu0 %v4468_v44 }
 0x1f4   :  { %1117 = vmatpush1.msra.mxu1 %v4475_v45  ;;  %1188 = vmatpush1.msra.mxu0 %v4480_v48 }
 0x1f5   :  { %1118 = vmatprep.subr.mxu1 %v4487_v49  ;;  %1189 = vmatprep.subr.mxu0 %v6183_v33  ;;  %v640_v33 = vlaneseq }
 0x1f6   :  { %1119 = vmatpush1.msra.mxu1 %v4499_v53  ;;  %1190 = vmatpush1.msra.mxu0 %v4504_v56 }
 0x1f7   :  { %1120 = vmatprep.subr.mxu1 %v4511_v59  ;;  %1191 = vmatprep.subr.mxu0 %v4516_v62  ;;  %v641_v53 = vshrl.u32 %v640_v33, 7  ;;  %v638_v62 = vld [vmem:[%s6034_s6] sm:$0xf] }
 0x1f8   :  { %1121 = vmatpush1.msra.mxu1 %v4523_v63  ;;  %1154 = vmatprep.mubr.f32.mxu1 %v6182_v50 }
 0x1f9   :  { %1192 = vmatpush1.msra.mxu0 %v4530_v3  ;;  %1225 = vmatprep.mubr.f32.mxu0 %v6182_v50  ;;  %v642_v49 = vsub.s32 0, %v641_v53  ;;  %v650_v56 = vsub.s32 2, %v641_v53  ;;  %v646_v59 = vsub.s32 1, %v641_v53  ;;  %v654_v63 = vsub.s32 3, %v641_v53 }
 0x1fa   :  { %1282 = vmatprep.subr.mxu1 %v4145_v6  ;;  %1353 = vmatprep.subr.mxu0 %v4150_v7 }
 0x1fb   :  { %v643_v48 = vrot.slane %v638_v62, %v642_v49  ;;  %v651_v45 = vrot.slane %v638_v62, %v650_v56  ;;  %v647_v44 = vrot.slane %v638_v62, %v646_v59  ;;  %v655_v3 = vrot.slane %v638_v62, %v654_v63 }
 0x273   :  { %v736_v41 = vpop.f32.mrf.mxu1  ;;  %v819_v50 = vpop.f32.mrf.mxu0 }
 0x274   :  { %v737_v38 = vadd.f32 %v736_v41, %v643_v48  ;;  %v820_v6 = vadd.f32 %v819_v50, %v651_v45 }
 0x275   :  { %v738_v37 = vpop.f32.mrf.mxu1  ;;  %v821_v7 = vpop.f32.mrf.mxu0 }
 0x276   :  { %836 = vst [vmem:[#allocation2 + $0x30] sm:$0xff] %v737_v38  ;;  %838 = vst [vmem:[#allocation2 + $0x58] sm:$0xff] %v820_v6  ;;  %v739_v33 = vadd.f32 %v738_v37, %v647_v44  ;;  %v822_v36 = vadd.f32 %v821_v7, %v655_v3 }
 0x278   :  { %837 = vst [vmem:[#allocation2] sm:$0xff] %v739_v33  ;;  %839 = vst [vmem:[#allocation2 + $0x18] sm:$0xff] %v822_v36 }
 0x279   :  { %v742_v35 = vpop.f32.mrf.mxu1  ;;  %v825_v34 = vpop.f32.mrf.mxu0 }
 0x27a   :  { %v743_v32 = vadd.f32 %v742_v35, %v643_v48  ;;  %v826_v53 = vadd.f32 %v825_v34, %v651_v45 }
 0x27b   :  { %v744_v49 = vpop.f32.mrf.mxu1  ;;  %v827_v56 = vpop.f32.mrf.mxu0 }
 0x27c   :  { %840 = vst [vmem:[#allocation2 + $0x50] sm:$0xff] %v743_v32  ;;  %842 = vst [vmem:[#allocation2 + $0x8] sm:$0xff] %v826_v53  ;;  %v745_v59 = vadd.f32 %v744_v49, %v647_v44  ;;  %v828_v62 = vadd.f32 %v827_v56, %v655_v3 }
 0x27d   :  { %v912_v34 = vld [vmem:[#allocation2 + $0x30] sm:$0x3] }
 0x27e   :  { %841 = vst [vmem:[#allocation2 + $0x20] sm:$0xff] %v745_v59  ;;  %843 = vst [vmem:[#allocation2 + $0x38] sm:$0xff] %v828_v62 }
 0x27f   :  { %v748_v41 = vpop.f32.mrf.mxu1  ;;  %v831_v50 = vpop.f32.mrf.mxu0  ;;  %v913_v33 = vld [vmem:[#allocation2] sm:$0x3] }
 0x280   :  { %v749_v38 = vadd.f32 %v748_v41, %v643_v48  ;;  %v832_v6 = vadd.f32 %v831_v50, %v651_v45  ;;  %v915_v48 = vld [vmem:[#allocation2 + $0x18] sm:$0x3] }
 0x281   :  { %v750_v37 = vpop.f32.mrf.mxu1  ;;  %v833_v7 = vpop.f32.mrf.mxu0 }
 0x282   :  { %844 = vst [vmem:[#allocation2 + $0x28] sm:$0xff] %v749_v38  ;;  %846 = vst [vmem:[#allocation2 + $0x10] sm:$0xff] %v832_v6  ;;  %v751_v36 = vadd.f32 %v750_v37, %v647_v44  ;;  %v834_v63 = vadd.f32 %v833_v7, %v655_v3  ;;  %v914_v38 = vld [vmem:[#allocation2 + $0x58] sm:$0x3] }
 0x284   :  { %845 = vst [vmem:[#allocation2 + $0x48] sm:$0xff] %v751_v36  ;;  %847 = vst [vmem:[#allocation2 + $0x40] sm:$0xff] %v834_v63 }
 0x298   :  { %v982_v35 = vpop.f32.mrf.mxu1  ;;  %v1053_v59 = vpop.f32.mrf.mxu0 }
 0x299   :  { %v1058_v32 = vadd.f32 %v982_v35, %v912_v34  ;;  %v1060_v3 = vadd.f32 %v1053_v59, %v914_v38  ;;  %v6188_v38 = vld [vmem:[#allocation13_spill] sm:$0xff] }
 0x29a   :  { %v984_v53 = vpop.f32.mrf.mxu1  ;;  %v1055_v45 = vpop.f32.mrf.mxu0 }
 0x29b   :  { %v3323_v49 = vmul.f32 -1.442695, %v1058_v32  ;;  %v1059_v56 = vadd.f32 %v984_v53, %v913_v33  ;;  %v1061_v41 = vadd.f32 %v1055_v45, %v915_v48  ;;  %v6184_v45 = vld [vmem:[#allocation9_spill] sm:$0xff]  ;;  %v6185_v48 = vld [vmem:[#allocation10_spill] sm:$0xff] }
 0x29d   :  { %3534 = vpow2.f32 %v3323_v49  ;;  %v3324_v62 = vmul.f32 -1.442695, %v1059_v56  ;;  %v3325_v50 = vmul.f32 -1.442695, %v1061_v41  ;;  %v6186_v41 = vld [vmem:[#allocation11_spill] sm:$0xff] }
 0x29f   :  { %3536 = vpow2.f32 %v3324_v62 }
 0x2a0   :  { %3538 = vpow2.f32 %v3325_v50  ;;  %v6187_v50 = vld [vmem:[#allocation12_spill] sm:$0xff] }
 0x2aa   :  { %v3535_v44 = vpop.eup %3534 }
 0x2ab   :  { %v1065_v6 = vadd.f32 1.0, %v3535_v44  ;;  %v6189_v44 = vld [vmem:[#allocation14_spill] sm:$0xff] }
 0x2ac   :  { %v3537_v37 = vpop.eup %3536 }
 0x2ad   :  { %3540 = vrcp.f32 %v1065_v6  ;;  %v1071_v7 = vadd.f32 1.0, %v3537_v37  ;;  %v3539_v36 = vpop.eup %3538  ;;  %v6191_v6 = vld [vmem:[#allocation16_spill] sm:$0xff]  ;;  %v6192_v37 = vld [vmem:[#allocation17_spill] sm:$0xff] }
 0x2ae   :  { %3542 = vtanh.f32 %v1060_v3  ;;  %v1078_v32 = vadd.f32 1.0, %v3539_v36  ;;  %v6190_v3 = vld [vmem:[#allocation15_spill] sm:$0xff] }
 0x2af   :  { %3544 = vrcp.f32 %v1071_v7  ;;  %v6193_v7 = vld [vmem:[#allocation18_spill] sm:$0xff]  ;;  %v6194_v36 = vld [vmem:[#allocation19_spill] sm:$0xff] }
 0x2b0   :  { %3546 = vrcp.f32 %v1078_v32  ;;  %v6198_v32 = vld [vmem:[#allocation23_spill] sm:$0xff] }
 0x2ba   :  { %v3541_v63 = vpop.eup %3540 }
 0x2bb   :  { %v3543_v34 = vpop.eup %3542 }
 0x2bc   :  { %v3545_v35 = vpop.eup %3544  ;;  %v1082_v53 = vmul.f32 %v3543_v34, %v3541_v63  ;;  %v6195_v63 = vld [vmem:[#allocation20_spill] sm:$0xff]  ;;  %v6196_v34 = vld [vmem:[#allocation21_spill] sm:$0xff] }
 0x2bd   :  { %v1081_v33 = vmul.f32 0.0, %v3545_v35  ;;  %v3547_v56 = vpop.eup %3546  ;;  %v6197_v35 = vld [vmem:[#allocation22_spill] sm:$0xff] }
 0x2bf   :  { %v4611_v49 = vadd.f32 %v1082_v53, %v1081_v33  ;;  %v6199_v33 = vld [vmem:[#allocation24_spill] sm:$0xff]  ;;  %v6200_v53 = vld [vmem:[#allocation25_spill] sm:$0xff] }
 0x2c1   :  { %3548 = vtanh.f32 %v4611_v49 }
 0x2ce   :  { %v3549_v59 = vpop.eup %3548 }
 0x2cf   :  { %v1085_v62 = vmul.f32 %v3549_v59, %v3547_v56  ;;  %v6201_v56 = vld [vmem:[#allocation26_spill] sm:$0xff]  ;;  %v6202_v59 = vmov 0.0  }
 0x2d1   :  { %1155 = vmatmul.mubr.f32.vlgmr.msra.gmra.mxu1 %v1085_v62  ;;  %1226 = vmatmul.mubr.f32.vlgmr.msra.gmra.mxu0 %v1085_v62  ;;  %v6203_v62 = vld [vmem:[#allocation27_spill] sm:$0xff] }
 0x2d2   :  { %1283 = vmatpush1.msra.mxu1 %v4157_v39  ;;  %1354 = vmatpush1.msra.mxu0 %v4162_v40 }
 0x2d3   :  { %1284 = vmatprep.subr.mxu1 %v4167_v42  ;;  %1355 = vmatprep.subr.mxu0 %v4172_v43 }
 0x2d4   :  { %1285 = vmatpush1.msra.mxu1 %v4179_v46  ;;  %1356 = vmatpush1.msra.mxu0 %v4184_v47 }
 0x2d5   :  { %1286 = vmatprep.subr.mxu1 %v4193_v51  ;;  %1357 = vmatprep.subr.mxu0 %v4198_v52 }
 0x2d6   :  { %1287 = vmatpush1.msra.mxu1 %v4207_v54  ;;  %1358 = vmatpush1.msra.mxu0 %v4212_v55 }
 0x2d7   :  { %1288 = vmatprep.subr.mxu1 %v4219_v57  ;;  %1359 = vmatprep.subr.mxu0 %v4224_v58 }
 0x2d8   :  { %1289 = vmatpush1.msra.mxu1 %v4231_v60  ;;  %1360 = vmatpush1.msra.mxu0 %v4236_v61 }
 0x2d9   :  { %1290 = vmatprep.subr.mxu1 %v4245_v0  ;;  %1361 = vmatprep.subr.mxu0 %v4250_v1 }
 0x2da   :  { %1291 = vmatpush1.msra.mxu1 %v4259_v2  ;;  %1362 = vmatpush1.msra.mxu0 %v4264_v4 }
 0x2db   :  { %1292 = vmatprep.subr.mxu1 %v4271_v5  ;;  %1363 = vmatprep.subr.mxu0 %v4276_v8 }
 0x2dc   :  { %1293 = vmatpush1.msra.mxu1 %v4283_v9  ;;  %1364 = vmatpush1.msra.mxu0 %v4288_v10 }
 0x2dd   :  { %1294 = vmatprep.subr.mxu1 %v4295_v11  ;;  %1365 = vmatprep.subr.mxu0 %v4300_v12 }
 0x2de   :  { %1295 = vmatpush1.msra.mxu1 %v4307_v13  ;;  %1366 = vmatpush1.msra.mxu0 %v4312_v14 }
 0x2df   :  { %1296 = vmatprep.subr.mxu1 %v4319_v15  ;;  %1367 = vmatprep.subr.mxu0 %v4324_v16 }
 0x2e0   :  { %1297 = vmatpush1.msra.mxu1 %v4331_v17  ;;  %1368 = vmatpush1.msra.mxu0 %v4336_v18 }
 0x2e1   :  { %1298 = vmatprep.subr.mxu1 %v4343_v19  ;;  %1369 = vmatprep.subr.mxu0 %v4348_v20 }
 0x2e2   :  { %1299 = vmatpush1.msra.mxu1 %v4355_v21  ;;  %1370 = vmatpush1.msra.mxu0 %v4360_v22 }
 0x2e3   :  { %1300 = vmatprep.subr.mxu1 %v4367_v23  ;;  %1371 = vmatprep.subr.mxu0 %v4372_v24 }
 0x2e4   :  { %1301 = vmatpush1.msra.mxu1 %v4379_v25  ;;  %1372 = vmatpush1.msra.mxu0 %v4384_v26 }
 0x2e5   :  { %1302 = vmatprep.subr.mxu1 %v4391_v27  ;;  %1373 = vmatprep.subr.mxu0 %v4396_v28 }
 0x2e6   :  { %1303 = vmatpush1.msra.mxu1 %v4403_v29  ;;  %1374 = vmatpush1.msra.mxu0 %v4408_v30 }
 0x2e7   :  { %1304 = vmatprep.subr.mxu1 %v4415_v31  ;;  %1375 = vmatprep.subr.mxu0 %v6184_v45 }
 0x2e8   :  { %1305 = vmatpush1.msra.mxu1 %v6185_v48  ;;  %1376 = vmatpush1.msra.mxu0 %v6186_v41 }
 0x2e9   :  { %1306 = vmatprep.subr.mxu1 %v6187_v50  ;;  %1377 = vmatprep.subr.mxu0 %v6188_v38 }
 0x2ea   :  { %1307 = vmatpush1.msra.mxu1 %v6189_v44  ;;  %1378 = vmatpush1.msra.mxu0 %v6190_v3 }
 0x2eb   :  { %1308 = vmatprep.subr.mxu1 %v6191_v6  ;;  %1379 = vmatprep.subr.mxu0 %v6192_v37 }
 0x2ec   :  { %1309 = vmatpush1.msra.mxu1 %v6193_v7  ;;  %1380 = vmatpush1.msra.mxu0 %v6194_v36  ;;  %v6204_v36 = vld [vmem:[#allocation6_spill] sm:$0xff]  ;;  %v1086_v7 = vld [vmem:[#allocation2 + $0x30] sm:$0xc] }
 0x2ed   :  { %1310 = vmatprep.subr.mxu1 %v6195_v63  ;;  %1381 = vmatprep.subr.mxu0 %v6196_v34  ;;  %v6205_v63 = vld [vmem:[#allocation7_spill] sm:$0xff] }
 0x2ee   :  { %1311 = vmatpush1.msra.mxu1 %v6197_v35  ;;  %1382 = vmatpush1.msra.mxu0 %v6198_v32 }
 0x2ef   :  { %1312 = vmatprep.subr.mxu1 %v6199_v33  ;;  %1383 = vmatprep.subr.mxu0 %v6200_v53  ;;  %v1087_v53 = vld [vmem:[#allocation2] sm:$0xc] }
 0x2f0   :  { %1313 = vmatpush1.msra.mxu1 %v6201_v56  ;;  %1346 = vmatprep.mubr.f32.mxu1 %v6202_v59 }
 0x2f1   :  { %1384 = vmatpush1.msra.mxu0 %v6203_v62  ;;  %1417 = vmatprep.mubr.f32.mxu0 %v6202_v59  ;;  %v1089_v59 = vld [vmem:[#allocation2 + $0x18] sm:$0xc] }
 0x2f2   :  { %1474 = vmatprep.subr.mxu1 %v6204_v36  ;;  %1545 = vmatprep.subr.mxu0 %v6205_v63  ;;  %v1088_v63 = vld [vmem:[#allocation2 + $0x58] sm:$0xc] }
 0x391   :  { %v1156_v34 = vpop.f32.mrf.mxu1  ;;  %v1227_v33 = vpop.f32.mrf.mxu0 }
 0x392   :  { %v1236_v35 = vrot.slane %v1156_v34, 6  ;;  %v1238_v36 = vrot.slane %v1227_v33, 6 }
 0x393   :  { %v1158_v32 = vpop.f32.mrf.mxu1  ;;  %v1229_v38 = vpop.f32.mrf.mxu0 }
 0x394   :  { %v1244_v37 = vadd.f32 %v1236_v35, %v1086_v7  ;;  %v1237_v6 = vrot.slane %v1158_v32, 6  ;;  %v1239_v62 = vrot.slane %v1229_v38, 6  ;;  %v1246_v34 = vadd.f32 %v1238_v36, %v1088_v63  ;;  %v6219_v36 = vld [vmem:[#allocation21_spill] sm:$0xff]  ;;  %v6220_v63 = vld [vmem:[#allocation22_spill] sm:$0xff] }
 0x396   :  { %v3326_v3 = vmul.f32 -1.442695, %v1244_v37  ;;  %v1245_v56 = vadd.f32 %v1237_v6, %v1087_v53  ;;  %v1247_v50 = vadd.f32 %v1239_v62, %v1089_v59  ;;  %v6215_v53 = vld [vmem:[#allocation17_spill] sm:$0xff]  ;;  %v6217_v59 = vld [vmem:[#allocation19_spill] sm:$0xff]  ;;  %v6218_v62 = vld [vmem:[#allocation20_spill] sm:$0xff] }
 0x398   :  { %3550 = vpow2.f32 %v3326_v3  ;;  %v3327_v44 = vmul.f32 -1.442695, %v1245_v56  ;;  %v3328_v41 = vmul.f32 -1.442695, %v1247_v50  ;;  %v6216_v56 = vld [vmem:[#allocation18_spill] sm:$0xff] }
 0x39a   :  { %3552 = vpow2.f32 %v3327_v44  ;;  %v1268_v44 = vrot.slane %v4611_v49, 6  ;;  %v6214_v49 = vld [vmem:[#allocation16_spill] sm:$0xff] }
 0x39b   :  { %3554 = vpow2.f32 %v3328_v41 }
 0x3a5   :  { %v3551_v48 = vpop.eup %3550 }
 0x3a6   :  { %v1251_v45 = vadd.f32 1.0, %v3551_v48 }
 0x3a7   :  { %v3553_v31 = vpop.eup %3552 }
 0x3a8   :  { %3556 = vrcp.f32 %v1251_v45  ;;  %v1257_v7 = vadd.f32 1.0, %v3553_v31  ;;  %v3555_v6 = vpop.eup %3554 }
 0x3a9   :  { %3558 = vtanh.f32 %v1246_v34  ;;  %v1264_v35 = vadd.f32 1.0, %v3555_v6  ;;  %v6221_v34 = vld [vmem:[#allocation23_spill] sm:$0xff]  ;;  %v6223_v6 = vld [vmem:[#allocation25_spill] sm:$0xff] }
 0x3aa   :  { %3560 = vrcp.f32 %v1257_v7  ;;  %v6222_v7 = vld [vmem:[#allocation24_spill] sm:$0xff] }
 0x3ab   :  { %3562 = vrcp.f32 %v1264_v35  ;;  %v4757_v35 = vld [vmem:[%s6033_s5 + $0x1f8] sm:$0xff] }
 0x3ac   :  { %6228 = vst [vmem:[#allocation7_spill] sm:$0xff] %v4757_v35 }
 0x3b5   :  { %v3557_v3 = vpop.eup %3556 }
 0x3b6   :  { %v3559_v37 = vpop.eup %3558 }
 0x3b7   :  { %v3561_v38 = vpop.eup %3560  ;;  %v1271_v32 = vmul.f32 %v3559_v37, %v3557_v3  ;;  %v6224_v3 = vld [vmem:[#allocation26_spill] sm:$0xff]  ;;  %v6225_v37 = vmov 0.0  }
 0x3b8   :  { %v1270_v33 = vmul.f32 %v3561_v38, %v1268_v44  ;;  %v3563_v48 = vpop.eup %3562  ;;  %v6226_v44 = vld [vmem:[#allocation27_spill] sm:$0xff] }
 0x3b9   :  { %v4751_v38 = vld [vmem:[%s6033_s5 + $0x1e8] sm:$0xff] }
 0x3ba   :  { %v4681_v50 = vadd.f32 %v1271_v32, %v1270_v33  ;;  %6227 = vst [vmem:[#allocation6_spill] sm:$0xff] %v4751_v38 }
 0x3bc   :  { %3564 = vtanh.f32 %v4681_v50 }
 0x3c9   :  { %v3565_v41 = vpop.eup %3564 }
 0x3ca   :  { %v1274_v45 = vmul.f32 %v3565_v41, %v3563_v48  ;;  %v1275_v48 = vld [vmem:[#allocation2 + $0x30] sm:$0x30] }
 0x3cc   :  { %v1280_v31 = vrot.slane %v1274_v45, 2 }
 0x3ce   :  { %1347 = vmatmul.mubr.f32.vlgmr.msra.gmra.mxu1 %v1280_v31  ;;  %1418 = vmatmul.mubr.f32.vlgmr.msra.gmra.mxu0 %v1280_v31 }
 0x3cf   :  { %1475 = vmatpush1.msra.mxu1 %v4157_v39  ;;  %1546 = vmatpush1.msra.mxu0 %v4162_v40  ;;  %v6206_v39 = vld [vmem:[#allocation8_spill] sm:$0xff]  ;;  %v6207_v40 = vld [vmem:[#allocation9_spill] sm:$0xff] }
 0x3d0   :  { %1476 = vmatprep.subr.mxu1 %v4167_v42  ;;  %1547 = vmatprep.subr.mxu0 %v4172_v43  ;;  %v6208_v42 = vld [vmem:[#allocation10_spill] sm:$0xff]  ;;  %v6209_v43 = vld [vmem:[#allocation11_spill] sm:$0xff] }
 0x3d1   :  { %1477 = vmatpush1.msra.mxu1 %v4179_v46  ;;  %1548 = vmatpush1.msra.mxu0 %v4184_v47  ;;  %v6210_v46 = vld [vmem:[#allocation12_spill] sm:$0xff]  ;;  %v6211_v47 = vld [vmem:[#allocation13_spill] sm:$0xff] }
 0x3d2   :  { %1478 = vmatprep.subr.mxu1 %v4193_v51  ;;  %1549 = vmatprep.subr.mxu0 %v4198_v52  ;;  %v6212_v51 = vld [vmem:[#allocation14_spill] sm:$0xff]  ;;  %v6213_v52 = vld [vmem:[#allocation15_spill] sm:$0xff] }
 0x3d3   :  { %1479 = vmatpush1.msra.mxu1 %v4207_v54  ;;  %1550 = vmatpush1.msra.mxu0 %v4212_v55 }
 0x3d4   :  { %1480 = vmatprep.subr.mxu1 %v4219_v57  ;;  %1551 = vmatprep.subr.mxu0 %v4224_v58 }
 0x3d5   :  { %1481 = vmatpush1.msra.mxu1 %v4231_v60  ;;  %1552 = vmatpush1.msra.mxu0 %v4236_v61 }
 0x3d6   :  { %1482 = vmatprep.subr.mxu1 %v4245_v0  ;;  %1553 = vmatprep.subr.mxu0 %v4250_v1 }
 0x3d7   :  { %1483 = vmatpush1.msra.mxu1 %v4259_v2  ;;  %1554 = vmatpush1.msra.mxu0 %v4264_v4 }
 0x3d8   :  { %1484 = vmatprep.subr.mxu1 %v4271_v5  ;;  %1555 = vmatprep.subr.mxu0 %v4276_v8 }
 0x3d9   :  { %1485 = vmatpush1.msra.mxu1 %v4283_v9  ;;  %1556 = vmatpush1.msra.mxu0 %v4288_v10 }
 0x3da   :  { %1486 = vmatprep.subr.mxu1 %v4295_v11  ;;  %1557 = vmatprep.subr.mxu0 %v4300_v12 }
 0x3db   :  { %1487 = vmatpush1.msra.mxu1 %v4307_v13  ;;  %1558 = vmatpush1.msra.mxu0 %v4312_v14 }
 0x3dc   :  { %1488 = vmatprep.subr.mxu1 %v4319_v15  ;;  %1559 = vmatprep.subr.mxu0 %v4324_v16 }
 0x3dd   :  { %1489 = vmatpush1.msra.mxu1 %v4331_v17  ;;  %1560 = vmatpush1.msra.mxu0 %v4336_v18 }
 0x3de   :  { %1490 = vmatprep.subr.mxu1 %v4343_v19  ;;  %1561 = vmatprep.subr.mxu0 %v4348_v20 }
 0x3df   :  { %1491 = vmatpush1.msra.mxu1 %v4355_v21  ;;  %1562 = vmatpush1.msra.mxu0 %v4360_v22 }
 0x3e0   :  { %1492 = vmatprep.subr.mxu1 %v4367_v23  ;;  %1563 = vmatprep.subr.mxu0 %v4372_v24 }
 0x3e1   :  { %1493 = vmatpush1.msra.mxu1 %v4379_v25  ;;  %1564 = vmatpush1.msra.mxu0 %v4384_v26 }
 0x3e2   :  { %1494 = vmatprep.subr.mxu1 %v4391_v27  ;;  %1565 = vmatprep.subr.mxu0 %v4396_v28 }
 0x3e3   :  { %1495 = vmatpush1.msra.mxu1 %v4403_v29  ;;  %1566 = vmatpush1.msra.mxu0 %v4408_v30 }
 0x3e4   :  { %1496 = vmatprep.subr.mxu1 %v6206_v39  ;;  %1567 = vmatprep.subr.mxu0 %v6207_v40 }
 0x3e5   :  { %1497 = vmatpush1.msra.mxu1 %v6208_v42  ;;  %1568 = vmatpush1.msra.mxu0 %v6209_v43 }
 0x3e6   :  { %1498 = vmatprep.subr.mxu1 %v6210_v46  ;;  %1569 = vmatprep.subr.mxu0 %v6211_v47 }
 0x3e7   :  { %1499 = vmatpush1.msra.mxu1 %v6212_v51  ;;  %1570 = vmatpush1.msra.mxu0 %v6213_v52 }
 0x3e8   :  { %1500 = vmatprep.subr.mxu1 %v6214_v49  ;;  %1571 = vmatprep.subr.mxu0 %v6215_v53 }
 0x3e9   :  { %1501 = vmatpush1.msra.mxu1 %v6216_v56  ;;  %1572 = vmatpush1.msra.mxu0 %v6217_v59 }
 0x3ea   :  { %1502 = vmatprep.subr.mxu1 %v6218_v62  ;;  %1573 = vmatprep.subr.mxu0 %v6219_v36 }
 0x3eb   :  { %1503 = vmatpush1.msra.mxu1 %v6220_v63  ;;  %1574 = vmatpush1.msra.mxu0 %v6221_v34  ;;  %v1278_v63 = vld [vmem:[#allocation2 + $0x18] sm:$0x30] }
 0x3ec   :  { %1504 = vmatprep.subr.mxu1 %v6222_v7  ;;  %1575 = vmatprep.subr.mxu0 %v6223_v6 }
 0x3ed   :  { %1505 = vmatpush1.msra.mxu1 %v6224_v3  ;;  %1538 = vmatprep.mubr.f32.mxu1 %v6225_v37 }
 0x3ee   :  { %1576 = vmatpush1.msra.mxu0 %v6226_v44  ;;  %1609 = vmatprep.mubr.f32.mxu0 %v6225_v37  ;;  %v1276_v37 = vld [vmem:[#allocation2] sm:$0x30] }
 0x3ef   :  { %1666 = vmatprep.subr.mxu1 %v4751_v38  ;;  %1737 = vmatprep.subr.mxu0 %v4757_v35  ;;  %v1277_v35 = vld [vmem:[#allocation2 + $0x58] sm:$0x30] }
 0x48e   :  { %v1348_v32 = vpop.f32.mrf.mxu1  ;;  %v1419_v31 = vpop.f32.mrf.mxu0 }
 0x48f   :  { %v1428_v33 = vrot.slane %v1348_v32, 4  ;;  %v1430_v62 = vrot.slane %v1419_v31, 4  ;;  %v4803_v31 = vld [vmem:[%s6033_s5 + $0x1a8] sm:$0xff] }
 0x490   :  { %v1350_v41 = vpop.f32.mrf.mxu1  ;;  %v1421_v38 = vpop.f32.mrf.mxu0 }
 0x491   :  { %v1436_v45 = vadd.f32 %v1428_v33, %v1275_v48  ;;  %v1429_v44 = vrot.slane %v1350_v41, 4  ;;  %v1431_v34 = vrot.slane %v1421_v38, 4  ;;  %v1438_v32 = vadd.f32 %v1430_v62, %v1277_v35  ;;  %v4767_v62 = vld [vmem:[%s6033_s5 + $0x1e0] sm:$0xff]  ;;  %v4779_v35 = vld [vmem:[%s6033_s5 + $0x1c8] sm:$0xff]  ;;  %v4785_v48 = vld [vmem:[%s6033_s5 + $0x1d8] sm:$0xff] }
 0x492   :  { %v4791_v41 = vld [vmem:[%s6033_s5 + $0x1c0] sm:$0xff] }
 0x493   :  { %v3329_v3 = vmul.f32 -1.442695, %v1436_v45  ;;  %v1437_v6 = vadd.f32 %v1429_v44, %v1276_v37  ;;  %v1439_v36 = vadd.f32 %v1431_v34, %v1278_v63  ;;  %v4797_v45 = vld [vmem:[%s6033_s5 + $0x1d0] sm:$0xff] }
 0x495   :  { %3566 = vpow2.f32 %v3329_v3  ;;  %v3330_v7 = vmul.f32 -1.442695, %v1437_v6  ;;  %v3331_v59 = vmul.f32 -1.442695, %v1439_v36 }
 0x497   :  { %3568 = vpow2.f32 %v3330_v7  ;;  %v1460_v7 = vrot.slane %v4681_v50, 6  ;;  %v4773_v50 = vld [vmem:[%s6033_s5 + $0x1f0] sm:$0xff] }
 0x498   :  { %3570 = vpow2.f32 %v3331_v59 }
 0x4a2   :  { %v3567_v56 = vpop.eup %3566 }
 0x4a3   :  { %v1443_v53 = vadd.f32 1.0, %v3567_v56 }
 0x4a4   :  { %v3569_v49 = vpop.eup %3568 }
 0x4a5   :  { %3572 = vrcp.f32 %v1443_v53  ;;  %v1449_v33 = vadd.f32 1.0, %v3569_v49  ;;  %v3571_v37 = vpop.eup %3570 }
 0x4a6   :  { %3574 = vtanh.f32 %v1438_v32  ;;  %v1456_v38 = vadd.f32 1.0, %v3571_v37  ;;  %v4809_v32 = vld [vmem:[%s6033_s5 + $0x1b8] sm:$0xff] }
 0x4a7   :  { %3576 = vrcp.f32 %v1449_v33 }
 0x4a8   :  { %3578 = vrcp.f32 %v1456_v38 }
 0x4b2   :  { %v3573_v3 = vpop.eup %3572 }
 0x4b3   :  { %v3575_v6 = vpop.eup %3574 }
 0x4b4   :  { %v3577_v44 = vpop.eup %3576  ;;  %v1463_v63 = vmul.f32 %v3575_v6, %v3573_v3 }
 0x4b5   :  { %v1462_v34 = vmul.f32 %v3577_v44, %v1460_v7  ;;  %v3579_v56 = vpop.eup %3578 }
 0x4b7   :  { %v4761_v36 = vadd.f32 %v1463_v63, %v1462_v34 }
 0x4b9   :  { %3580 = vtanh.f32 %v4761_v36 }
 0x4c6   :  { %v3581_v59 = vpop.eup %3580 }
 0x4c7   :  { %v1466_v53 = vmul.f32 %v3581_v59, %v3579_v56  ;;  %v4891_v56 = vld [vmem:[%s6033_s5 + $0x1b0] sm:$0xff]  ;;  %v4897_v59 = vld [vmem:[%s6033_s5 + $0x188] sm:$0xff] }
 0x4c9   :  { %v1472_v49 = vrot.slane %v1466_v53, 4  ;;  %v4903_v53 = vld [vmem:[%s6033_s5 + $0x198] sm:$0xff] }
 0x4cb   :  { %1539 = vmatmul.mubr.f32.vlgmr.msra.gmra.mxu1 %v1472_v49  ;;  %1610 = vmatmul.mubr.f32.vlgmr.msra.gmra.mxu0 %v1472_v49  ;;  %v4909_v49 = vld [vmem:[%s6033_s5 + $0x180] sm:$0xff] }
 0x4cc   :  { %1667 = vmatpush1.msra.mxu1 %v4767_v62  ;;  %1738 = vmatpush1.msra.mxu0 %v4773_v50 }
 0x4cd   :  { %1668 = vmatprep.subr.mxu1 %v4779_v35  ;;  %1739 = vmatprep.subr.mxu0 %v4785_v48 }
 0x4ce   :  { %1669 = vmatpush1.msra.mxu1 %v4791_v41  ;;  %1740 = vmatpush1.msra.mxu0 %v4797_v45 }
 0x4cf   :  { %1670 = vmatprep.subr.mxu1 %v4803_v31  ;;  %1741 = vmatprep.subr.mxu0 %v4809_v32 }
 0x4d0   :  { %1671 = vmatpush1.msra.mxu1 %v4207_v54  ;;  %1742 = vmatpush1.msra.mxu0 %v4212_v55  ;;  %v6229_v54 = vld [vmem:[#allocation16_spill] sm:$0xff]  ;;  %v6230_v55 = vld [vmem:[#allocation17_spill] sm:$0xff] }
 0x4d1   :  { %1672 = vmatprep.subr.mxu1 %v4219_v57  ;;  %1743 = vmatprep.subr.mxu0 %v4224_v58  ;;  %v6231_v57 = vld [vmem:[#allocation18_spill] sm:$0xff]  ;;  %v6232_v58 = vld [vmem:[#allocation19_spill] sm:$0xff] }
 0x4d2   :  { %1673 = vmatpush1.msra.mxu1 %v4231_v60  ;;  %1744 = vmatpush1.msra.mxu0 %v4236_v61  ;;  %v6233_v60 = vld [vmem:[#allocation20_spill] sm:$0xff]  ;;  %v6234_v61 = vld [vmem:[#allocation21_spill] sm:$0xff] }
 0x4d3   :  { %1674 = vmatprep.subr.mxu1 %v4245_v0  ;;  %1745 = vmatprep.subr.mxu0 %v4250_v1  ;;  %v6235_v0 = vld [vmem:[#allocation22_spill] sm:$0xff]  ;;  %v6236_v1 = vld [vmem:[#allocation23_spill] sm:$0xff] }
 0x4d4   :  { %1675 = vmatpush1.msra.mxu1 %v4259_v2  ;;  %1746 = vmatpush1.msra.mxu0 %v4264_v4  ;;  %v6237_v2 = vld [vmem:[#allocation24_spill] sm:$0xff]  ;;  %v6238_v4 = vld [vmem:[#allocation25_spill] sm:$0xff] }
 0x4d5   :  { %1676 = vmatprep.subr.mxu1 %v4271_v5  ;;  %1747 = vmatprep.subr.mxu0 %v4276_v8  ;;  %v6239_v5 = vld [vmem:[#allocation26_spill] sm:$0xff]  ;;  %v6240_v8 = vmov 0.0  }
 0x4d6   :  { %1677 = vmatpush1.msra.mxu1 %v4283_v9  ;;  %1748 = vmatpush1.msra.mxu0 %v4288_v10  ;;  %v6241_v9 = vld [vmem:[#allocation27_spill] sm:$0xff]  ;;  %v6242_v10 = vld [vmem:[#allocation6_spill] sm:$0xff] }
 0x4d7   :  { %1678 = vmatprep.subr.mxu1 %v4295_v11  ;;  %1749 = vmatprep.subr.mxu0 %v4300_v12  ;;  %v6243_v11 = vld [vmem:[#allocation7_spill] sm:$0xff] }
 0x4d8   :  { %1679 = vmatpush1.msra.mxu1 %v4307_v13  ;;  %1750 = vmatpush1.msra.mxu0 %v4312_v14  ;;  %v1467_v14 = vld [vmem:[#allocation2 + $0x30] sm:$0xc0] }
 0x4d9   :  { %1680 = vmatprep.subr.mxu1 %v4319_v15  ;;  %1751 = vmatprep.subr.mxu0 %v4324_v16 }
 0x4da   :  { %1681 = vmatpush1.msra.mxu1 %v4331_v17  ;;  %1752 = vmatpush1.msra.mxu0 %v4336_v18 }
 0x4db   :  { %1682 = vmatprep.subr.mxu1 %v4343_v19  ;;  %1753 = vmatprep.subr.mxu0 %v4348_v20  ;;  %v1468_v19 = vld [vmem:[#allocation2] sm:$0xc0] }
 0x4dc   :  { %1683 = vmatpush1.msra.mxu1 %v4355_v21  ;;  %1754 = vmatpush1.msra.mxu0 %v4360_v22 }
 0x4dd   :  { %1684 = vmatprep.subr.mxu1 %v4367_v23  ;;  %1755 = vmatprep.subr.mxu0 %v4372_v24 }
 0x4de   :  { %1685 = vmatpush1.msra.mxu1 %v4379_v25  ;;  %1756 = vmatpush1.msra.mxu0 %v4384_v26  ;;  %v1470_v25 = vld [vmem:[#allocation2 + $0x18] sm:$0xc0] }
 0x4df   :  { %1686 = vmatprep.subr.mxu1 %v4391_v27  ;;  %1757 = vmatprep.subr.mxu0 %v4396_v28 }
 0x4e0   :  { %1687 = vmatpush1.msra.mxu1 %v4403_v29  ;;  %1758 = vmatpush1.msra.mxu0 %v4408_v30  ;;  %v1469_v29 = vld [vmem:[#allocation2 + $0x58] sm:$0xc0] }
 0x4e1   :  { %1688 = vmatprep.subr.mxu1 %v6206_v39  ;;  %1759 = vmatprep.subr.mxu0 %v6207_v40 }
 0x4e2   :  { %1689 = vmatpush1.msra.mxu1 %v6208_v42  ;;  %1760 = vmatpush1.msra.mxu0 %v6209_v43 }
 0x4e3   :  { %1690 = vmatprep.subr.mxu1 %v6210_v46  ;;  %1761 = vmatprep.subr.mxu0 %v6211_v47 }
 0x4e4   :  { %1691 = vmatpush1.msra.mxu1 %v6212_v51  ;;  %1762 = vmatpush1.msra.mxu0 %v6213_v52  ;;  %v1652_v52 = vrot.slane %v4761_v36, 6  ;;  %v4885_v36 = vld [vmem:[%s6033_s5 + $0x1a0] sm:$0xff] }
 0x4e5   :  { %1692 = vmatprep.subr.mxu1 %v6229_v54  ;;  %1763 = vmatprep.subr.mxu0 %v6230_v55  ;;  %v4915_v54 = vld [vmem:[%s6033_s5 + $0x190] sm:$0xff]  ;;  %v4921_v55 = vld [vmem:[%s6033_s5 + $0x168] sm:$0xff] }
 0x4e6   :  { %1693 = vmatpush1.msra.mxu1 %v6231_v57  ;;  %1764 = vmatpush1.msra.mxu0 %v6232_v58  ;;  %v4927_v57 = vld [vmem:[%s6033_s5 + $0x178] sm:$0xff]  ;;  %v4933_v58 = vld [vmem:[%s6033_s5 + $0x160] sm:$0xff] }
 0x4e7   :  { %1694 = vmatprep.subr.mxu1 %v6233_v60  ;;  %1765 = vmatprep.subr.mxu0 %v6234_v61  ;;  %v4939_v60 = vld [vmem:[%s6033_s5 + $0x170] sm:$0xff]  ;;  %v4945_v61 = vld [vmem:[%s6033_s5 + $0x148] sm:$0xff] }
 0x4e8   :  { %1695 = vmatpush1.msra.mxu1 %v6235_v0  ;;  %1766 = vmatpush1.msra.mxu0 %v6236_v1  ;;  %v4951_v0 = vld [vmem:[%s6033_s5 + $0x158] sm:$0xff]  ;;  %v4957_v1 = vld [vmem:[%s6033_s5 + $0x140] sm:$0xff] }
 0x4e9   :  { %1696 = vmatprep.subr.mxu1 %v6237_v2  ;;  %1767 = vmatprep.subr.mxu0 %v6238_v4  ;;  %v4963_v2 = vld [vmem:[%s6033_s5 + $0x150] sm:$0xff]  ;;  %v4969_v4 = vld [vmem:[%s6033_s5 + $0x128] sm:$0xff] }
 0x4ea   :  { %1697 = vmatpush1.msra.mxu1 %v6239_v5  ;;  %1730 = vmatprep.mubr.f32.mxu1 %v6240_v8  ;;  %v4975_v5 = vld [vmem:[%s6033_s5 + $0x138] sm:$0xff] }
 0x4eb   :  { %1768 = vmatpush1.msra.mxu0 %v6241_v9  ;;  %1801 = vmatprep.mubr.f32.mxu0 %v6240_v8  ;;  %v4981_v9 = vld [vmem:[%s6033_s5 + $0x120] sm:$0xff] }
 0x4ec   :  { %1843 = vmatprep.subr.mxu1 %v6242_v10  ;;  %1914 = vmatprep.subr.mxu0 %v6243_v11 }
 0x58b   :  { %v1540_v12 = vpop.f32.mrf.mxu1  ;;  %v1611_v17 = vpop.f32.mrf.mxu0 }
 0x58c   :  { %v1620_v13 = vrot.slane %v1540_v12, 2  ;;  %v1622_v27 = vrot.slane %v1611_v17, 2  ;;  %v4987_v12 = vld [vmem:[%s6033_s5 + $0x130] sm:$0xff]  ;;  %v5017_v17 = vld [vmem:[%s6033_s5 + $0xe8] sm:$0xff] }
 0x58d   :  { %v1542_v15 = vpop.f32.mrf.mxu1  ;;  %v1613_v23 = vpop.f32.mrf.mxu0 }
 0x58e   :  { %v1628_v16 = vadd.f32 %v1620_v13, %v1467_v14  ;;  %v1621_v18 = vrot.slane %v1542_v15, 2  ;;  %v1623_v24 = vrot.slane %v1613_v23, 2  ;;  %v1630_v39 = vadd.f32 %v1622_v27, %v1469_v29  ;;  %v4993_v13 = vld [vmem:[%s6033_s5 + $0x108] sm:$0xff]  ;;  %v4999_v14 = vld [vmem:[%s6033_s5 + $0x118] sm:$0xff]  ;;  %v5005_v15 = vld [vmem:[%s6033_s5 + $0x100] sm:$0xff] }
 0x58f   :  { %v5053_v23 = vld [vmem:[%s6033_s5 + $0xc0] sm:$0xff]  ;;  %v5089_v29 = vld [vmem:[%s6033_s5 + $0x88] sm:$0xff] }
 0x590   :  { %v3332_v20 = vmul.f32 -1.442695, %v1628_v16  ;;  %v1629_v21 = vadd.f32 %v1621_v18, %v1468_v19  ;;  %v1631_v26 = vadd.f32 %v1623_v24, %v1470_v25  ;;  %v5011_v16 = vld [vmem:[%s6033_s5 + $0x110] sm:$0xff]  ;;  %v5023_v18 = vld [vmem:[%s6033_s5 + $0xf8] sm:$0xff]  ;;  %v5029_v19 = vld [vmem:[%s6033_s5 + $0xe0] sm:$0xff]  ;;  %6244 = vst [vmem:[#allocation8_spill] sm:$0xff] %v5089_v29 }
 0x591   :  { %v5059_v24 = vld [vmem:[%s6033_s5 + $0xd0] sm:$0xff]  ;;  %v5065_v25 = vld [vmem:[%s6033_s5 + $0xa8] sm:$0xff]  ;;  %v5077_v27 = vld [vmem:[%s6033_s5 + $0xa0] sm:$0xff] }
 0x592   :  { %3582 = vpow2.f32 %v3332_v20  ;;  %v3333_v22 = vmul.f32 -1.442695, %v1629_v21  ;;  %v3334_v28 = vmul.f32 -1.442695, %v1631_v26  ;;  %v5035_v20 = vld [vmem:[%s6033_s5 + $0xf0] sm:$0xff]  ;;  %v5041_v21 = vld [vmem:[%s6033_s5 + $0xc8] sm:$0xff] }
 0x593   :  { %v5071_v26 = vld [vmem:[%s6033_s5 + $0xb8] sm:$0xff] }
 0x594   :  { %3584 = vpow2.f32 %v3333_v22  ;;  %v5047_v22 = vld [vmem:[%s6033_s5 + $0xd8] sm:$0xff] }
 0x595   :  { %3586 = vpow2.f32 %v3334_v28  ;;  %v5083_v28 = vld [vmem:[%s6033_s5 + $0xb0] sm:$0xff] }
 0x59f   :  { %v3583_v30 = vpop.eup %3582 }
 0x5a0   :  { %v1635_v40 = vadd.f32 1.0, %v3583_v30  ;;  %v5095_v30 = vld [vmem:[%s6033_s5 + $0x98] sm:$0xff] }
 0x5a1   :  { %v3585_v42 = vpop.eup %3584  ;;  %6245 = vst [vmem:[#allocation9_spill] sm:$0xff] %v5095_v30 }
 0x5a2   :  { %3588 = vrcp.f32 %v1635_v40  ;;  %v1641_v43 = vadd.f32 1.0, %v3585_v42  ;;  %v3587_v46 = vpop.eup %3586  ;;  %v5107_v40 = vld [vmem:[%s6033_s5 + $0x90] sm:$0xff]  ;;  %v5113_v42 = vld [vmem:[%s6033_s5 + $0x68] sm:$0xff] }
 0x5a3   :  { %3590 = vtanh.f32 %v1630_v39  ;;  %v1648_v37 = vadd.f32 1.0, %v3587_v46  ;;  %v5101_v39 = vld [vmem:[%s6033_s5 + $0x80] sm:$0xff]  ;;  %6247 = vst [vmem:[#allocation11_spill] sm:$0xff] %v5107_v40  ;;  %6248 = vst [vmem:[#allocation12_spill] sm:$0xff] %v5113_v42 }
 0x5a4   :  { %3592 = vrcp.f32 %v1641_v43  ;;  %6246 = vst [vmem:[#allocation10_spill] sm:$0xff] %v5101_v39  ;;  %v5119_v43 = vld [vmem:[%s6033_s5 + $0x78] sm:$0xff]  ;;  %v5125_v46 = vld [vmem:[%s6033_s5 + $0x60] sm:$0xff] }
 0x5a5   :  { %3594 = vrcp.f32 %v1648_v37  ;;  %6249 = vst [vmem:[#allocation13_spill] sm:$0xff] %v5119_v43  ;;  %6250 = vst [vmem:[#allocation14_spill] sm:$0xff] %v5125_v46  ;;  %v5155_v37 = vld [vmem:[%s6033_s5 + $0x50] sm:$0xff] }
 0x5a6   :  { %6255 = vst [vmem:[#allocation19_spill] sm:$0xff] %v5155_v37 }
 0x5af   :  { %v3589_v47 = vpop.eup %3588 }
 0x5b0   :  { %v3591_v51 = vpop.eup %3590 }
 0x5b1   :  { %v3593_v33 = vpop.eup %3592  ;;  %v1655_v3 = vmul.f32 %v3591_v51, %v3589_v47  ;;  %v5131_v47 = vld [vmem:[%s6033_s5 + $0x70] sm:$0xff]  ;;  %v5137_v51 = vld [vmem:[%s6033_s5 + $0x48] sm:$0xff] }
 0x5b2   :  { %v1654_v6 = vmul.f32 %v3593_v33, %v1652_v52  ;;  %v3595_v44 = vpop.eup %3594  ;;  %6251 = vst [vmem:[#allocation15_spill] sm:$0xff] %v5131_v47  ;;  %6252 = vst [vmem:[#allocation16_spill] sm:$0xff] %v5137_v51  ;;  %v5143_v52 = vld [vmem:[%s6033_s5 + $0x58] sm:$0xff]  ;;  %v5149_v33 = vld [vmem:[%s6033_s5 + $0x40] sm:$0xff] }
 0x5b3   :  { %6253 = vst [vmem:[#allocation17_spill] sm:$0xff] %v5143_v52  ;;  %6254 = vst [vmem:[#allocation18_spill] sm:$0xff] %v5149_v33 }
 0x5b4   :  { %v4871_v7 = vadd.f32 %v1655_v3, %v1654_v6  ;;  %v5161_v3 = vld [vmem:[%s6033_s5 + $0x28] sm:$0xff]  ;;  %v5167_v6 = vld [vmem:[%s6033_s5 + $0x38] sm:$0xff] }
 0x5b5   :  { %6256 = vst [vmem:[#allocation20_spill] sm:$0xff] %v5161_v3  ;;  %6257 = vst [vmem:[#allocation21_spill] sm:$0xff] %v5167_v6 }
 0x5b6   :  { %3596 = vtanh.f32 %v4871_v7 }
 0x5c3   :  { %v3597_v38 = vpop.eup %3596 }
 0x5c4   :  { %v1658_v63 = vmul.f32 %v3597_v38, %v3595_v44  ;;  %v5173_v44 = vld [vmem:[%s6033_s5 + $0x20] sm:$0xff]  ;;  %v5179_v38 = vld [vmem:[%s6033_s5 + $0x30] sm:$0xff] }
 0x5c5   :  { %6258 = vst [vmem:[#allocation22_spill] sm:$0xff] %v5173_v44  ;;  %6259 = vst [vmem:[#allocation23_spill] sm:$0xff] %v5179_v38 }
 0x5c6   :  { %v1664_v34 = vrot.slane %v1658_v63, 6  ;;  %v5185_v63 = vld [vmem:[%s6033_s5 + $0x8] sm:$0xff] }
 0x5c7   :  { %6260 = vst [vmem:[#allocation24_spill] sm:$0xff] %v5185_v63 }
 0x5c8   :  { %1731 = vmatmul.mubr.f32.vlgmr.msra.gmra.mxu1 %v1664_v34  ;;  %1802 = vmatmul.mubr.f32.vlgmr.msra.gmra.mxu0 %v1664_v34  ;;  %v5191_v34 = vld [vmem:[%s6033_s5 + $0x18] sm:$0xff] }
 0x5c9   :  { %1844 = vmatpush1.msra.mxu1 %v4767_v62  ;;  %1915 = vmatpush1.msra.mxu0 %v4773_v50  ;;  %6261 = vst [vmem:[#allocation25_spill] sm:$0xff] %v5191_v34 }
 0x5ca   :  { %1845 = vmatprep.subr.mxu1 %v4779_v35  ;;  %1916 = vmatprep.subr.mxu0 %v4785_v48 }
 0x5cb   :  { %1846 = vmatpush1.msra.mxu1 %v4791_v41  ;;  %1917 = vmatpush1.msra.mxu0 %v4797_v45 }
 0x5cc   :  { %1847 = vmatprep.subr.mxu1 %v4803_v31  ;;  %1918 = vmatprep.subr.mxu0 %v4809_v32 }
 0x5cd   :  { %1848 = vmatpush1.msra.mxu1 %v4885_v36  ;;  %1919 = vmatpush1.msra.mxu0 %v4891_v56 }
 0x5ce   :  { %1849 = vmatprep.subr.mxu1 %v4897_v59  ;;  %1920 = vmatprep.subr.mxu0 %v4903_v53 }
 0x5cf   :  { %1850 = vmatpush1.msra.mxu1 %v4909_v49  ;;  %1921 = vmatpush1.msra.mxu0 %v4915_v54 }
 0x5d0   :  { %1851 = vmatprep.subr.mxu1 %v4921_v55  ;;  %1922 = vmatprep.subr.mxu0 %v4927_v57 }
 0x5d1   :  { %1852 = vmatpush1.msra.mxu1 %v4933_v58  ;;  %1923 = vmatpush1.msra.mxu0 %v4939_v60 }
 0x5d2   :  { %1853 = vmatprep.subr.mxu1 %v4945_v61  ;;  %1924 = vmatprep.subr.mxu0 %v4951_v0 }
 0x5d3   :  { %1854 = vmatpush1.msra.mxu1 %v4957_v1  ;;  %1925 = vmatpush1.msra.mxu0 %v4963_v2 }
 0x5d4   :  { %1855 = vmatprep.subr.mxu1 %v4969_v4  ;;  %1926 = vmatprep.subr.mxu0 %v4975_v5 }
 0x5d5   :  { %1856 = vmatpush1.msra.mxu1 %v4981_v9  ;;  %1927 = vmatpush1.msra.mxu0 %v4987_v12 }
 0x5d6   :  { %1857 = vmatprep.subr.mxu1 %v4993_v13  ;;  %1928 = vmatprep.subr.mxu0 %v4999_v14 }
 0x5d7   :  { %1858 = vmatpush1.msra.mxu1 %v5005_v15  ;;  %1929 = vmatpush1.msra.mxu0 %v5011_v16 }
 0x5d8   :  { %1859 = vmatprep.subr.mxu1 %v5017_v17  ;;  %1930 = vmatprep.subr.mxu0 %v5023_v18 }
 0x5d9   :  { %1860 = vmatpush1.msra.mxu1 %v5029_v19  ;;  %1931 = vmatpush1.msra.mxu0 %v5035_v20 }
 0x5da   :  { %1861 = vmatprep.subr.mxu1 %v5041_v21  ;;  %1932 = vmatprep.subr.mxu0 %v5047_v22 }
 0x5db   :  { %1862 = vmatpush1.msra.mxu1 %v5053_v23  ;;  %1933 = vmatpush1.msra.mxu0 %v5059_v24 }
 0x5dc   :  { %1863 = vmatprep.subr.mxu1 %v5065_v25  ;;  %1934 = vmatprep.subr.mxu0 %v5071_v26 }
 0x5dd   :  { %1864 = vmatpush1.msra.mxu1 %v5077_v27  ;;  %1935 = vmatpush1.msra.mxu0 %v5083_v28 }
 0x5de   :  { %1865 = vmatprep.subr.mxu1 %v5089_v29  ;;  %1936 = vmatprep.subr.mxu0 %v5095_v30 }
 0x5df   :  { %1866 = vmatpush1.msra.mxu1 %v5101_v39  ;;  %1937 = vmatpush1.msra.mxu0 %v5107_v40 }
 0x5e0   :  { %1867 = vmatprep.subr.mxu1 %v5113_v42  ;;  %1938 = vmatprep.subr.mxu0 %v5119_v43 }
 0x5e1   :  { %1868 = vmatpush1.msra.mxu1 %v5125_v46  ;;  %1939 = vmatpush1.msra.mxu0 %v5131_v47  ;;  %v1662_v46 = vld [vmem:[#allocation2 + $0x38] sm:$0x3] }
 0x5e2   :  { %1869 = vmatprep.subr.mxu1 %v5137_v51  ;;  %1940 = vmatprep.subr.mxu0 %v5143_v52 }
 0x5e3   :  { %1870 = vmatpush1.msra.mxu1 %v5149_v33  ;;  %1941 = vmatpush1.msra.mxu0 %v5155_v37 }
 0x5e4   :  { %1871 = vmatprep.subr.mxu1 %v5161_v3  ;;  %1942 = vmatprep.subr.mxu0 %v5167_v6  ;;  %v1660_v3 = vld [vmem:[#allocation2 + $0x20] sm:$0x3] }
 0x5e5   :  { %1872 = vmatpush1.msra.mxu1 %v5173_v44  ;;  %1943 = vmatpush1.msra.mxu0 %v5179_v38  ;;  %v5197_v44 = vld [vmem:[%s6033_s5] sm:$0xff] }
 0x5e6   :  { %1873 = vmatprep.subr.mxu1 %v5185_v63  ;;  %1944 = vmatprep.subr.mxu0 %v5191_v34  ;;  %6262 = vst [vmem:[#allocation26_spill] sm:$0xff] %v5197_v44  ;;  %v5204_v63 = vld [vmem:[%s6033_s5 + $0x10] sm:$0xff] }
 0x5e7   :  { %1874 = vmatpush1.msra.mxu1 %v5197_v44  ;;  %1907 = vmatprep.mubr.f32.mxu1 %v6240_v8  ;;  %6263 = vst [vmem:[#allocation27_spill] sm:$0xff] %v5204_v63  ;;  %v1659_v34 = vld [vmem:[#allocation2 + $0x50] sm:$0x3] }
 0x5e8   :  { %1945 = vmatpush1.msra.mxu0 %v5204_v63  ;;  %1978 = vmatprep.mubr.f32.mxu0 %v6240_v8  ;;  %v1661_v8 = vld [vmem:[#allocation2 + $0x8] sm:$0x3] }
 0x5e9   :  { %2035 = vmatprep.subr.mxu1 %v6242_v10  ;;  %2106 = vmatprep.subr.mxu0 %v6243_v11 }
 0x688   :  { %v1732_v38 = vpop.f32.mrf.mxu1  ;;  %v1803_v52 = vpop.f32.mrf.mxu0 }
 0x689   :  { %v1808_v6 = vadd.f32 %v1732_v38, %v1659_v34  ;;  %v1810_v10 = vadd.f32 %v1803_v52, %v1661_v8  ;;  %v6268_v52 = vld [vmem:[#allocation15_spill] sm:$0xff] }
 0x68a   :  { %v1734_v44 = vpop.f32.mrf.mxu1  ;;  %v1805_v47 = vpop.f32.mrf.mxu0 }
 0x68b   :  { %v3335_v37 = vmul.f32 -1.442695, %v1808_v6  ;;  %v1809_v33 = vadd.f32 %v1734_v44, %v1660_v3  ;;  %v1811_v63 = vadd.f32 %v1805_v47, %v1662_v46 }
 0x68d   :  { %3598 = vpow2.f32 %v3335_v37  ;;  %v3336_v51 = vmul.f32 -1.442695, %v1809_v33  ;;  %v3337_v43 = vmul.f32 -1.442695, %v1811_v63  ;;  %v1832_v33 = vrot.slane %v4871_v7, 6  ;;  %v6266_v7 = vld [vmem:[#allocation13_spill] sm:$0xff] }
 0x68e   :  { %v6269_v63 = vld [vmem:[#allocation16_spill] sm:$0xff] }
 0x68f   :  { %3600 = vpow2.f32 %v3336_v51 }
 0x690   :  { %3602 = vpow2.f32 %v3337_v43  ;;  %v6267_v43 = vld [vmem:[#allocation14_spill] sm:$0xff] }
 0x69a   :  { %v3599_v42 = vpop.eup %3598 }
 0x69b   :  { %v1815_v40 = vadd.f32 1.0, %v3599_v42 }
 0x69c   :  { %v3601_v11 = vpop.eup %3600 }
 0x69d   :  { %3604 = vrcp.f32 %v1815_v40  ;;  %v1821_v38 = vadd.f32 1.0, %v3601_v11  ;;  %v3603_v6 = vpop.eup %3602  ;;  %v6265_v11 = vld [vmem:[#allocation12_spill] sm:$0xff] }
 0x69e   :  { %3606 = vtanh.f32 %v1810_v10  ;;  %v1828_v44 = vadd.f32 1.0, %v3603_v6  ;;  %v6264_v10 = vld [vmem:[#allocation11_spill] sm:$0xff]  ;;  %v6271_v6 = vld [vmem:[#allocation18_spill] sm:$0xff] }
 0x69f   :  { %3608 = vrcp.f32 %v1821_v38  ;;  %v6270_v38 = vld [vmem:[#allocation17_spill] sm:$0xff] }
 0x6a0   :  { %3610 = vrcp.f32 %v1828_v44  ;;  %v6276_v44 = vld [vmem:[#allocation23_spill] sm:$0xff] }
 0x6aa   :  { %v3605_v3 = vpop.eup %3604 }
 0x6ab   :  { %v3607_v37 = vpop.eup %3606 }
 0x6ac   :  { %v3609_v51 = vpop.eup %3608  ;;  %v1835_v34 = vmul.f32 %v3607_v37, %v3605_v3  ;;  %v6272_v3 = vld [vmem:[#allocation19_spill] sm:$0xff]  ;;  %v6273_v37 = vld [vmem:[#allocation20_spill] sm:$0xff] }
 0x6ad   :  { %v1834_v46 = vmul.f32 %v3609_v51, %v1832_v33  ;;  %v3611_v8 = vpop.eup %3610  ;;  %v6274_v33 = vld [vmem:[#allocation21_spill] sm:$0xff]  ;;  %v6275_v51 = vld [vmem:[#allocation22_spill] sm:$0xff] }
 0x6af   :  { %v5211_v47 = vadd.f32 %v1835_v34, %v1834_v46  ;;  %v6277_v34 = vld [vmem:[#allocation24_spill] sm:$0xff]  ;;  %v6278_v46 = vld [vmem:[#allocation25_spill] sm:$0xff] }
 0x6b1   :  { %3612 = vtanh.f32 %v5211_v47 }
 0x6be   :  { %v3613_v42 = vpop.eup %3612 }
 0x6bf   :  { %v1838_v40 = vmul.f32 %v3613_v42, %v3611_v8  ;;  %v6279_v8 = vld [vmem:[#allocation26_spill] sm:$0xff]  ;;  %v6280_v42 = vmov 0.0  }
 0x6c1   :  { %1908 = vmatmul.mubr.f32.vlgmr.msra.gmra.mxu1 %v1838_v40  ;;  %1979 = vmatmul.mubr.f32.vlgmr.msra.gmra.mxu0 %v1838_v40  ;;  %v6281_v40 = vld [vmem:[#allocation27_spill] sm:$0xff] }
 0x6c2   :  { %2036 = vmatpush1.msra.mxu1 %v4767_v62  ;;  %2107 = vmatpush1.msra.mxu0 %v4773_v50 }
 0x6c3   :  { %2037 = vmatprep.subr.mxu1 %v4779_v35  ;;  %2108 = vmatprep.subr.mxu0 %v4785_v48 }
 0x6c4   :  { %2038 = vmatpush1.msra.mxu1 %v4791_v41  ;;  %2109 = vmatpush1.msra.mxu0 %v4797_v45 }
 0x6c5   :  { %2039 = vmatprep.subr.mxu1 %v4803_v31  ;;  %2110 = vmatprep.subr.mxu0 %v4809_v32 }
 0x6c6   :  { %2040 = vmatpush1.msra.mxu1 %v4885_v36  ;;  %2111 = vmatpush1.msra.mxu0 %v4891_v56 }
 0x6c7   :  { %2041 = vmatprep.subr.mxu1 %v4897_v59  ;;  %2112 = vmatprep.subr.mxu0 %v4903_v53 }
 0x6c8   :  { %2042 = vmatpush1.msra.mxu1 %v4909_v49  ;;  %2113 = vmatpush1.msra.mxu0 %v4915_v54 }
 0x6c9   :  { %2043 = vmatprep.subr.mxu1 %v4921_v55  ;;  %2114 = vmatprep.subr.mxu0 %v4927_v57 }
 0x6ca   :  { %2044 = vmatpush1.msra.mxu1 %v4933_v58  ;;  %2115 = vmatpush1.msra.mxu0 %v4939_v60 }
 0x6cb   :  { %2045 = vmatprep.subr.mxu1 %v4945_v61  ;;  %2116 = vmatprep.subr.mxu0 %v4951_v0 }
 0x6cc   :  { %2046 = vmatpush1.msra.mxu1 %v4957_v1  ;;  %2117 = vmatpush1.msra.mxu0 %v4963_v2 }
 0x6cd   :  { %2047 = vmatprep.subr.mxu1 %v4969_v4  ;;  %2118 = vmatprep.subr.mxu0 %v4975_v5 }
 0x6ce   :  { %2048 = vmatpush1.msra.mxu1 %v4981_v9  ;;  %2119 = vmatpush1.msra.mxu0 %v4987_v12 }
 0x6cf   :  { %2049 = vmatprep.subr.mxu1 %v4993_v13  ;;  %2120 = vmatprep.subr.mxu0 %v4999_v14 }
 0x6d0   :  { %2050 = vmatpush1.msra.mxu1 %v5005_v15  ;;  %2121 = vmatpush1.msra.mxu0 %v5011_v16 }
 0x6d1   :  { %2051 = vmatprep.subr.mxu1 %v5017_v17  ;;  %2122 = vmatprep.subr.mxu0 %v5023_v18 }
 0x6d2   :  { %2052 = vmatpush1.msra.mxu1 %v5029_v19  ;;  %2123 = vmatpush1.msra.mxu0 %v5035_v20 }
 0x6d3   :  { %2053 = vmatprep.subr.mxu1 %v5041_v21  ;;  %2124 = vmatprep.subr.mxu0 %v5047_v22 }
 0x6d4   :  { %2054 = vmatpush1.msra.mxu1 %v5053_v23  ;;  %2125 = vmatpush1.msra.mxu0 %v5059_v24 }
 0x6d5   :  { %2055 = vmatprep.subr.mxu1 %v5065_v25  ;;  %2126 = vmatprep.subr.mxu0 %v5071_v26 }
 0x6d6   :  { %2056 = vmatpush1.msra.mxu1 %v5077_v27  ;;  %2127 = vmatpush1.msra.mxu0 %v5083_v28 }
 0x6d7   :  { %2057 = vmatprep.subr.mxu1 %v5089_v29  ;;  %2128 = vmatprep.subr.mxu0 %v5095_v30 }
 0x6d8   :  { %2058 = vmatpush1.msra.mxu1 %v5101_v39  ;;  %2129 = vmatpush1.msra.mxu0 %v6264_v10 }
 0x6d9   :  { %2059 = vmatprep.subr.mxu1 %v6265_v11  ;;  %2130 = vmatprep.subr.mxu0 %v6266_v7 }
 0x6da   :  { %2060 = vmatpush1.msra.mxu1 %v6267_v43  ;;  %2131 = vmatpush1.msra.mxu0 %v6268_v52 }
 0x6db   :  { %2061 = vmatprep.subr.mxu1 %v6269_v63  ;;  %2132 = vmatprep.subr.mxu0 %v6270_v38 }
 0x6dc   :  { %2062 = vmatpush1.msra.mxu1 %v6271_v6  ;;  %2133 = vmatpush1.msra.mxu0 %v6272_v3  ;;  %v6282_v3 = vld [vmem:[#allocation6_spill] sm:$0xff]  ;;  %v1839_v6 = vld [vmem:[#allocation2 + $0x50] sm:$0xc] }
 0x6dd   :  { %2063 = vmatprep.subr.mxu1 %v6273_v37  ;;  %2134 = vmatprep.subr.mxu0 %v6274_v33  ;;  %v6283_v37 = vld [vmem:[#allocation7_spill] sm:$0xff] }
 0x6de   :  { %2064 = vmatpush1.msra.mxu1 %v6275_v51  ;;  %2135 = vmatpush1.msra.mxu0 %v6276_v44 }
 0x6df   :  { %2065 = vmatprep.subr.mxu1 %v6277_v34  ;;  %2136 = vmatprep.subr.mxu0 %v6278_v46  ;;  %v1840_v46 = vld [vmem:[#allocation2 + $0x20] sm:$0xc] }
 0x6e0   :  { %2066 = vmatpush1.msra.mxu1 %v6279_v8  ;;  %2099 = vmatprep.mubr.f32.mxu1 %v6280_v42 }
 0x6e1   :  { %2137 = vmatpush1.msra.mxu0 %v6281_v40  ;;  %2170 = vmatprep.mubr.f32.mxu0 %v6280_v42  ;;  %v1842_v42 = vld [vmem:[#allocation2 + $0x38] sm:$0xc] }
 0x6e2   :  { %2227 = vmatprep.subr.mxu1 %v6282_v3  ;;  %2298 = vmatprep.subr.mxu0 %v6283_v37  ;;  %v1841_v37 = vld [vmem:[#allocation2 + $0x8] sm:$0xc] }
 0x781   :  { %v1909_v33 = vpop.f32.mrf.mxu1  ;;  %v1980_v34 = vpop.f32.mrf.mxu0 }
 0x782   :  { %v1989_v51 = vrot.slane %v1909_v33, 6  ;;  %v1991_v3 = vrot.slane %v1980_v34, 6 }
 0x783   :  { %v1911_v44 = vpop.f32.mrf.mxu1  ;;  %v1982_v7 = vpop.f32.mrf.mxu0 }
 0x784   :  { %v1997_v38 = vadd.f32 %v1989_v51, %v1839_v6  ;;  %v1990_v63 = vrot.slane %v1911_v44, 6  ;;  %v1992_v40 = vrot.slane %v1982_v7, 6  ;;  %v1999_v33 = vadd.f32 %v1991_v3, %v1841_v37  ;;  %v6285_v3 = vld [vmem:[#allocation9_spill] sm:$0xff]  ;;  %v6286_v37 = vld [vmem:[#allocation10_spill] sm:$0xff] }
 0x786   :  { %v3338_v52 = vmul.f32 -1.442695, %v1997_v38  ;;  %v1998_v8 = vadd.f32 %v1990_v63, %v1840_v46  ;;  %v2000_v11 = vadd.f32 %v1992_v40, %v1842_v42  ;;  %v6287_v46 = vld [vmem:[#allocation11_spill] sm:$0xff]  ;;  %v6289_v42 = vld [vmem:[#allocation13_spill] sm:$0xff]  ;;  %v6290_v40 = vld [vmem:[#allocation14_spill] sm:$0xff] }
 0x788   :  { %3614 = vpow2.f32 %v3338_v52  ;;  %v3339_v43 = vmul.f32 -1.442695, %v1998_v8  ;;  %v3340_v10 = vmul.f32 -1.442695, %v2000_v11  ;;  %v6288_v8 = vld [vmem:[#allocation12_spill] sm:$0xff] }
 0x78a   :  { %3616 = vpow2.f32 %v3339_v43  ;;  %v2021_v43 = vrot.slane %v5211_v47, 6  ;;  %v6284_v47 = vld [vmem:[#allocation8_spill] sm:$0xff] }
 0x78b   :  { %3618 = vpow2.f32 %v3340_v10 }
 0x795   :  { %v3615_v39 = vpop.eup %3614 }
 0x796   :  { %v2004_v30 = vadd.f32 1.0, %v3615_v39 }
 0x797   :  { %v3617_v29 = vpop.eup %3616 }
 0x798   :  { %3620 = vrcp.f32 %v2004_v30  ;;  %v2010_v6 = vadd.f32 1.0, %v3617_v29  ;;  %v3619_v63 = vpop.eup %3618 }
 0x799   :  { %3622 = vtanh.f32 %v1999_v33  ;;  %v2017_v51 = vadd.f32 1.0, %v3619_v63  ;;  %v6291_v33 = vld [vmem:[#allocation15_spill] sm:$0xff]  ;;  %v6293_v63 = vld [vmem:[#allocation17_spill] sm:$0xff] }
 0x79a   :  { %3624 = vrcp.f32 %v2010_v6  ;;  %v6292_v6 = vld [vmem:[#allocation16_spill] sm:$0xff] }
 0x79b   :  { %3626 = vrcp.f32 %v2017_v51  ;;  %v6298_v51 = vld [vmem:[#allocation22_spill] sm:$0xff] }
 0x7a5   :  { %v3621_v52 = vpop.eup %3620 }
 0x7a6   :  { %v3623_v38 = vpop.eup %3622 }
 0x7a7   :  { %v3625_v7 = vpop.eup %3624  ;;  %v2024_v44 = vmul.f32 %v3623_v38, %v3621_v52  ;;  %v6294_v52 = vld [vmem:[#allocation18_spill] sm:$0xff]  ;;  %v6295_v38 = vld [vmem:[#allocation19_spill] sm:$0xff] }
 0x7a8   :  { %v2023_v34 = vmul.f32 %v3625_v7, %v2021_v43  ;;  %v3627_v39 = vpop.eup %3626  ;;  %v6296_v43 = vld [vmem:[#allocation20_spill] sm:$0xff]  ;;  %v6297_v7 = vld [vmem:[#allocation21_spill] sm:$0xff] }
 0x7aa   :  { %v5281_v11 = vadd.f32 %v2024_v44, %v2023_v34  ;;  %v6299_v44 = vld [vmem:[#allocation23_spill] sm:$0xff]  ;;  %v6300_v34 = vld [vmem:[#allocation24_spill] sm:$0xff] }
 0x7ac   :  { %3628 = vtanh.f32 %v5281_v11 }
 0x7b9   :  { %v3629_v10 = vpop.eup %3628 }
 0x7ba   :  { %v2027_v30 = vmul.f32 %v3629_v10, %v3627_v39  ;;  %v6301_v39 = vld [vmem:[#allocation25_spill] sm:$0xff]  ;;  %v6302_v10 = vld [vmem:[#allocation26_spill] sm:$0xff] }
 0x7bc   :  { %v2033_v29 = vrot.slane %v2027_v30, 2  ;;  %v6303_v30 = vmov 0.0  }
 0x7be   :  { %2100 = vmatmul.mubr.f32.vlgmr.msra.gmra.mxu1 %v2033_v29  ;;  %2171 = vmatmul.mubr.f32.vlgmr.msra.gmra.mxu0 %v2033_v29  ;;  %v6304_v29 = vld [vmem:[#allocation27_spill] sm:$0xff] }
 0x7bf   :  { %2228 = vmatpush1.msra.mxu1 %v4767_v62  ;;  %2299 = vmatpush1.msra.mxu0 %v4773_v50 }
 0x7c0   :  { %2229 = vmatprep.subr.mxu1 %v4779_v35  ;;  %2300 = vmatprep.subr.mxu0 %v4785_v48 }
 0x7c1   :  { %2230 = vmatpush1.msra.mxu1 %v4791_v41  ;;  %2301 = vmatpush1.msra.mxu0 %v4797_v45 }
 0x7c2   :  { %2231 = vmatprep.subr.mxu1 %v4803_v31  ;;  %2302 = vmatprep.subr.mxu0 %v4809_v32 }
 0x7c3   :  { %2232 = vmatpush1.msra.mxu1 %v4885_v36  ;;  %2303 = vmatpush1.msra.mxu0 %v4891_v56 }
 0x7c4   :  { %2233 = vmatprep.subr.mxu1 %v4897_v59  ;;  %2304 = vmatprep.subr.mxu0 %v4903_v53 }
 0x7c5   :  { %2234 = vmatpush1.msra.mxu1 %v4909_v49  ;;  %2305 = vmatpush1.msra.mxu0 %v4915_v54 }
 0x7c6   :  { %2235 = vmatprep.subr.mxu1 %v4921_v55  ;;  %2306 = vmatprep.subr.mxu0 %v4927_v57 }
 0x7c7   :  { %2236 = vmatpush1.msra.mxu1 %v4933_v58  ;;  %2307 = vmatpush1.msra.mxu0 %v4939_v60 }
 0x7c8   :  { %2237 = vmatprep.subr.mxu1 %v4945_v61  ;;  %2308 = vmatprep.subr.mxu0 %v4951_v0 }
 0x7c9   :  { %2238 = vmatpush1.msra.mxu1 %v4957_v1  ;;  %2309 = vmatpush1.msra.mxu0 %v4963_v2 }
 0x7ca   :  { %2239 = vmatprep.subr.mxu1 %v4969_v4  ;;  %2310 = vmatprep.subr.mxu0 %v4975_v5 }
 0x7cb   :  { %2240 = vmatpush1.msra.mxu1 %v4981_v9  ;;  %2311 = vmatpush1.msra.mxu0 %v4987_v12 }
 0x7cc   :  { %2241 = vmatprep.subr.mxu1 %v4993_v13  ;;  %2312 = vmatprep.subr.mxu0 %v4999_v14 }
 0x7cd   :  { %2242 = vmatpush1.msra.mxu1 %v5005_v15  ;;  %2313 = vmatpush1.msra.mxu0 %v5011_v16 }
 0x7ce   :  { %2243 = vmatprep.subr.mxu1 %v5017_v17  ;;  %2314 = vmatprep.subr.mxu0 %v5023_v18 }
 0x7cf   :  { %2244 = vmatpush1.msra.mxu1 %v5029_v19  ;;  %2315 = vmatpush1.msra.mxu0 %v5035_v20 }
 0x7d0   :  { %2245 = vmatprep.subr.mxu1 %v5041_v21  ;;  %2316 = vmatprep.subr.mxu0 %v5047_v22 }
 0x7d1   :  { %2246 = vmatpush1.msra.mxu1 %v5053_v23  ;;  %2317 = vmatpush1.msra.mxu0 %v5059_v24 }
 0x7d2   :  { %2247 = vmatprep.subr.mxu1 %v5065_v25  ;;  %2318 = vmatprep.subr.mxu0 %v5071_v26 }
 0x7d3   :  { %2248 = vmatpush1.msra.mxu1 %v5077_v27  ;;  %2319 = vmatpush1.msra.mxu0 %v5083_v28 }
 0x7d4   :  { %2249 = vmatprep.subr.mxu1 %v6284_v47  ;;  %2320 = vmatprep.subr.mxu0 %v6285_v3 }
 0x7d5   :  { %2250 = vmatpush1.msra.mxu1 %v6286_v37  ;;  %2321 = vmatpush1.msra.mxu0 %v6287_v46 }
 0x7d6   :  { %2251 = vmatprep.subr.mxu1 %v6288_v8  ;;  %2322 = vmatprep.subr.mxu0 %v6289_v42 }
 0x7d7   :  { %2252 = vmatpush1.msra.mxu1 %v6290_v40  ;;  %2323 = vmatpush1.msra.mxu0 %v6291_v33 }
 0x7d8   :  { %2253 = vmatprep.subr.mxu1 %v6292_v6  ;;  %2324 = vmatprep.subr.mxu0 %v6293_v63 }
 0x7d9   :  { %2254 = vmatpush1.msra.mxu1 %v6294_v52  ;;  %2325 = vmatpush1.msra.mxu0 %v6295_v38  ;;  %v6305_v38 = vld [vmem:[#allocation6_spill] sm:$0xff]  ;;  %v2028_v52 = vld [vmem:[#allocation2 + $0x50] sm:$0x30] }
 0x7da   :  { %2255 = vmatprep.subr.mxu1 %v6296_v43  ;;  %2326 = vmatprep.subr.mxu0 %v6297_v7  ;;  %v6306_v43 = vld [vmem:[#allocation7_spill] sm:$0xff] }
 0x7db   :  { %2256 = vmatpush1.msra.mxu1 %v6298_v51  ;;  %2327 = vmatpush1.msra.mxu0 %v6299_v44 }
 0x7dc   :  { %2257 = vmatprep.subr.mxu1 %v6300_v34  ;;  %2328 = vmatprep.subr.mxu0 %v6301_v39  ;;  %v2029_v39 = vld [vmem:[#allocation2 + $0x20] sm:$0x30] }
 0x7dd   :  { %2258 = vmatpush1.msra.mxu1 %v6302_v10  ;;  %2291 = vmatprep.mubr.f32.mxu1 %v6303_v30 }
 0x7de   :  { %2329 = vmatpush1.msra.mxu0 %v6304_v29  ;;  %2362 = vmatprep.mubr.f32.mxu0 %v6303_v30  ;;  %v2031_v30 = vld [vmem:[#allocation2 + $0x38] sm:$0x30] }
 0x7df   :  { %2419 = vmatprep.subr.mxu1 %v6305_v38  ;;  %2490 = vmatprep.subr.mxu0 %v6306_v43  ;;  %v2030_v43 = vld [vmem:[#allocation2 + $0x8] sm:$0x30] }
 0x87e   :  { %v2101_v7 = vpop.f32.mrf.mxu1  ;;  %v2172_v34 = vpop.f32.mrf.mxu0 }
 0x87f   :  { %v2181_v51 = vrot.slane %v2101_v7, 4  ;;  %v2183_v38 = vrot.slane %v2172_v34, 4 }
 0x880   :  { %v2103_v44 = vpop.f32.mrf.mxu1  ;;  %v2174_v42 = vpop.f32.mrf.mxu0 }
 0x881   :  { %v2189_v63 = vadd.f32 %v2181_v51, %v2028_v52  ;;  %v2182_v6 = vrot.slane %v2103_v44, 4  ;;  %v2184_v29 = vrot.slane %v2174_v42, 4  ;;  %v2191_v7 = vadd.f32 %v2183_v38, %v2030_v43  ;;  %v6320_v38 = vld [vmem:[#allocation21_spill] sm:$0xff]  ;;  %v6321_v43 = vld [vmem:[#allocation22_spill] sm:$0xff] }
 0x883   :  { %v3341_v33 = vmul.f32 -1.442695, %v2189_v63  ;;  %v2190_v10 = vadd.f32 %v2182_v6, %v2029_v39  ;;  %v2192_v8 = vadd.f32 %v2184_v29, %v2031_v30  ;;  %v6316_v39 = vld [vmem:[#allocation17_spill] sm:$0xff]  ;;  %v6318_v30 = vld [vmem:[#allocation19_spill] sm:$0xff]  ;;  %v6319_v29 = vld [vmem:[#allocation20_spill] sm:$0xff] }
 0x885   :  { %3630 = vpow2.f32 %v3341_v33  ;;  %v3342_v40 = vmul.f32 -1.442695, %v2190_v10  ;;  %v3343_v46 = vmul.f32 -1.442695, %v2192_v8  ;;  %v6317_v10 = vld [vmem:[#allocation18_spill] sm:$0xff] }
 0x887   :  { %3632 = vpow2.f32 %v3342_v40  ;;  %v2213_v40 = vrot.slane %v5281_v11, 6  ;;  %v6315_v11 = vld [vmem:[#allocation16_spill] sm:$0xff] }
 0x888   :  { %3634 = vpow2.f32 %v3343_v46 }
 0x892   :  { %v3631_v37 = vpop.eup %3630 }
 0x893   :  { %v2196_v3 = vadd.f32 1.0, %v3631_v37 }
 0x894   :  { %v3633_v47 = vpop.eup %3632 }
 0x895   :  { %3636 = vrcp.f32 %v2196_v3  ;;  %v2202_v52 = vadd.f32 1.0, %v3633_v47  ;;  %v3635_v6 = vpop.eup %3634 }
 0x896   :  { %3638 = vtanh.f32 %v2191_v7  ;;  %v2209_v51 = vadd.f32 1.0, %v3635_v6  ;;  %v6322_v7 = vld [vmem:[#allocation23_spill] sm:$0xff]  ;;  %v6324_v6 = vld [vmem:[#allocation25_spill] sm:$0xff] }
 0x897   :  { %3640 = vrcp.f32 %v2202_v52  ;;  %v6323_v52 = vld [vmem:[#allocation24_spill] sm:$0xff] }
 0x898   :  { %3642 = vrcp.f32 %v2209_v51  ;;  %v5427_v51 = vld [vmem:[%s6033_s5 + $0x1f8] sm:$0xff] }
 0x899   :  { %6329 = vst [vmem:[#allocation7_spill] sm:$0xff] %v5427_v51 }
 0x8a2   :  { %v3637_v33 = vpop.eup %3636 }
 0x8a3   :  { %v3639_v63 = vpop.eup %3638 }
 0x8a4   :  { %v3641_v42 = vpop.eup %3640  ;;  %v2216_v44 = vmul.f32 %v3639_v63, %v3637_v33  ;;  %v6325_v33 = vld [vmem:[#allocation26_spill] sm:$0xff]  ;;  %v6326_v63 = vmov 0.0  }
 0x8a5   :  { %v2215_v34 = vmul.f32 %v3641_v42, %v2213_v40  ;;  %v3643_v37 = vpop.eup %3642  ;;  %v6327_v40 = vld [vmem:[#allocation27_spill] sm:$0xff] }
 0x8a6   :  { %v5421_v42 = vld [vmem:[%s6033_s5 + $0x1e8] sm:$0xff] }
 0x8a7   :  { %v5351_v8 = vadd.f32 %v2216_v44, %v2215_v34  ;;  %6328 = vst [vmem:[#allocation6_spill] sm:$0xff] %v5421_v42 }
 0x8a9   :  { %3644 = vtanh.f32 %v5351_v8 }
 0x8b6   :  { %v3645_v46 = vpop.eup %3644 }
 0x8b7   :  { %v2219_v3 = vmul.f32 %v3645_v46, %v3643_v37  ;;  %v2220_v37 = vld [vmem:[#allocation2 + $0x50] sm:$0xc0] }
 0x8b9   :  { %v2225_v47 = vrot.slane %v2219_v3, 4 }
 0x8bb   :  { %2292 = vmatmul.mubr.f32.vlgmr.msra.gmra.mxu1 %v2225_v47  ;;  %2363 = vmatmul.mubr.f32.vlgmr.msra.gmra.mxu0 %v2225_v47 }
 0x8bc   :  { %2420 = vmatpush1.msra.mxu1 %v4767_v62  ;;  %2491 = vmatpush1.msra.mxu0 %v4773_v50  ;;  %v6307_v62 = vld [vmem:[#allocation8_spill] sm:$0xff]  ;;  %v6308_v50 = vld [vmem:[#allocation9_spill] sm:$0xff] }
 0x8bd   :  { %2421 = vmatprep.subr.mxu1 %v4779_v35  ;;  %2492 = vmatprep.subr.mxu0 %v4785_v48  ;;  %v6309_v35 = vld [vmem:[#allocation10_spill] sm:$0xff]  ;;  %v6310_v48 = vld [vmem:[#allocation11_spill] sm:$0xff] }
 0x8be   :  { %2422 = vmatpush1.msra.mxu1 %v4791_v41  ;;  %2493 = vmatpush1.msra.mxu0 %v4797_v45  ;;  %v6311_v41 = vld [vmem:[#allocation12_spill] sm:$0xff]  ;;  %v6312_v45 = vld [vmem:[#allocation13_spill] sm:$0xff] }
 0x8bf   :  { %2423 = vmatprep.subr.mxu1 %v4803_v31  ;;  %2494 = vmatprep.subr.mxu0 %v4809_v32  ;;  %v6313_v31 = vld [vmem:[#allocation14_spill] sm:$0xff]  ;;  %v6314_v32 = vld [vmem:[#allocation15_spill] sm:$0xff] }
 0x8c0   :  { %2424 = vmatpush1.msra.mxu1 %v4885_v36  ;;  %2495 = vmatpush1.msra.mxu0 %v4891_v56 }
 0x8c1   :  { %2425 = vmatprep.subr.mxu1 %v4897_v59  ;;  %2496 = vmatprep.subr.mxu0 %v4903_v53 }
 0x8c2   :  { %2426 = vmatpush1.msra.mxu1 %v4909_v49  ;;  %2497 = vmatpush1.msra.mxu0 %v4915_v54 }
 0x8c3   :  { %2427 = vmatprep.subr.mxu1 %v4921_v55  ;;  %2498 = vmatprep.subr.mxu0 %v4927_v57 }
 0x8c4   :  { %2428 = vmatpush1.msra.mxu1 %v4933_v58  ;;  %2499 = vmatpush1.msra.mxu0 %v4939_v60 }
 0x8c5   :  { %2429 = vmatprep.subr.mxu1 %v4945_v61  ;;  %2500 = vmatprep.subr.mxu0 %v4951_v0 }
 0x8c6   :  { %2430 = vmatpush1.msra.mxu1 %v4957_v1  ;;  %2501 = vmatpush1.msra.mxu0 %v4963_v2 }
 0x8c7   :  { %2431 = vmatprep.subr.mxu1 %v4969_v4  ;;  %2502 = vmatprep.subr.mxu0 %v4975_v5 }
 0x8c8   :  { %2432 = vmatpush1.msra.mxu1 %v4981_v9  ;;  %2503 = vmatpush1.msra.mxu0 %v4987_v12 }
 0x8c9   :  { %2433 = vmatprep.subr.mxu1 %v4993_v13  ;;  %2504 = vmatprep.subr.mxu0 %v4999_v14 }
 0x8ca   :  { %2434 = vmatpush1.msra.mxu1 %v5005_v15  ;;  %2505 = vmatpush1.msra.mxu0 %v5011_v16 }
 0x8cb   :  { %2435 = vmatprep.subr.mxu1 %v5017_v17  ;;  %2506 = vmatprep.subr.mxu0 %v5023_v18 }
 0x8cc   :  { %2436 = vmatpush1.msra.mxu1 %v5029_v19  ;;  %2507 = vmatpush1.msra.mxu0 %v5035_v20 }
 0x8cd   :  { %2437 = vmatprep.subr.mxu1 %v5041_v21  ;;  %2508 = vmatprep.subr.mxu0 %v5047_v22 }
 0x8ce   :  { %2438 = vmatpush1.msra.mxu1 %v5053_v23  ;;  %2509 = vmatpush1.msra.mxu0 %v5059_v24 }
 0x8cf   :  { %2439 = vmatprep.subr.mxu1 %v5065_v25  ;;  %2510 = vmatprep.subr.mxu0 %v5071_v26 }
 0x8d0   :  { %2440 = vmatpush1.msra.mxu1 %v5077_v27  ;;  %2511 = vmatpush1.msra.mxu0 %v5083_v28 }
 0x8d1   :  { %2441 = vmatprep.subr.mxu1 %v6307_v62  ;;  %2512 = vmatprep.subr.mxu0 %v6308_v50 }
 0x8d2   :  { %2442 = vmatpush1.msra.mxu1 %v6309_v35  ;;  %2513 = vmatpush1.msra.mxu0 %v6310_v48 }
 0x8d3   :  { %2443 = vmatprep.subr.mxu1 %v6311_v41  ;;  %2514 = vmatprep.subr.mxu0 %v6312_v45 }
 0x8d4   :  { %2444 = vmatpush1.msra.mxu1 %v6313_v31  ;;  %2515 = vmatpush1.msra.mxu0 %v6314_v32 }
 0x8d5   :  { %2445 = vmatprep.subr.mxu1 %v6315_v11  ;;  %2516 = vmatprep.subr.mxu0 %v6316_v39 }
 0x8d6   :  { %2446 = vmatpush1.msra.mxu1 %v6317_v10  ;;  %2517 = vmatpush1.msra.mxu0 %v6318_v30 }
 0x8d7   :  { %2447 = vmatprep.subr.mxu1 %v6319_v29  ;;  %2518 = vmatprep.subr.mxu0 %v6320_v38 }
 0x8d8   :  { %2448 = vmatpush1.msra.mxu1 %v6321_v43  ;;  %2519 = vmatpush1.msra.mxu0 %v6322_v7  ;;  %v2223_v43 = vld [vmem:[#allocation2 + $0x38] sm:$0xc0] }
 0x8d9   :  { %2449 = vmatprep.subr.mxu1 %v6323_v52  ;;  %2520 = vmatprep.subr.mxu0 %v6324_v6 }
 0x8da   :  { %2450 = vmatpush1.msra.mxu1 %v6325_v33  ;;  %2483 = vmatprep.mubr.f32.mxu1 %v6326_v63 }
 0x8db   :  { %2521 = vmatpush1.msra.mxu0 %v6327_v40  ;;  %2554 = vmatprep.mubr.f32.mxu0 %v6326_v63  ;;  %v2221_v63 = vld [vmem:[#allocation2 + $0x20] sm:$0xc0] }
 0x8dc   :  { %2596 = vmatprep.subr.mxu1 %v5421_v42  ;;  %2667 = vmatprep.subr.mxu0 %v5427_v51  ;;  %v2222_v51 = vld [vmem:[#allocation2 + $0x8] sm:$0xc0] }
 0x97b   :  { %v2293_v44 = vpop.f32.mrf.mxu1  ;;  %v2364_v47 = vpop.f32.mrf.mxu0 }
 0x97c   :  { %v2373_v34 = vrot.slane %v2293_v44, 2  ;;  %v2375_v29 = vrot.slane %v2364_v47, 2  ;;  %v5473_v47 = vld [vmem:[%s6033_s5 + $0x1a8] sm:$0xff] }
 0x97d   :  { %v2295_v46 = vpop.f32.mrf.mxu1  ;;  %v2366_v42 = vpop.f32.mrf.mxu0 }
 0x97e   :  { %v2381_v3 = vadd.f32 %v2373_v34, %v2220_v37  ;;  %v2374_v40 = vrot.slane %v2295_v46, 2  ;;  %v2376_v7 = vrot.slane %v2366_v42, 2  ;;  %v2383_v44 = vadd.f32 %v2375_v29, %v2222_v51  ;;  %v5437_v29 = vld [vmem:[%s6033_s5 + $0x1e0] sm:$0xff]  ;;  %v5449_v51 = vld [vmem:[%s6033_s5 + $0x1c8] sm:$0xff]  ;;  %v5455_v37 = vld [vmem:[%s6033_s5 + $0x1d8] sm:$0xff] }
 0x97f   :  { %v5461_v46 = vld [vmem:[%s6033_s5 + $0x1c0] sm:$0xff] }
 0x980   :  { %v3344_v33 = vmul.f32 -1.442695, %v2381_v3  ;;  %v2382_v6 = vadd.f32 %v2374_v40, %v2221_v63  ;;  %v2384_v38 = vadd.f32 %v2376_v7, %v2223_v43  ;;  %v5467_v3 = vld [vmem:[%s6033_s5 + $0x1d0] sm:$0xff] }
 0x982   :  { %3646 = vpow2.f32 %v3344_v33  ;;  %v3345_v52 = vmul.f32 -1.442695, %v2382_v6  ;;  %v3346_v30 = vmul.f32 -1.442695, %v2384_v38 }
 0x984   :  { %3648 = vpow2.f32 %v3345_v52  ;;  %v2405_v52 = vrot.slane %v5351_v8, 6  ;;  %v5443_v8 = vld [vmem:[%s6033_s5 + $0x1f0] sm:$0xff] }
 0x985   :  { %3650 = vpow2.f32 %v3346_v30 }
 0x98f   :  { %v3647_v10 = vpop.eup %3646 }
 0x990   :  { %v2388_v39 = vadd.f32 1.0, %v3647_v10 }
 0x991   :  { %v3649_v11 = vpop.eup %3648 }
 0x992   :  { %3652 = vrcp.f32 %v2388_v39  ;;  %v2394_v34 = vadd.f32 1.0, %v3649_v11  ;;  %v3651_v63 = vpop.eup %3650 }
 0x993   :  { %3654 = vtanh.f32 %v2383_v44  ;;  %v2401_v42 = vadd.f32 1.0, %v3651_v63  ;;  %v5479_v44 = vld [vmem:[%s6033_s5 + $0x1b8] sm:$0xff] }
 0x994   :  { %3656 = vrcp.f32 %v2394_v34 }
 0x995   :  { %3658 = vrcp.f32 %v2401_v42  ;;  %v5567_v42 = vld [vmem:[%s6033_s5 + $0x188] sm:$0xff] }
 0x99f   :  { %v3653_v33 = vpop.eup %3652 }
 0x9a0   :  { %v3655_v6 = vpop.eup %3654 }
 0x9a1   :  { %v3657_v40 = vpop.eup %3656  ;;  %v2408_v43 = vmul.f32 %v3655_v6, %v3653_v33 }
 0x9a2   :  { %v2407_v7 = vmul.f32 %v3657_v40, %v2405_v52  ;;  %v3659_v10 = vpop.eup %3658  ;;  %v5555_v52 = vld [vmem:[%s6033_s5 + $0x1a0] sm:$0xff]  ;;  %v5561_v40 = vld [vmem:[%s6033_s5 + $0x1b0] sm:$0xff] }
 0x9a4   :  { %v5431_v38 = vadd.f32 %v2408_v43, %v2407_v7  ;;  %v5573_v43 = vld [vmem:[%s6033_s5 + $0x198] sm:$0xff]  ;;  %v5579_v7 = vld [vmem:[%s6033_s5 + $0x180] sm:$0xff] }
 0x9a6   :  { %3660 = vtanh.f32 %v5431_v38 }
 0x9b3   :  { %v3661_v30 = vpop.eup %3660 }
 0x9b4   :  { %v2411_v39 = vmul.f32 %v3661_v30, %v3659_v10  ;;  %v5591_v10 = vld [vmem:[%s6033_s5 + $0x168] sm:$0xff]  ;;  %v5597_v30 = vld [vmem:[%s6033_s5 + $0x178] sm:$0xff] }
 0x9b6   :  { %v2417_v11 = vrot.slane %v2411_v39, 6  ;;  %v5603_v39 = vld [vmem:[%s6033_s5 + $0x160] sm:$0xff] }
 0x9b8   :  { %2484 = vmatmul.mubr.f32.vlgmr.msra.gmra.mxu1 %v2417_v11  ;;  %2555 = vmatmul.mubr.f32.vlgmr.msra.gmra.mxu0 %v2417_v11  ;;  %v5609_v11 = vld [vmem:[%s6033_s5 + $0x170] sm:$0xff] }
 0x9b9   :  { %2597 = vmatpush1.msra.mxu1 %v5437_v29  ;;  %2668 = vmatpush1.msra.mxu0 %v5443_v8 }
 0x9ba   :  { %2598 = vmatprep.subr.mxu1 %v5449_v51  ;;  %2669 = vmatprep.subr.mxu0 %v5455_v37 }
 0x9bb   :  { %2599 = vmatpush1.msra.mxu1 %v5461_v46  ;;  %2670 = vmatpush1.msra.mxu0 %v5467_v3 }
 0x9bc   :  { %2600 = vmatprep.subr.mxu1 %v5473_v47  ;;  %2671 = vmatprep.subr.mxu0 %v5479_v44 }
 0x9bd   :  { %2601 = vmatpush1.msra.mxu1 %v4885_v36  ;;  %2672 = vmatpush1.msra.mxu0 %v4891_v56  ;;  %v6330_v36 = vld [vmem:[#allocation16_spill] sm:$0xff]  ;;  %v6331_v56 = vld [vmem:[#allocation17_spill] sm:$0xff] }
 0x9be   :  { %2602 = vmatprep.subr.mxu1 %v4897_v59  ;;  %2673 = vmatprep.subr.mxu0 %v4903_v53  ;;  %v6332_v59 = vld [vmem:[#allocation18_spill] sm:$0xff]  ;;  %v6333_v53 = vld [vmem:[#allocation19_spill] sm:$0xff] }
 0x9bf   :  { %2603 = vmatpush1.msra.mxu1 %v4909_v49  ;;  %2674 = vmatpush1.msra.mxu0 %v4915_v54  ;;  %v6334_v49 = vld [vmem:[#allocation20_spill] sm:$0xff]  ;;  %v6335_v54 = vld [vmem:[#allocation21_spill] sm:$0xff] }
 0x9c0   :  { %2604 = vmatprep.subr.mxu1 %v4921_v55  ;;  %2675 = vmatprep.subr.mxu0 %v4927_v57  ;;  %v6336_v55 = vld [vmem:[#allocation22_spill] sm:$0xff]  ;;  %v6337_v57 = vld [vmem:[#allocation23_spill] sm:$0xff] }
 0x9c1   :  { %2605 = vmatpush1.msra.mxu1 %v4933_v58  ;;  %2676 = vmatpush1.msra.mxu0 %v4939_v60  ;;  %v6338_v58 = vld [vmem:[#allocation24_spill] sm:$0xff]  ;;  %v6339_v60 = vld [vmem:[#allocation25_spill] sm:$0xff] }
 0x9c2   :  { %2606 = vmatprep.subr.mxu1 %v4945_v61  ;;  %2677 = vmatprep.subr.mxu0 %v4951_v0  ;;  %v6340_v61 = vld [vmem:[#allocation26_spill] sm:$0xff]  ;;  %v6341_v0 = vmov 0.0  }
 0x9c3   :  { %2607 = vmatpush1.msra.mxu1 %v4957_v1  ;;  %2678 = vmatpush1.msra.mxu0 %v4963_v2  ;;  %v6342_v1 = vld [vmem:[#allocation27_spill] sm:$0xff]  ;;  %v6343_v2 = vld [vmem:[#allocation6_spill] sm:$0xff] }
 0x9c4   :  { %2608 = vmatprep.subr.mxu1 %v4969_v4  ;;  %2679 = vmatprep.subr.mxu0 %v4975_v5  ;;  %v6344_v4 = vld [vmem:[#allocation7_spill] sm:$0xff]  ;;  %v2412_v5 = vld [vmem:[#allocation2 + $0x28] sm:$0x3] }
 0x9c5   :  { %2609 = vmatpush1.msra.mxu1 %v4981_v9  ;;  %2680 = vmatpush1.msra.mxu0 %v4987_v12 }
 0x9c6   :  { %2610 = vmatprep.subr.mxu1 %v4993_v13  ;;  %2681 = vmatprep.subr.mxu0 %v4999_v14  ;;  %v2413_v13 = vld [vmem:[#allocation2 + $0x48] sm:$0x3] }
 0x9c7   :  { %2611 = vmatpush1.msra.mxu1 %v5005_v15  ;;  %2682 = vmatpush1.msra.mxu0 %v5011_v16 }
 0x9c8   :  { %2612 = vmatprep.subr.mxu1 %v5017_v17  ;;  %2683 = vmatprep.subr.mxu0 %v5023_v18 }
 0x9c9   :  { %2613 = vmatpush1.msra.mxu1 %v5029_v19  ;;  %2684 = vmatpush1.msra.mxu0 %v5035_v20  ;;  %v2415_v20 = vld [vmem:[#allocation2 + $0x40] sm:$0x3] }
 0x9ca   :  { %2614 = vmatprep.subr.mxu1 %v5041_v21  ;;  %2685 = vmatprep.subr.mxu0 %v5047_v22 }
 0x9cb   :  { %2615 = vmatpush1.msra.mxu1 %v5053_v23  ;;  %2686 = vmatpush1.msra.mxu0 %v5059_v24  ;;  %v2414_v23 = vld [vmem:[#allocation2 + $0x10] sm:$0x3] }
 0x9cc   :  { %2616 = vmatprep.subr.mxu1 %v5065_v25  ;;  %2687 = vmatprep.subr.mxu0 %v5071_v26 }
 0x9cd   :  { %2617 = vmatpush1.msra.mxu1 %v5077_v27  ;;  %2688 = vmatpush1.msra.mxu0 %v5083_v28 }
 0x9ce   :  { %2618 = vmatprep.subr.mxu1 %v6307_v62  ;;  %2689 = vmatprep.subr.mxu0 %v6308_v50 }
 0x9cf   :  { %2619 = vmatpush1.msra.mxu1 %v6309_v35  ;;  %2690 = vmatpush1.msra.mxu0 %v6310_v48  ;;  %v2585_v48 = vrot.slane %v5431_v38, 6  ;;  %v5585_v38 = vld [vmem:[%s6033_s5 + $0x190] sm:$0xff] }
 0x9d0   :  { %2620 = vmatprep.subr.mxu1 %v6311_v41  ;;  %2691 = vmatprep.subr.mxu0 %v6312_v45 }
 0x9d1   :  { %2621 = vmatpush1.msra.mxu1 %v6313_v31  ;;  %2692 = vmatpush1.msra.mxu0 %v6314_v32 }
 0x9d2   :  { %2622 = vmatprep.subr.mxu1 %v6330_v36  ;;  %2693 = vmatprep.subr.mxu0 %v6331_v56  ;;  %v5615_v36 = vld [vmem:[%s6033_s5 + $0x148] sm:$0xff]  ;;  %v5621_v56 = vld [vmem:[%s6033_s5 + $0x158] sm:$0xff] }
 0x9d3   :  { %2623 = vmatpush1.msra.mxu1 %v6332_v59  ;;  %2694 = vmatpush1.msra.mxu0 %v6333_v53  ;;  %v5627_v59 = vld [vmem:[%s6033_s5 + $0x140] sm:$0xff]  ;;  %v5633_v53 = vld [vmem:[%s6033_s5 + $0x150] sm:$0xff] }
 0x9d4   :  { %2624 = vmatprep.subr.mxu1 %v6334_v49  ;;  %2695 = vmatprep.subr.mxu0 %v6335_v54  ;;  %v5639_v49 = vld [vmem:[%s6033_s5 + $0x128] sm:$0xff]  ;;  %v5645_v54 = vld [vmem:[%s6033_s5 + $0x138] sm:$0xff] }
 0x9d5   :  { %2625 = vmatpush1.msra.mxu1 %v6336_v55  ;;  %2696 = vmatpush1.msra.mxu0 %v6337_v57  ;;  %v5651_v55 = vld [vmem:[%s6033_s5 + $0x120] sm:$0xff]  ;;  %v5657_v57 = vld [vmem:[%s6033_s5 + $0x130] sm:$0xff] }
 0x9d6   :  { %2626 = vmatprep.subr.mxu1 %v6338_v58  ;;  %2697 = vmatprep.subr.mxu0 %v6339_v60  ;;  %v5663_v58 = vld [vmem:[%s6033_s5 + $0x108] sm:$0xff]  ;;  %v5669_v60 = vld [vmem:[%s6033_s5 + $0x118] sm:$0xff] }
 0x9d7   :  { %2627 = vmatpush1.msra.mxu1 %v6340_v61  ;;  %2660 = vmatprep.mubr.f32.mxu1 %v6341_v0  ;;  %v5675_v61 = vld [vmem:[%s6033_s5 + $0x100] sm:$0xff] }
 0x9d8   :  { %2698 = vmatpush1.msra.mxu0 %v6342_v1  ;;  %2731 = vmatprep.mubr.f32.mxu0 %v6341_v0  ;;  %v5681_v1 = vld [vmem:[%s6033_s5 + $0x110] sm:$0xff] }
 0x9d9   :  { %2788 = vmatprep.subr.mxu1 %v6343_v2  ;;  %2859 = vmatprep.subr.mxu0 %v6344_v4 }
 0xa78   :  { %v2485_v9 = vpop.f32.mrf.mxu1  ;;  %v2556_v17 = vpop.f32.mrf.mxu0 }
 0xa79   :  { %v2561_v12 = vadd.f32 %v2485_v9, %v2412_v5  ;;  %v2563_v25 = vadd.f32 %v2556_v17, %v2414_v23  ;;  %v5687_v5 = vld [vmem:[%s6033_s5 + $0xe8] sm:$0xff]  ;;  %v5693_v9 = vld [vmem:[%s6033_s5 + $0xf8] sm:$0xff]  ;;  %v5729_v17 = vld [vmem:[%s6033_s5 + $0xd0] sm:$0xff] }
 0xa7a   :  { %v2487_v14 = vpop.f32.mrf.mxu1  ;;  %v2558_v19 = vpop.f32.mrf.mxu0  ;;  %v5765_v23 = vld [vmem:[%s6033_s5 + $0x98] sm:$0xff] }
 0xa7b   :  { %v3347_v15 = vmul.f32 -1.442695, %v2561_v12  ;;  %v2562_v16 = vadd.f32 %v2487_v14, %v2413_v13  ;;  %v2564_v21 = vadd.f32 %v2558_v19, %v2415_v20  ;;  %v5699_v12 = vld [vmem:[%s6033_s5 + $0xe0] sm:$0xff]  ;;  %v5705_v13 = vld [vmem:[%s6033_s5 + $0xf0] sm:$0xff]  ;;  %v5711_v14 = vld [vmem:[%s6033_s5 + $0xc8] sm:$0xff]  ;;  %6346 = vst [vmem:[#allocation9_spill] sm:$0xff] %v5765_v23 }
 0xa7c   :  { %v5741_v19 = vld [vmem:[%s6033_s5 + $0xb8] sm:$0xff]  ;;  %v5747_v20 = vld [vmem:[%s6033_s5 + $0xa0] sm:$0xff] }
 0xa7d   :  { %3662 = vpow2.f32 %v3347_v15  ;;  %v3348_v18 = vmul.f32 -1.442695, %v2562_v16  ;;  %v3349_v22 = vmul.f32 -1.442695, %v2564_v21  ;;  %v5717_v15 = vld [vmem:[%s6033_s5 + $0xd8] sm:$0xff]  ;;  %v5723_v16 = vld [vmem:[%s6033_s5 + $0xc0] sm:$0xff] }
 0xa7e   :  { %v5753_v21 = vld [vmem:[%s6033_s5 + $0xb0] sm:$0xff] }
 0xa7f   :  { %3664 = vpow2.f32 %v3348_v18  ;;  %v5735_v18 = vld [vmem:[%s6033_s5 + $0xa8] sm:$0xff] }
 0xa80   :  { %3666 = vpow2.f32 %v3349_v22  ;;  %v5759_v22 = vld [vmem:[%s6033_s5 + $0x88] sm:$0xff] }
 0xa81   :  { %6345 = vst [vmem:[#allocation8_spill] sm:$0xff] %v5759_v22 }
 0xa8a   :  { %v3663_v24 = vpop.eup %3662 }
 0xa8b   :  { %v2568_v26 = vadd.f32 1.0, %v3663_v24  ;;  %v5771_v24 = vld [vmem:[%s6033_s5 + $0x80] sm:$0xff] }
 0xa8c   :  { %v3665_v27 = vpop.eup %3664  ;;  %6347 = vst [vmem:[#allocation10_spill] sm:$0xff] %v5771_v24 }
 0xa8d   :  { %3668 = vrcp.f32 %v2568_v26  ;;  %v2574_v28 = vadd.f32 1.0, %v3665_v27  ;;  %v3667_v62 = vpop.eup %3666  ;;  %v5783_v26 = vld [vmem:[%s6033_s5 + $0x68] sm:$0xff]  ;;  %v5789_v27 = vld [vmem:[%s6033_s5 + $0x78] sm:$0xff] }
 0xa8e   :  { %3670 = vtanh.f32 %v2563_v25  ;;  %v2581_v45 = vadd.f32 1.0, %v3667_v62  ;;  %v5777_v25 = vld [vmem:[%s6033_s5 + $0x90] sm:$0xff]  ;;  %6349 = vst [vmem:[#allocation12_spill] sm:$0xff] %v5783_v26  ;;  %6350 = vst [vmem:[#allocation13_spill] sm:$0xff] %v5789_v27 }
 0xa8f   :  { %3672 = vrcp.f32 %v2574_v28  ;;  %6348 = vst [vmem:[#allocation11_spill] sm:$0xff] %v5777_v25  ;;  %v5795_v28 = vld [vmem:[%s6033_s5 + $0x60] sm:$0xff]  ;;  %v5801_v62 = vld [vmem:[%s6033_s5 + $0x70] sm:$0xff] }
 0xa90   :  { %3674 = vrcp.f32 %v2581_v45  ;;  %6351 = vst [vmem:[#allocation14_spill] sm:$0xff] %v5795_v28  ;;  %6352 = vst [vmem:[#allocation15_spill] sm:$0xff] %v5801_v62  ;;  %v5831_v45 = vld [vmem:[%s6033_s5 + $0x28] sm:$0xff] }
 0xa91   :  { %6357 = vst [vmem:[#allocation20_spill] sm:$0xff] %v5831_v45 }
 0xa9a   :  { %v3669_v50 = vpop.eup %3668 }
 0xa9b   :  { %v3671_v35 = vpop.eup %3670 }
 0xa9c   :  { %v3673_v41 = vpop.eup %3672  ;;  %v2588_v31 = vmul.f32 %v3671_v35, %v3669_v50  ;;  %v5807_v50 = vld [vmem:[%s6033_s5 + $0x48] sm:$0xff]  ;;  %v5813_v35 = vld [vmem:[%s6033_s5 + $0x58] sm:$0xff] }
 0xa9d   :  { %v2587_v32 = vmul.f32 %v3673_v41, %v2585_v48  ;;  %v3675_v63 = vpop.eup %3674  ;;  %6353 = vst [vmem:[#allocation16_spill] sm:$0xff] %v5807_v50  ;;  %6354 = vst [vmem:[#allocation17_spill] sm:$0xff] %v5813_v35  ;;  %v5819_v48 = vld [vmem:[%s6033_s5 + $0x40] sm:$0xff]  ;;  %v5825_v41 = vld [vmem:[%s6033_s5 + $0x50] sm:$0xff] }
 0xa9e   :  { %6355 = vst [vmem:[#allocation18_spill] sm:$0xff] %v5819_v48  ;;  %6356 = vst [vmem:[#allocation19_spill] sm:$0xff] %v5825_v41 }
 0xa9f   :  { %v5541_v34 = vadd.f32 %v2588_v31, %v2587_v32  ;;  %v5837_v31 = vld [vmem:[%s6033_s5 + $0x38] sm:$0xff]  ;;  %v5843_v32 = vld [vmem:[%s6033_s5 + $0x20] sm:$0xff] }
 0xaa0   :  { %6358 = vst [vmem:[#allocation21_spill] sm:$0xff] %v5837_v31  ;;  %6359 = vst [vmem:[#allocation22_spill] sm:$0xff] %v5843_v32 }
 0xaa1   :  { %3676 = vtanh.f32 %v5541_v34 }
 0xaae   :  { %v3677_v33 = vpop.eup %3676 }
 0xaaf   :  { %v2591_v6 = vmul.f32 %v3677_v33, %v3675_v63  ;;  %v5849_v63 = vld [vmem:[%s6033_s5 + $0x30] sm:$0xff]  ;;  %v5855_v33 = vld [vmem:[%s6033_s5 + $0x8] sm:$0xff] }
 0xab0   :  { %6360 = vst [vmem:[#allocation23_spill] sm:$0xff] %v5849_v63  ;;  %6361 = vst [vmem:[#allocation24_spill] sm:$0xff] %v5855_v33 }
 0xab1   :  { %2661 = vmatmul.mubr.f32.vlgmr.msra.gmra.mxu1 %v2591_v6  ;;  %2732 = vmatmul.mubr.f32.vlgmr.msra.gmra.mxu0 %v2591_v6  ;;  %v5861_v6 = vld [vmem:[%s6033_s5 + $0x18] sm:$0xff] }
 0xab2   :  { %2789 = vmatpush1.msra.mxu1 %v5437_v29  ;;  %2860 = vmatpush1.msra.mxu0 %v5443_v8  ;;  %6362 = vst [vmem:[#allocation25_spill] sm:$0xff] %v5861_v6 }
 0xab3   :  { %2790 = vmatprep.subr.mxu1 %v5449_v51  ;;  %2861 = vmatprep.subr.mxu0 %v5455_v37 }
 0xab4   :  { %2791 = vmatpush1.msra.mxu1 %v5461_v46  ;;  %2862 = vmatpush1.msra.mxu0 %v5467_v3 }
 0xab5   :  { %2792 = vmatprep.subr.mxu1 %v5473_v47  ;;  %2863 = vmatprep.subr.mxu0 %v5479_v44 }
 0xab6   :  { %2793 = vmatpush1.msra.mxu1 %v5555_v52  ;;  %2864 = vmatpush1.msra.mxu0 %v5561_v40 }
 0xab7   :  { %2794 = vmatprep.subr.mxu1 %v5567_v42  ;;  %2865 = vmatprep.subr.mxu0 %v5573_v43 }
 0xab8   :  { %2795 = vmatpush1.msra.mxu1 %v5579_v7  ;;  %2866 = vmatpush1.msra.mxu0 %v5585_v38 }
 0xab9   :  { %2796 = vmatprep.subr.mxu1 %v5591_v10  ;;  %2867 = vmatprep.subr.mxu0 %v5597_v30 }
 0xaba   :  { %2797 = vmatpush1.msra.mxu1 %v5603_v39  ;;  %2868 = vmatpush1.msra.mxu0 %v5609_v11 }
 0xabb   :  { %2798 = vmatprep.subr.mxu1 %v5615_v36  ;;  %2869 = vmatprep.subr.mxu0 %v5621_v56 }
 0xabc   :  { %2799 = vmatpush1.msra.mxu1 %v5627_v59  ;;  %2870 = vmatpush1.msra.mxu0 %v5633_v53 }
 0xabd   :  { %2800 = vmatprep.subr.mxu1 %v5639_v49  ;;  %2871 = vmatprep.subr.mxu0 %v5645_v54 }
 0xabe   :  { %2801 = vmatpush1.msra.mxu1 %v5651_v55  ;;  %2872 = vmatpush1.msra.mxu0 %v5657_v57 }
 0xabf   :  { %2802 = vmatprep.subr.mxu1 %v5663_v58  ;;  %2873 = vmatprep.subr.mxu0 %v5669_v60 }
 0xac0   :  { %2803 = vmatpush1.msra.mxu1 %v5675_v61  ;;  %2874 = vmatpush1.msra.mxu0 %v5681_v1 }
 0xac1   :  { %2804 = vmatprep.subr.mxu1 %v5687_v5  ;;  %2875 = vmatprep.subr.mxu0 %v5693_v9 }
 0xac2   :  { %2805 = vmatpush1.msra.mxu1 %v5699_v12  ;;  %2876 = vmatpush1.msra.mxu0 %v5705_v13 }
 0xac3   :  { %2806 = vmatprep.subr.mxu1 %v5711_v14  ;;  %2877 = vmatprep.subr.mxu0 %v5717_v15 }
 0xac4   :  { %2807 = vmatpush1.msra.mxu1 %v5723_v16  ;;  %2878 = vmatpush1.msra.mxu0 %v5729_v17 }
 0xac5   :  { %2808 = vmatprep.subr.mxu1 %v5735_v18  ;;  %2879 = vmatprep.subr.mxu0 %v5741_v19 }
 0xac6   :  { %2809 = vmatpush1.msra.mxu1 %v5747_v20  ;;  %2880 = vmatpush1.msra.mxu0 %v5753_v21 }
 0xac7   :  { %2810 = vmatprep.subr.mxu1 %v5759_v22  ;;  %2881 = vmatprep.subr.mxu0 %v5765_v23 }
 0xac8   :  { %2811 = vmatpush1.msra.mxu1 %v5771_v24  ;;  %2882 = vmatpush1.msra.mxu0 %v5777_v25 }
 0xac9   :  { %2812 = vmatprep.subr.mxu1 %v5783_v26  ;;  %2883 = vmatprep.subr.mxu0 %v5789_v27 }
 0xaca   :  { %2813 = vmatpush1.msra.mxu1 %v5795_v28  ;;  %2884 = vmatpush1.msra.mxu0 %v5801_v62 }
 0xacb   :  { %2814 = vmatprep.subr.mxu1 %v5807_v50  ;;  %2885 = vmatprep.subr.mxu0 %v5813_v35  ;;  %v2593_v35 = vld [vmem:[#allocation2 + $0x48] sm:$0xc] }
 0xacc   :  { %2815 = vmatpush1.msra.mxu1 %v5819_v48  ;;  %2886 = vmatpush1.msra.mxu0 %v5825_v41 }
 0xacd   :  { %2816 = vmatprep.subr.mxu1 %v5831_v45  ;;  %2887 = vmatprep.subr.mxu0 %v5837_v31  ;;  %v2592_v31 = vld [vmem:[#allocation2 + $0x28] sm:$0xc] }
 0xace   :  { %2817 = vmatpush1.msra.mxu1 %v5843_v32  ;;  %2888 = vmatpush1.msra.mxu0 %v5849_v63  ;;  %v5867_v32 = vld [vmem:[%s6033_s5] sm:$0xff] }
 0xacf   :  { %2818 = vmatprep.subr.mxu1 %v5855_v33  ;;  %2889 = vmatprep.subr.mxu0 %v5861_v6  ;;  %6363 = vst [vmem:[#allocation26_spill] sm:$0xff] %v5867_v32  ;;  %v5874_v33 = vld [vmem:[%s6033_s5 + $0x10] sm:$0xff] }
 0xad0   :  { %2819 = vmatpush1.msra.mxu1 %v5867_v32  ;;  %2852 = vmatprep.mubr.f32.mxu1 %v6341_v0  ;;  %6364 = vst [vmem:[#allocation27_spill] sm:$0xff] %v5874_v33 }
 0xad1   :  { %2890 = vmatpush1.msra.mxu0 %v5874_v33  ;;  %2923 = vmatprep.mubr.f32.mxu0 %v6341_v0  ;;  %v2595_v0 = vld [vmem:[#allocation2 + $0x40] sm:$0xc] }
 0xad2   :  { %2980 = vmatprep.subr.mxu1 %v6343_v2  ;;  %3051 = vmatprep.subr.mxu0 %v6344_v4  ;;  %v2594_v4 = vld [vmem:[#allocation2 + $0x10] sm:$0xc] }
 0xb71   :  { %v2662_v6 = vpop.f32.mrf.mxu1  ;;  %v2733_v41 = vpop.f32.mrf.mxu0 }
 0xb72   :  { %v2742_v63 = vrot.slane %v2662_v6, 6  ;;  %v2744_v2 = vrot.slane %v2733_v41, 6 }
 0xb73   :  { %v2664_v45 = vpop.f32.mrf.mxu1  ;;  %v2735_v27 = vpop.f32.mrf.mxu0 }
 0xb74   :  { %v2750_v32 = vadd.f32 %v2742_v63, %v2592_v31  ;;  %v2743_v48 = vrot.slane %v2664_v45, 6  ;;  %v2745_v33 = vrot.slane %v2735_v27, 6  ;;  %v2752_v6 = vadd.f32 %v2744_v2, %v2594_v4 }
 0xb76   :  { %v3350_v50 = vmul.f32 -1.442695, %v2750_v32  ;;  %v2751_v62 = vadd.f32 %v2743_v48, %v2593_v35  ;;  %v2753_v26 = vadd.f32 %v2745_v33, %v2595_v0 }
 0xb78   :  { %3678 = vpow2.f32 %v3350_v50  ;;  %v3351_v28 = vmul.f32 -1.442695, %v2751_v62  ;;  %v3352_v25 = vmul.f32 -1.442695, %v2753_v26 }
 0xb7a   :  { %3680 = vpow2.f32 %v3351_v28  ;;  %v2774_v28 = vrot.slane %v5541_v34, 6  ;;  %v6373_v34 = vld [vmem:[#allocation16_spill] sm:$0xff] }
 0xb7b   :  { %3682 = vpow2.f32 %v3352_v25 }
 0xb85   :  { %v3679_v24 = vpop.eup %3678 }
 0xb86   :  { %v2757_v23 = vadd.f32 1.0, %v3679_v24 }
 0xb87   :  { %v3681_v22 = vpop.eup %3680 }
 0xb88   :  { %3684 = vrcp.f32 %v2757_v23  ;;  %v2763_v45 = vadd.f32 1.0, %v3681_v22  ;;  %v3683_v35 = vpop.eup %3682 }
 0xb89   :  { %3686 = vtanh.f32 %v2752_v6  ;;  %v2770_v48 = vadd.f32 1.0, %v3683_v35 }
 0xb8a   :  { %3688 = vrcp.f32 %v2763_v45 }
 0xb8b   :  { %3690 = vrcp.f32 %v2770_v48 }
 0xb95   :  { %v3685_v50 = vpop.eup %3684 }
 0xb96   :  { %v3687_v62 = vpop.eup %3686 }
 0xb97   :  { %v3689_v27 = vpop.eup %3688  ;;  %v2777_v0 = vmul.f32 %v3687_v62, %v3685_v50 }
 0xb98   :  { %v2776_v41 = vmul.f32 %v3689_v27, %v2774_v28  ;;  %v3691_v24 = vpop.eup %3690 }
 0xb9a   :  { %v5881_v26 = vadd.f32 %v2777_v0, %v2776_v41  ;;  %v3180_v0 = vld [vmem:[%s6035_s7 + $0x78] sm:$0xff]  ;;  %v3179_v41 = vld [vmem:[%s6035_s7 + $0x70] sm:$0xff] }
 0xb9c   :  { %3692 = vtanh.f32 %v5881_v26  ;;  %v2966_v2 = vrot.slane %v5881_v26, 6  ;;  %v3178_v26 = vld [vmem:[%s6035_s7 + $0x68] sm:$0xff] }
 0xba9   :  { %v3693_v25 = vpop.eup %3692 }
 0xbaa   :  { %v2780_v23 = vmul.f32 %v3693_v25, %v3691_v24  ;;  %v3177_v24 = vld [vmem:[%s6035_s7 + $0x60] sm:$0xff]  ;;  %v3176_v25 = vld [vmem:[%s6035_s7 + $0x58] sm:$0xff] }
 0xbac   :  { %v2786_v22 = vrot.slane %v2780_v23, 2  ;;  %v3175_v23 = vld [vmem:[%s6035_s7 + $0x50] sm:$0xff] }
 0xbae   :  { %2853 = vmatmul.mubr.f32.vlgmr.msra.gmra.mxu1 %v2786_v22  ;;  %2924 = vmatmul.mubr.f32.vlgmr.msra.gmra.mxu0 %v2786_v22  ;;  %v3174_v22 = vld [vmem:[%s6035_s7 + $0x48] sm:$0xff] }
 0xbaf   :  { %2981 = vmatpush1.msra.mxu1 %v5437_v29  ;;  %3052 = vmatpush1.msra.mxu0 %v5443_v8  ;;  %v6365_v29 = vld [vmem:[#allocation8_spill] sm:$0xff]  ;;  %v6366_v8 = vld [vmem:[#allocation9_spill] sm:$0xff] }
 0xbb0   :  { %2982 = vmatprep.subr.mxu1 %v5449_v51  ;;  %3053 = vmatprep.subr.mxu0 %v5455_v37  ;;  %v6367_v51 = vld [vmem:[#allocation10_spill] sm:$0xff]  ;;  %v6368_v37 = vld [vmem:[#allocation11_spill] sm:$0xff] }
 0xbb1   :  { %2983 = vmatpush1.msra.mxu1 %v5461_v46  ;;  %3054 = vmatpush1.msra.mxu0 %v5467_v3  ;;  %v6369_v46 = vld [vmem:[#allocation12_spill] sm:$0xff]  ;;  %v6370_v3 = vld [vmem:[#allocation13_spill] sm:$0xff] }
 0xbb2   :  { %2984 = vmatprep.subr.mxu1 %v5473_v47  ;;  %3055 = vmatprep.subr.mxu0 %v5479_v44  ;;  %v6371_v47 = vld [vmem:[#allocation14_spill] sm:$0xff]  ;;  %v6372_v44 = vld [vmem:[#allocation15_spill] sm:$0xff] }
 0xbb3   :  { %2985 = vmatpush1.msra.mxu1 %v5555_v52  ;;  %3056 = vmatpush1.msra.mxu0 %v5561_v40  ;;  %v6374_v52 = vld [vmem:[#allocation17_spill] sm:$0xff]  ;;  %v6375_v40 = vld [vmem:[#allocation18_spill] sm:$0xff] }
 0xbb4   :  { %2986 = vmatprep.subr.mxu1 %v5567_v42  ;;  %3057 = vmatprep.subr.mxu0 %v5573_v43  ;;  %v6376_v42 = vld [vmem:[#allocation19_spill] sm:$0xff]  ;;  %v6377_v43 = vld [vmem:[#allocation20_spill] sm:$0xff] }
 0xbb5   :  { %2987 = vmatpush1.msra.mxu1 %v5579_v7  ;;  %3058 = vmatpush1.msra.mxu0 %v5585_v38  ;;  %v6378_v7 = vld [vmem:[#allocation21_spill] sm:$0xff]  ;;  %v6379_v38 = vld [vmem:[#allocation22_spill] sm:$0xff] }
 0xbb6   :  { %2988 = vmatprep.subr.mxu1 %v5591_v10  ;;  %3059 = vmatprep.subr.mxu0 %v5597_v30  ;;  %v6380_v10 = vld [vmem:[#allocation23_spill] sm:$0xff]  ;;  %v6381_v30 = vld [vmem:[#allocation24_spill] sm:$0xff] }
 0xbb7   :  { %2989 = vmatpush1.msra.mxu1 %v5603_v39  ;;  %3060 = vmatpush1.msra.mxu0 %v5609_v11  ;;  %v6382_v39 = vld [vmem:[#allocation25_spill] sm:$0xff]  ;;  %v6383_v11 = vld [vmem:[#allocation26_spill] sm:$0xff] }
 0xbb8   :  { %2990 = vmatprep.subr.mxu1 %v5615_v36  ;;  %3061 = vmatprep.subr.mxu0 %v5621_v56  ;;  %v6384_v36 = vmov 0.0   ;;  %v6385_v56 = vld [vmem:[#allocation27_spill] sm:$0xff] }
 0xbb9   :  { %2991 = vmatpush1.msra.mxu1 %v5627_v59  ;;  %3062 = vmatpush1.msra.mxu0 %v5633_v53 }
 0xbba   :  { %2992 = vmatprep.subr.mxu1 %v5639_v49  ;;  %3063 = vmatprep.subr.mxu0 %v5645_v54  ;;  %v2781_v49 = vld [vmem:[#allocation2 + $0x28] sm:$0x30] }
 0xbbb   :  { %2993 = vmatpush1.msra.mxu1 %v5651_v55  ;;  %3064 = vmatpush1.msra.mxu0 %v5657_v57 }
 0xbbc   :  { %2994 = vmatprep.subr.mxu1 %v5663_v58  ;;  %3065 = vmatprep.subr.mxu0 %v5669_v60  ;;  %v2782_v60 = vld [vmem:[#allocation2 + $0x48] sm:$0x30] }
 0xbbd   :  { %2995 = vmatpush1.msra.mxu1 %v5675_v61  ;;  %3066 = vmatpush1.msra.mxu0 %v5681_v1 }
 0xbbe   :  { %2996 = vmatprep.subr.mxu1 %v5687_v5  ;;  %3067 = vmatprep.subr.mxu0 %v5693_v9 }
 0xbbf   :  { %2997 = vmatpush1.msra.mxu1 %v5699_v12  ;;  %3068 = vmatpush1.msra.mxu0 %v5705_v13  ;;  %v2784_v13 = vld [vmem:[#allocation2 + $0x40] sm:$0x30] }
 0xbc0   :  { %2998 = vmatprep.subr.mxu1 %v5711_v14  ;;  %3069 = vmatprep.subr.mxu0 %v5717_v15 }
 0xbc1   :  { %2999 = vmatpush1.msra.mxu1 %v5723_v16  ;;  %3070 = vmatpush1.msra.mxu0 %v5729_v17  ;;  %v2783_v17 = vld [vmem:[#allocation2 + $0x10] sm:$0x30] }
 0xbc2   :  { %3000 = vmatprep.subr.mxu1 %v5735_v18  ;;  %3071 = vmatprep.subr.mxu0 %v5741_v19 }
 0xbc3   :  { %3001 = vmatpush1.msra.mxu1 %v5747_v20  ;;  %3072 = vmatpush1.msra.mxu0 %v5753_v21 }
 0xbc4   :  { %3002 = vmatprep.subr.mxu1 %v6365_v29  ;;  %3073 = vmatprep.subr.mxu0 %v6366_v8  ;;  %v3173_v29 = vld [vmem:[%s6035_s7 + $0x40] sm:$0xff]  ;;  %v3172_v8 = vld [vmem:[%s6035_s7 + $0x38] sm:$0xff] }
 0xbc5   :  { %3003 = vmatpush1.msra.mxu1 %v6367_v51  ;;  %3074 = vmatpush1.msra.mxu0 %v6368_v37  ;;  %v3171_v51 = vld [vmem:[%s6035_s7 + $0x30] sm:$0xff]  ;;  %v3170_v37 = vld [vmem:[%s6035_s7 + $0x28] sm:$0xff] }
 0xbc6   :  { %3004 = vmatprep.subr.mxu1 %v6369_v46  ;;  %3075 = vmatprep.subr.mxu0 %v6370_v3  ;;  %v3169_v46 = vld [vmem:[%s6035_s7 + $0x20] sm:$0xff]  ;;  %v3168_v3 = vld [vmem:[%s6035_s7 + $0x18] sm:$0xff] }
 0xbc7   :  { %3005 = vmatpush1.msra.mxu1 %v6371_v47  ;;  %3076 = vmatpush1.msra.mxu0 %v6372_v44  ;;  %v3167_v47 = vld [vmem:[%s6035_s7 + $0x10] sm:$0xff]  ;;  %v3166_v44 = vld [vmem:[%s6035_s7 + $0x8] sm:$0xff] }
 0xbc8   :  { %3006 = vmatprep.subr.mxu1 %v6373_v34  ;;  %3077 = vmatprep.subr.mxu0 %v6374_v52  ;;  %v3165_v34 = vld [vmem:[%s6035_s7] sm:$0xff] }
 0xbc9   :  { %3007 = vmatpush1.msra.mxu1 %v6375_v40  ;;  %3078 = vmatpush1.msra.mxu0 %v6376_v42  ;;  %v2973_v42 = vld [vmem:[#allocation2 + $0x28] sm:$0xc0] }
 0xbca   :  { %3008 = vmatprep.subr.mxu1 %v6377_v43  ;;  %3079 = vmatprep.subr.mxu0 %v6378_v7 }
 0xbcb   :  { %3009 = vmatpush1.msra.mxu1 %v6379_v38  ;;  %3080 = vmatpush1.msra.mxu0 %v6380_v10 }
 0xbcc   :  { %3010 = vmatprep.subr.mxu1 %v6381_v30  ;;  %3081 = vmatprep.subr.mxu0 %v6382_v39  ;;  %v2974_v30 = vld [vmem:[#allocation2 + $0x48] sm:$0xc0] }
 0xbcd   :  { %3011 = vmatpush1.msra.mxu1 %v6383_v11  ;;  %3044 = vmatprep.mubr.f32.mxu1 %v6384_v36 }
 0xbce   :  { %3082 = vmatpush1.msra.mxu0 %v6385_v56  ;;  %3115 = vmatprep.mubr.f32.mxu0 %v6384_v36 }
 0xbcf   :  { %3492 = vmatprep.subr.mxu1 %v6384_v36 }
 0xc6e   :  { %v2854_v59 = vpop.f32.mrf.mxu1  ;;  %v2925_v57 = vpop.f32.mrf.mxu0 }
 0xc6f   :  { %v2934_v53 = vrot.slane %v2854_v59, 4  ;;  %v2936_v15 = vrot.slane %v2925_v57, 4  ;;  %v2975_v57 = vld [vmem:[#allocation2 + $0x10] sm:$0xc0] }
 0xc70   :  { %v2856_v54 = vpop.f32.mrf.mxu1  ;;  %v2927_v9 = vpop.f32.mrf.mxu0 }
 0xc71   :  { %v2942_v55 = vadd.f32 %v2934_v53, %v2781_v49  ;;  %v2935_v58 = vrot.slane %v2856_v54, 4  ;;  %v2937_v12 = vrot.slane %v2927_v9, 4  ;;  %v2944_v19 = vadd.f32 %v2936_v15, %v2783_v17  ;;  %v2976_v49 = vld [vmem:[#allocation2 + $0x40] sm:$0xc0] }
 0xc73   :  { %v3353_v61 = vmul.f32 -1.442695, %v2942_v55  ;;  %v2943_v1 = vadd.f32 %v2935_v58, %v2782_v60  ;;  %v2945_v14 = vadd.f32 %v2937_v12, %v2784_v13 }
 0xc75   :  { %3694 = vpow2.f32 %v3353_v61  ;;  %v3354_v5 = vmul.f32 -1.442695, %v2943_v1  ;;  %v3355_v16 = vmul.f32 -1.442695, %v2945_v14 }
 0xc77   :  { %3696 = vpow2.f32 %v3354_v5 }
 0xc78   :  { %3698 = vpow2.f32 %v3355_v16 }
 0xc82   :  { %v3695_v18 = vpop.eup %3694 }
 0xc83   :  { %v2949_v20 = vadd.f32 1.0, %v3695_v18 }
 0xc84   :  { %v3697_v21 = vpop.eup %3696 }
 0xc85   :  { %3700 = vrcp.f32 %v2949_v20  ;;  %v2955_v31 = vadd.f32 1.0, %v3697_v21  ;;  %v3699_v32 = vpop.eup %3698 }
 0xc86   :  { %3702 = vtanh.f32 %v2944_v19  ;;  %v2962_v6 = vadd.f32 1.0, %v3699_v32 }
 0xc87   :  { %3704 = vrcp.f32 %v2955_v31 }
 0xc88   :  { %3706 = vrcp.f32 %v2962_v6 }
 0xc92   :  { %v3701_v63 = vpop.eup %3700 }
 0xc93   :  { %v3703_v33 = vpop.eup %3702 }
 0xc94   :  { %v3705_v4 = vpop.eup %3704  ;;  %v2969_v45 = vmul.f32 %v3703_v33, %v3701_v63  ;;  %v3359_v63 = vld [vmem:[%s6036_s8] ss:$0 sm:$0xff]  ;;  %s3882_s8 = smov [#allocation3]  }
 0xc95   :  { %v2968_v35 = vmul.f32 %v3705_v4, %v2966_v2  ;;  %v3707_v62 = vpop.eup %3706  ;;  %s3282_s27 = sshll.u32 %s3882_s8, 4  ;;  %s3283_s27 = int_to_ptr.vmem [resolvable:$true] %s3282_s27 }
 0xc96   :  { %s3858_s28 = scalar_lea.vmem %s3283_s27, 32  ;;  %p3863_p1 = scmp.lt.s32.totalorder %s3283_s27, %s3283_s27 }
 0xc97   :  { %v5950_v50 = vadd.f32 %v2969_v45, %v2968_v35  ;;  %p3859_p0 = scmp.ne.s32.totalorder %s3283_s27, %s3858_s28  ;;  %p3864_p2 = scmp.lt.s32.totalorder %s3858_s28, %s3858_s28 }
 0xc99   :  { %3708 = vtanh.f32 %v5950_v50  ;;  %v3158_v14 = vrot.slane %v5950_v50, 6  ;;  %p3865_p3 = por %p3864_p2, %p3863_p1 }
 0xc9b   :  { %p3866_p4 = pnand %p3865_p3, %p3859_p0 }
 0xca6   :  { %v3709_v28 = vpop.eup %3708 }
 0xca7   :  { %v2972_v27 = vmul.f32 %v3709_v28, %v3707_v62 }
 0xca9   :  { %v2978_v48 = vrot.slane %v2972_v27, 4 }
 0xcab   :  { %3045 = vmatmul.mubr.f32.vlgmr.msra.gmra.mxu1 %v2978_v48  ;;  %3116 = vmatmul.mubr.f32.vlgmr.msra.gmra.mxu0 %v2978_v48 }
 0xcac   :  { %3524 = vmatprep.mubr.msk.f32.mxu1 %vm3881_vm1, %v6384_v36  ;;  %3493 = vmatpush3.msra.mxu1 %v3180_v0 }
 0xcad   :  { %3494 = vmatprep.subr.mxu1 %v6384_v36 }
 0xcae   :  { %3495 = vmatpush3.msra.mxu1 %v3179_v41 }
 0xcaf   :  { %3496 = vmatprep.subr.mxu1 %v6384_v36 }
 0xcb0   :  { %3497 = vmatpush3.msra.mxu1 %v3178_v26 }
 0xcb1   :  { %3498 = vmatprep.subr.mxu1 %v6384_v36 }
 0xcb2   :  { %3499 = vmatpush3.msra.mxu1 %v3177_v24 }
 0xcb3   :  { %3500 = vmatprep.subr.mxu1 %v6384_v36 }
 0xcb4   :  { %3501 = vmatpush3.msra.mxu1 %v3176_v25 }
 0xcb5   :  { %3502 = vmatprep.subr.mxu1 %v6384_v36 }
 0xcb6   :  { %3503 = vmatpush3.msra.mxu1 %v3175_v23 }
 0xcb7   :  { %3504 = vmatprep.subr.mxu1 %v6384_v36 }
 0xcb8   :  { %3505 = vmatpush3.msra.mxu1 %v3174_v22 }
 0xcb9   :  { %3506 = vmatprep.subr.mxu1 %v6384_v36 }
 0xcba   :  { %3507 = vmatpush3.msra.mxu1 %v3173_v29 }
 0xcbb   :  { %3508 = vmatprep.subr.mxu1 %v6384_v36 }
 0xcbc   :  { %3509 = vmatpush3.msra.mxu1 %v3172_v8 }
 0xcbd   :  { %3510 = vmatprep.subr.mxu1 %v6384_v36 }
 0xcbe   :  { %3511 = vmatpush3.msra.mxu1 %v3171_v51 }
 0xcbf   :  { %3512 = vmatprep.subr.mxu1 %v6384_v36 }
 0xcc0   :  { %3513 = vmatpush3.msra.mxu1 %v3170_v37 }
 0xcc1   :  { %3514 = vmatprep.subr.mxu1 %v6384_v36 }
 0xcc2   :  { %3515 = vmatpush3.msra.mxu1 %v3169_v46 }
 0xcc3   :  { %3516 = vmatprep.subr.mxu1 %v6384_v36 }
 0xcc4   :  { %3517 = vmatpush3.msra.mxu1 %v3168_v3 }
 0xcc5   :  { %3518 = vmatprep.subr.mxu1 %v6384_v36 }
 0xcc6   :  { %3519 = vmatpush3.msra.mxu1 %v3167_v47 }
 0xcc7   :  { %3520 = vmatprep.subr.mxu1 %v6384_v36 }
 0xcc8   :  { %3521 = vmatpush3.msra.mxu1 %v3166_v44 }
 0xcc9   :  { %3522 = vmatprep.subr.mxu1 %v6384_v36 }
 0xcca   :  { %3523 = vmatpush3.msra.mxu1 %v3165_v34 }
 0xd6b   :  { %v3046_v52 = vpop.f32.mrf.mxu1  ;;  %v3117_v38 = vpop.f32.mrf.mxu0 }
 0xd6c   :  { %v3126_v40 = vrot.slane %v3046_v52, 2  ;;  %v3128_v55 = vrot.slane %v3117_v38, 2 }
 0xd6d   :  { %v3048_v43 = vpop.f32.mrf.mxu1  ;;  %v3119_v59 = vpop.f32.mrf.mxu0 }
 0xd6e   :  { %v3134_v7 = vadd.f32 %v3126_v40, %v2973_v42  ;;  %v3127_v10 = vrot.slane %v3048_v43, 2  ;;  %v3129_v53 = vrot.slane %v3119_v59, 2  ;;  %v3136_v60 = vadd.f32 %v3128_v55, %v2975_v57 }
 0xd70   :  { %v3356_v39 = vmul.f32 -1.442695, %v3134_v7  ;;  %v3135_v11 = vadd.f32 %v3127_v10, %v2974_v30  ;;  %v3137_v54 = vadd.f32 %v3129_v53, %v2976_v49 }
 0xd72   :  { %3710 = vpow2.f32 %v3356_v39  ;;  %v3357_v56 = vmul.f32 -1.442695, %v3135_v11  ;;  %v3358_v36 = vmul.f32 -1.442695, %v3137_v54 }
 0xd74   :  { %3712 = vpow2.f32 %v3357_v56 }
 0xd75   :  { %3714 = vpow2.f32 %v3358_v36 }
 0xd7f   :  { %v3711_v58 = vpop.eup %3710 }
 0xd80   :  { %v3141_v61 = vadd.f32 1.0, %v3711_v58 }
 0xd81   :  { %v3713_v1 = vpop.eup %3712 }
 0xd82   :  { %3716 = vrcp.f32 %v3141_v61  ;;  %v3147_v5 = vadd.f32 1.0, %v3713_v1  ;;  %v3715_v9 = vpop.eup %3714 }
 0xd83   :  { %3718 = vtanh.f32 %v3136_v60  ;;  %v3154_v16 = vadd.f32 1.0, %v3715_v9 }
 0xd84   :  { %3720 = vrcp.f32 %v3147_v5 }
 0xd85   :  { %3722 = vrcp.f32 %v3154_v16 }
 0xd8f   :  { %v3717_v12 = vpop.eup %3716 }
 0xd90   :  { %v3719_v13 = vpop.eup %3718 }
 0xd91   :  { %v3721_v15 = vpop.eup %3720  ;;  %v3161_v17 = vmul.f32 %v3719_v13, %v3717_v12 }
 0xd92   :  { %v3160_v18 = vmul.f32 %v3721_v15, %v3158_v14  ;;  %v3723_v20 = vpop.eup %3722 }
 0xd94   :  { %v3162_v19 = vadd.f32 %v3161_v17, %v3160_v18 }
 0xd96   :  { %3724 = vtanh.f32 %v3162_v19 }
 0xda3   :  { %v3725_v21 = vpop.eup %3724 }
 0xda4   :  { %v3164_v31 = vmul.f32 %v3725_v21, %v3723_v20 }
 0xda6   :  { %v3189_v32 = vrot.slane %v3164_v31, 6 }
 0xda8   :  { %3525 = vmatmul.mubr.f32.vlgmr.msra.gmra.mxu1 %v3189_v32 }
 0xe68   :  { %v3257_v33 = vpop.f32.mrf.mxu1 }
 0xe69   :  { %v3258_v2 = vadd.f32 %v3359_v63, %v3257_v33 }
 0xe6a   :  { %v3526_v4 = vpop.f32.mrf.mxu1 }
 0xe6b   :  { %v3262_v6 = vsel %vm3261_vm7, %v3258_v2, -inf }
 0xe6c   :  { %3263 = vmax.xlane.f32.xlu0 %v3262_v6 }
 0xef5   :  { %v3264_v45 = vpop.xlane.xlu0 %3263 }
 0xef6   :  { %v3265_v35 = vsub.f32 %v3258_v2, %v3264_v45 }
 0xef8   :  { %v3266_v50 = vmul.f32 1.442695, %v3265_v35 }
 0xefa   :  { %3726 = vpow2.f32 %v3266_v50 }
 0xf07   :  { %v3727_v62 = vpop.eup %3726 }
 0xf08   :  { %v3268_v28 = vsel %vm3261_vm7, %v3727_v62, 0.0 }
 0xf09   :  { %3269 = vadd.xlane.f32.xlu0 %v3268_v28 }
 0xf92   :  { %v3270_v27 = vpop.xlane.xlu0 %3269 }
 0xf93   :  { %3728 = vlog2.f32 %v3270_v27 }
 0xfa0   :  { %v3729_v48 = vpop.eup %3728 }
 0xfa1   :  { %v3272_v0 = vmul.f32 0.6931472, %v3729_v48 }
 0xfa3   :  { %v3273_v41 = vadd.f32 %v3272_v0, %v3264_v45 }
 0xfa5   :  { %v3274_v26 = vsub.f32 %v3258_v2, %v3273_v41 }
 0xfa7   :  { %3275 = vst.msk [vmem:[#allocation3] sm:$0x3] %vm3261_vm7, %v3274_v26 }
 0xfa8   :  { %3869 = shalt.err (!%p3866_p4)
}
 0xfa9   :  { %3285 = dma.vmem_to_hbm [thread:$0]  %s3283_s27, 32, %s6037_s9, [#allocation4]  }
 0xfaa   :  { %3878 = dma.done.wait [#allocation4], 32  }
 0xfab   :  { %3879 = vsyncadd [#allocation4], 4294967264 }
 0xfac   :  { %3289 = vsyncpa [#allocation4], 1 }

</bundles_post_ra>
